<compile_context>
chip_gen: v5e
topology: v5e:2x2
jax: 0.10.0
libtpu: 0.0.40
codegen_flags: <defaults>
</compile_context>

<pallas_src>
import functools

import jax
import jax.numpy as jnp
from jax import lax
from jax.experimental import pallas as pl
from jax.experimental.pallas import tpu as pltpu

INPUT_SIZE = 2
HIDDEN = 200
NUM_CLASSES = 10

HP = 256        # HIDDEN zero-padded to one clean 256-lane / 256x256-MXU tile
OUT_PAD = 128   # lane-dense head output; real logits are the first NUM_CLASSES cols


def rnn_kernel(T, B, x_ref,
               wih0_ref, b0_ref, whh0_ref,
               wih1_ref, whh1_ref, b1_ref,
               wout_ref, bout_ref,
               out_ref,
               xp_ref):
    # x_ref   : (T*B, INPUT_SIZE)   time-major, batch padded to a sublane multiple
    # wih0_ref: (INPUT_SIZE, HP)    b0_ref: (1, HP)       whh0_ref: (HP, HP)
    # wih1_ref: (HP, HP)            whh1_ref: (HP, HP)    b1_ref: (1, HP)
    # wout_ref: (HP, OUT_PAD)       bout_ref: (1, OUT_PAD)
    # out_ref : (B, OUT_PAD)        xp_ref: VMEM scratch (T*B, HP)

    # Hoisted input projection, done on the VPU: a K=2 MXU matmul is almost pure
    # fill/weight-push overhead, so use two broadcast FMAs instead.  One-time,
    # off the serial recurrence path; includes the pre-summed layer-0 biases.
    x = x_ref[...]                                       # (T*B, 2)
    w0 = wih0_ref[...]                                   # (2, HP)
    xp_ref[...] = (x[:, 0:1] * w0[0:1, :]
                   + x[:, 1:2] * w0[1:2, :]
                   + b0_ref[...])

    # Bias broadcast hoisted out of the unrolled loop (JAX does not CSE
    # broadcast_in_dim; keep a single (B, HP) copy live instead of 8 rebuilds).
    b1b = jnp.broadcast_to(b1_ref[...], (B, HP))

    h0 = jnp.zeros((B, HP), jnp.float32)                 # initial hidden (rnn(x, None))
    h1 = jnp.zeros((B, HP), jnp.float32)

    # T is small and static -> unrolled time loop.  Per step, three K=256
    # matmuls; h1_pre depends only on h1_{t-1}, so it is independent of the
    # layer-0 recurrent dot and the scheduler can overlap the two.
    # TODO(synk): if a bundle dump shows Mosaic re-pushing the loop-invariant
    #             recurrent RHS weights every step, drive the MXU explicitly
    #             with pltpu.matmul_push_rhs / matmul_acc_lhs / matmul_pop.
    for t in range(T):
        x_t = xp_ref[pl.ds(t * B, B), :]                 # (B, HP) precomputed x-proj
        h1_pre = jnp.dot(h1, whh1_ref[...],
                         preferred_element_type=jnp.float32)
        h0 = lax.tanh(x_t + jnp.dot(h0, whh0_ref[...],
                                    preferred_element_type=jnp.float32))
        h1 = lax.tanh(h1_pre
                      + jnp.dot(h0, wih1_ref[...],
                                preferred_element_type=jnp.float32)
                      + b1b)

    # Linear head on the last timestep of the top layer (lane-dense padded out).
    out_ref[...] = (jnp.dot(h1, wout_ref[...], preferred_element_type=jnp.float32)
                    + bout_ref[...])


def _pad_to(a, shape):
    return jnp.pad(a, [(0, s - d) for d, s in zip(a.shape, shape)])


def prepare_kernel_weights(p):
    """Zero-pad HIDDEN->HP and NUM_CLASSES->OUT_PAD (exact: padded rows/cols are 0)."""
    wih0 = _pad_to(p["wih0"], (INPUT_SIZE, HP))
    b0 = _pad_to(p["b0"], (1, HP))
    whh0 = _pad_to(p["whh0"], (HP, HP))
    wih1 = _pad_to(p["wih1"], (HP, HP))
    whh1 = _pad_to(p["whh1"], (HP, HP))
    b1 = _pad_to(p["b1"], (1, HP))
    wout = _pad_to(p["wout"], (HP, OUT_PAD))
    bout = _pad_to(p["bout"], (1, OUT_PAD))
    return wih0, b0, whh0, wih1, whh1, b1, wout, bout


@jax.jit
def rnn_forward(x, params):
    B, T, _ = x.shape
    Bp = max(8, ((B + 7) // 8) * 8)                      # sublane-aligned batch

    # Pad batch with zero rows, go time-major and flatten so each step's rows
    # are a contiguous, sublane-aligned (Bp, HP) slab of the xp scratch.
    # (All of this + the final slice fuses under the enclosing jit.)
    x_p = jnp.pad(x, ((0, Bp - B), (0, 0), (0, 0)))
    x_tm = jnp.transpose(x_p, (1, 0, 2)).reshape(T * Bp, INPUT_SIZE)

    weights = prepare_kernel_weights(params)
    vmem = pl.BlockSpec(memory_space=pltpu.MemorySpace.VMEM)
    n_in = 1 + len(weights)

    flops = (3 * 2 * T * Bp * HP * HP          # three recurrent/inter-layer dots per step
             + 2 * T * Bp * INPUT_SIZE * HP    # hoisted input projection (VPU)
             + 2 * Bp * HP * OUT_PAD)          # head
    bytes_accessed = 4 * (T * Bp * INPUT_SIZE + INPUT_SIZE * HP + 3 * HP * HP
                          + HP * OUT_PAD + 2 * HP + OUT_PAD + Bp * OUT_PAD)

    out = pl.pallas_call(
        functools.partial(rnn_kernel, T, Bp),
        out_shape=jax.ShapeDtypeStruct((Bp, OUT_PAD), jnp.float32),
        in_specs=[vmem] * n_in,
        out_specs=vmem,
        scratch_shapes=[pltpu.VMEM((T * Bp, HP), jnp.float32)],
        cost_estimate=pl.CostEstimate(flops=flops,
                                      transcendentals=2 * T * Bp * HP,
                                      bytes_accessed=bytes_accessed),
    )(x_tm, *weights)

    return out[:B, :NUM_CLASSES]


def init_params(key):
    """PyTorch-style uniform(-1/sqrt(H), 1/sqrt(H)) init, deterministic.

    Stored already transposed to (K, N) layout (unpadded); padding for the
    kernel happens in prepare_kernel_weights.
    """
    ks = jax.random.split(key, 10)
    bound = 1.0 / jnp.sqrt(jnp.float32(HIDDEN))

    def u(k, shape):
        return jax.random.uniform(k, shape, jnp.float32, -bound, bound)

    wih0 = u(ks[0], (HIDDEN, INPUT_SIZE)).T
    whh0 = u(ks[1], (HIDDEN, HIDDEN)).T
    b0 = (u(ks[2], (HIDDEN,)) + u(ks[3], (HIDDEN,))).reshape(1, HIDDEN)
    wih1 = u(ks[4], (HIDDEN, HIDDEN)).T
    whh1 = u(ks[5], (HIDDEN, HIDDEN)).T
    b1 = (u(ks[6], (HIDDEN,)) + u(ks[7], (HIDDEN,))).reshape(1, HIDDEN)
    wout = u(ks[8], (NUM_CLASSES, HIDDEN)).T
    bout = u(ks[9], (NUM_CLASSES,)).reshape(1, NUM_CLASSES)
    return dict(wih0=wih0, whh0=whh0, b0=b0,
                wih1=wih1, whh1=whh1, b1=b1,
                wout=wout, bout=bout)


def rnn_reference(x, p):
    """Pure-JAX reference of the same forward (unpadded, f32)."""
    B, T, _ = x.shape
    h0 = jnp.zeros((B, HIDDEN), jnp.float32)
    h1 = jnp.zeros((B, HIDDEN), jnp.float32)
    for t in range(T):
        x_t = x[:, t, :]
        h0 = jnp.tanh(x_t @ p["wih0"] + h0 @ p["whh0"] + p["b0"])
        h1 = jnp.tanh(h0 @ p["wih1"] + h1 @ p["whh1"] + p["b1"])
    return h1 @ p["wout"] + p["bout"]


if __name__ == "__main__":
    key = jax.random.PRNGKey(0)
    k_x, k_p = jax.random.split(key)

    B, T = 2, 8
    x = jax.random.normal(k_x, (B, T, INPUT_SIZE), jnp.float32)
    params = init_params(k_p)

    out = rnn_forward(x, params)
    out = jax.block_until_ready(out)

    ref = rnn_reference(x, params)
    assert out.shape == (B, NUM_CLASSES)
    assert jnp.allclose(out, ref, rtol=1e-4, atol=1e-4)

    print("KERNEL_OK")
</pallas_src>

<mosaic_0001>
module attributes {stable_mosaic.version = 11 : i64} {
  func.func @rnn_kernel(%arg0: memref<64x2xf32, #tpu.memory_space<vmem>>, %arg1: memref<2x256xf32, #tpu.memory_space<vmem>>, %arg2: memref<1x256xf32, #tpu.memory_space<vmem>>, %arg3: memref<256x256xf32, #tpu.memory_space<vmem>>, %arg4: memref<256x256xf32, #tpu.memory_space<vmem>>, %arg5: memref<256x256xf32, #tpu.memory_space<vmem>>, %arg6: memref<1x256xf32, #tpu.memory_space<vmem>>, %arg7: memref<256x128xf32, #tpu.memory_space<vmem>>, %arg8: memref<1x128xf32, #tpu.memory_space<vmem>>, %arg9: memref<8x128xf32, #tpu.memory_space<vmem>>, %arg10: memref<64x256xf32, #tpu.memory_space<vmem>>) attributes {dimension_semantics = [], scalar_prefetch = 0 : i64, scratch_operands = 1 : i64, tpu.core_type = #tpu.core_type<tc>} {
    %c0 = arith.constant 0 : index
    %c0_0 = arith.constant 0 : index
    %0 = vector.load %arg0[%c0, %c0_0] : memref<64x2xf32, #tpu.memory_space<vmem>>, vector<64x2xf32>
    %c0_1 = arith.constant 0 : index
    %c0_2 = arith.constant 0 : index
    %1 = vector.load %arg1[%c0_1, %c0_2] : memref<2x256xf32, #tpu.memory_space<vmem>>, vector<2x256xf32>
    %2 = vector.extract_strided_slice %0 {offsets = [0, 0], sizes = [64, 1], strides = [1, 1]} : vector<64x2xf32> to vector<64x1xf32>
    %3 = vector.extract_strided_slice %1 {offsets = [0, 0], sizes = [1, 256], strides = [1, 1]} : vector<2x256xf32> to vector<1x256xf32>
    %4 = vector.broadcast %2 : vector<64x1xf32> to vector<64x256xf32>
    %5 = vector.broadcast %3 : vector<1x256xf32> to vector<64x256xf32>
    %6 = arith.mulf %4, %5 : vector<64x256xf32>
    %7 = vector.extract_strided_slice %0 {offsets = [0, 1], sizes = [64, 1], strides = [1, 1]} : vector<64x2xf32> to vector<64x1xf32>
    %8 = vector.extract_strided_slice %1 {offsets = [1, 0], sizes = [1, 256], strides = [1, 1]} : vector<2x256xf32> to vector<1x256xf32>
    %9 = vector.broadcast %7 : vector<64x1xf32> to vector<64x256xf32>
    %10 = vector.broadcast %8 : vector<1x256xf32> to vector<64x256xf32>
    %11 = arith.mulf %9, %10 : vector<64x256xf32>
    %12 = arith.addf %6, %11 : vector<64x256xf32>
    %c0_3 = arith.constant 0 : index
    %c0_4 = arith.constant 0 : index
    %13 = vector.load %arg2[%c0_3, %c0_4] : memref<1x256xf32, #tpu.memory_space<vmem>>, vector<1x256xf32>
    %14 = vector.broadcast %13 : vector<1x256xf32> to vector<64x256xf32>
    %15 = arith.addf %12, %14 : vector<64x256xf32>
    %c0_5 = arith.constant 0 : index
    %c0_6 = arith.constant 0 : index
    %16 = vector.load %arg10[%c0_5, %c0_6] : memref<64x256xf32, #tpu.memory_space<vmem>>, vector<64x256xf32>
    tpu.vector_store %arg10[%c0_5, %c0_6], %15 {strides = array<i32>} : memref<64x256xf32, #tpu.memory_space<vmem>>, vector<64x256xf32>,
    %c0_7 = arith.constant 0 : index
    %c0_8 = arith.constant 0 : index
    %17 = vector.load %arg6[%c0_7, %c0_8] : memref<1x256xf32, #tpu.memory_space<vmem>>, vector<1x256xf32>
    %18 = vector.shape_cast %17 : vector<1x256xf32> to vector<1x256xf32>
    %19 = vector.broadcast %18 : vector<1x256xf32> to vector<8x256xf32>
    %cst = arith.constant 0.000000e+00 : f32
    %20 = vector.broadcast %cst : f32 to vector<8x256xf32>
    %cst_9 = arith.constant 0.000000e+00 : f32
    %21 = vector.broadcast %cst_9 : f32 to vector<8x256xf32>
    %c0_10 = arith.constant 0 : index
    %c0_11 = arith.constant 0 : index
    %22 = vector.load %arg10[%c0_10, %c0_11] : memref<64x256xf32, #tpu.memory_space<vmem>>, vector<8x256xf32>
    %c0_12 = arith.constant 0 : index
    %c0_13 = arith.constant 0 : index
    %23 = vector.load %arg5[%c0_12, %c0_13] : memref<256x256xf32, #tpu.memory_space<vmem>>, vector<256x256xf32>
    %cst_14 = arith.constant dense<0.000000e+00> : vector<8x256xf32>
    %24 = tpu.matmul %21, %23, %cst_14 {dimension_numbers = #tpu.dot_dimension_numbers<[1], [0], [0], [1], [0, 0, 1, 1], [], []>} : vector<8x256xf32>, vector<256x256xf32>, vector<8x256xf32> -> vector<8x256xf32>
    %c0_15 = arith.constant 0 : index
    %c0_16 = arith.constant 0 : index
    %25 = vector.load %arg3[%c0_15, %c0_16] : memref<256x256xf32, #tpu.memory_space<vmem>>, vector<256x256xf32>
    %cst_17 = arith.constant dense<0.000000e+00> : vector<8x256xf32>
    %26 = tpu.matmul %20, %25, %cst_17 {dimension_numbers = #tpu.dot_dimension_numbers<[1], [0], [0], [1], [0, 0, 1, 1], [], []>} : vector<8x256xf32>, vector<256x256xf32>, vector<8x256xf32> -> vector<8x256xf32>
    %27 = arith.addf %22, %26 : vector<8x256xf32>
    %28 = math.tanh %27 : vector<8x256xf32>
    %c0_18 = arith.constant 0 : index
    %c0_19 = arith.constant 0 : index
    %29 = vector.load %arg4[%c0_18, %c0_19] : memref<256x256xf32, #tpu.memory_space<vmem>>, vector<256x256xf32>
    %cst_20 = arith.constant dense<0.000000e+00> : vector<8x256xf32>
    %30 = tpu.matmul %28, %29, %cst_20 {dimension_numbers = #tpu.dot_dimension_numbers<[1], [0], [0], [1], [0, 0, 1, 1], [], []>} : vector<8x256xf32>, vector<256x256xf32>, vector<8x256xf32> -> vector<8x256xf32>
    %31 = arith.addf %24, %30 : vector<8x256xf32>
    %32 = arith.addf %31, %19 : vector<8x256xf32>
    %33 = math.tanh %32 : vector<8x256xf32>
    %c8 = arith.constant 8 : index
    %c0_21 = arith.constant 0 : index
    %34 = vector.load %arg10[%c8, %c0_21] : memref<64x256xf32, #tpu.memory_space<vmem>>, vector<8x256xf32>
    %c0_22 = arith.constant 0 : index
    %c0_23 = arith.constant 0 : index
    %35 = vector.load %arg5[%c0_22, %c0_23] : memref<256x256xf32, #tpu.memory_space<vmem>>, vector<256x256xf32>
    %cst_24 = arith.constant dense<0.000000e+00> : vector<8x256xf32>
    %36 = tpu.matmul %33, %35, %cst_24 {dimension_numbers = #tpu.dot_dimension_numbers<[1], [0], [0], [1], [0, 0, 1, 1], [], []>} : vector<8x256xf32>, vector<256x256xf32>, vector<8x256xf32> -> vector<8x256xf32>
    %c0_25 = arith.constant 0 : index
    %c0_26 = arith.constant 0 : index
    %37 = vector.load %arg3[%c0_25, %c0_26] : memref<256x256xf32, #tpu.memory_space<vmem>>, vector<256x256xf32>
    %cst_27 = arith.constant dense<0.000000e+00> : vector<8x256xf32>
    %38 = tpu.matmul %28, %37, %cst_27 {dimension_numbers = #tpu.dot_dimension_numbers<[1], [0], [0], [1], [0, 0, 1, 1], [], []>} : vector<8x256xf32>, vector<256x256xf32>, vector<8x256xf32> -> vector<8x256xf32>
    %39 = arith.addf %34, %38 : vector<8x256xf32>
    %40 = math.tanh %39 : vector<8x256xf32>
    %c0_28 = arith.constant 0 : index
    %c0_29 = arith.constant 0 : index
    %41 = vector.load %arg4[%c0_28, %c0_29] : memref<256x256xf32, #tpu.memory_space<vmem>>, vector<256x256xf32>
    %cst_30 = arith.constant dense<0.000000e+00> : vector<8x256xf32>
    %42 = tpu.matmul %40, %41, %cst_30 {dimension_numbers = #tpu.dot_dimension_numbers<[1], [0], [0], [1], [0, 0, 1, 1], [], []>} : vector<8x256xf32>, vector<256x256xf32>, vector<8x256xf32> -> vector<8x256xf32>
    %43 = arith.addf %36, %42 : vector<8x256xf32>
    %44 = arith.addf %43, %19 : vector<8x256xf32>
    %45 = math.tanh %44 : vector<8x256xf32>
    %c16 = arith.constant 16 : index
    %c0_31 = arith.constant 0 : index
    %46 = vector.load %arg10[%c16, %c0_31] : memref<64x256xf32, #tpu.memory_space<vmem>>, vector<8x256xf32>
    %c0_32 = arith.constant 0 : index
    %c0_33 = arith.constant 0 : index
    %47 = vector.load %arg5[%c0_32, %c0_33] : memref<256x256xf32, #tpu.memory_space<vmem>>, vector<256x256xf32>
    %cst_34 = arith.constant dense<0.000000e+00> : vector<8x256xf32>
    %48 = tpu.matmul %45, %47, %cst_34 {dimension_numbers = #tpu.dot_dimension_numbers<[1], [0], [0], [1], [0, 0, 1, 1], [], []>} : vector<8x256xf32>, vector<256x256xf32>, vector<8x256xf32> -> vector<8x256xf32>
    %c0_35 = arith.constant 0 : index
    %c0_36 = arith.constant 0 : index
    %49 = vector.load %arg3[%c0_35, %c0_36] : memref<256x256xf32, #tpu.memory_space<vmem>>, vector<256x256xf32>
    %cst_37 = arith.constant dense<0.000000e+00> : vector<8x256xf32>
    %50 = tpu.matmul %40, %49, %cst_37 {dimension_numbers = #tpu.dot_dimension_numbers<[1], [0], [0], [1], [0, 0, 1, 1], [], []>} : vector<8x256xf32>, vector<256x256xf32>, vector<8x256xf32> -> vector<8x256xf32>
    %51 = arith.addf %46, %50 : vector<8x256xf32>
    %52 = math.tanh %51 : vector<8x256xf32>
    %c0_38 = arith.constant 0 : index
    %c0_39 = arith.constant 0 : index
    %53 = vector.load %arg4[%c0_38, %c0_39] : memref<256x256xf32, #tpu.memory_space<vmem>>, vector<256x256xf32>
    %cst_40 = arith.constant dense<0.000000e+00> : vector<8x256xf32>
    %54 = tpu.matmul %52, %53, %cst_40 {dimension_numbers = #tpu.dot_dimension_numbers<[1], [0], [0], [1], [0, 0, 1, 1], [], []>} : vector<8x256xf32>, vector<256x256xf32>, vector<8x256xf32> -> vector<8x256xf32>
    %55 = arith.addf %48, %54 : vector<8x256xf32>
    %56 = arith.addf %55, %19 : vector<8x256xf32>
    %57 = math.tanh %56 : vector<8x256xf32>
    %c24 = arith.constant 24 : index
    %c0_41 = arith.constant 0 : index
    %58 = vector.load %arg10[%c24, %c0_41] : memref<64x256xf32, #tpu.memory_space<vmem>>, vector<8x256xf32>
    %c0_42 = arith.constant 0 : index
    %c0_43 = arith.constant 0 : index
    %59 = vector.load %arg5[%c0_42, %c0_43] : memref<256x256xf32, #tpu.memory_space<vmem>>, vector<256x256xf32>
    %cst_44 = arith.constant dense<0.000000e+00> : vector<8x256xf32>
    %60 = tpu.matmul %57, %59, %cst_44 {dimension_numbers = #tpu.dot_dimension_numbers<[1], [0], [0], [1], [0, 0, 1, 1], [], []>} : vector<8x256xf32>, vector<256x256xf32>, vector<8x256xf32> -> vector<8x256xf32>
    %c0_45 = arith.constant 0 : index
    %c0_46 = arith.constant 0 : index
    %61 = vector.load %arg3[%c0_45, %c0_46] : memref<256x256xf32, #tpu.memory_space<vmem>>, vector<256x256xf32>
    %cst_47 = arith.constant dense<0.000000e+00> : vector<8x256xf32>
    %62 = tpu.matmul %52, %61, %cst_47 {dimension_numbers = #tpu.dot_dimension_numbers<[1], [0], [0], [1], [0, 0, 1, 1], [], []>} : vector<8x256xf32>, vector<256x256xf32>, vector<8x256xf32> -> vector<8x256xf32>
    %63 = arith.addf %58, %62 : vector<8x256xf32>
    %64 = math.tanh %63 : vector<8x256xf32>
    %c0_48 = arith.constant 0 : index
    %c0_49 = arith.constant 0 : index
    %65 = vector.load %arg4[%c0_48, %c0_49] : memref<256x256xf32, #tpu.memory_space<vmem>>, vector<256x256xf32>
    %cst_50 = arith.constant dense<0.000000e+00> : vector<8x256xf32>
    %66 = tpu.matmul %64, %65, %cst_50 {dimension_numbers = #tpu.dot_dimension_numbers<[1], [0], [0], [1], [0, 0, 1, 1], [], []>} : vector<8x256xf32>, vector<256x256xf32>, vector<8x256xf32> -> vector<8x256xf32>
    %67 = arith.addf %60, %66 : vector<8x256xf32>
    %68 = arith.addf %67, %19 : vector<8x256xf32>
    %69 = math.tanh %68 : vector<8x256xf32>
    %c32 = arith.constant 32 : index
    %c0_51 = arith.constant 0 : index
    %70 = vector.load %arg10[%c32, %c0_51] : memref<64x256xf32, #tpu.memory_space<vmem>>, vector<8x256xf32>
    %c0_52 = arith.constant 0 : index
    %c0_53 = arith.constant 0 : index
    %71 = vector.load %arg5[%c0_52, %c0_53] : memref<256x256xf32, #tpu.memory_space<vmem>>, vector<256x256xf32>
    %cst_54 = arith.constant dense<0.000000e+00> : vector<8x256xf32>
    %72 = tpu.matmul %69, %71, %cst_54 {dimension_numbers = #tpu.dot_dimension_numbers<[1], [0], [0], [1], [0, 0, 1, 1], [], []>} : vector<8x256xf32>, vector<256x256xf32>, vector<8x256xf32> -> vector<8x256xf32>
    %c0_55 = arith.constant 0 : index
    %c0_56 = arith.constant 0 : index
    %73 = vector.load %arg3[%c0_55, %c0_56] : memref<256x256xf32, #tpu.memory_space<vmem>>, vector<256x256xf32>
    %cst_57 = arith.constant dense<0.000000e+00> : vector<8x256xf32>
    %74 = tpu.matmul %64, %73, %cst_57 {dimension_numbers = #tpu.dot_dimension_numbers<[1], [0], [0], [1], [0, 0, 1, 1], [], []>} : vector<8x256xf32>, vector<256x256xf32>, vector<8x256xf32> -> vector<8x256xf32>
    %75 = arith.addf %70, %74 : vector<8x256xf32>
    %76 = math.tanh %75 : vector<8x256xf32>
    %c0_58 = arith.constant 0 : index
    %c0_59 = arith.constant 0 : index
    %77 = vector.load %arg4[%c0_58, %c0_59] : memref<256x256xf32, #tpu.memory_space<vmem>>, vector<256x256xf32>
    %cst_60 = arith.constant dense<0.000000e+00> : vector<8x256xf32>
    %78 = tpu.matmul %76, %77, %cst_60 {dimension_numbers = #tpu.dot_dimension_numbers<[1], [0], [0], [1], [0, 0, 1, 1], [], []>} : vector<8x256xf32>, vector<256x256xf32>, vector<8x256xf32> -> vector<8x256xf32>
    %79 = arith.addf %72, %78 : vector<8x256xf32>
    %80 = arith.addf %79, %19 : vector<8x256xf32>
    %81 = math.tanh %80 : vector<8x256xf32>
    %c40 = arith.constant 40 : index
    %c0_61 = arith.constant 0 : index
    %82 = vector.load %arg10[%c40, %c0_61] : memref<64x256xf32, #tpu.memory_space<vmem>>, vector<8x256xf32>
    %c0_62 = arith.constant 0 : index
    %c0_63 = arith.constant 0 : index
    %83 = vector.load %arg5[%c0_62, %c0_63] : memref<256x256xf32, #tpu.memory_space<vmem>>, vector<256x256xf32>
    %cst_64 = arith.constant dense<0.000000e+00> : vector<8x256xf32>
    %84 = tpu.matmul %81, %83, %cst_64 {dimension_numbers = #tpu.dot_dimension_numbers<[1], [0], [0], [1], [0, 0, 1, 1], [], []>} : vector<8x256xf32>, vector<256x256xf32>, vector<8x256xf32> -> vector<8x256xf32>
    %c0_65 = arith.constant 0 : index
    %c0_66 = arith.constant 0 : index
    %85 = vector.load %arg3[%c0_65, %c0_66] : memref<256x256xf32, #tpu.memory_space<vmem>>, vector<256x256xf32>
    %cst_67 = arith.constant dense<0.000000e+00> : vector<8x256xf32>
    %86 = tpu.matmul %76, %85, %cst_67 {dimension_numbers = #tpu.dot_dimension_numbers<[1], [0], [0], [1], [0, 0, 1, 1], [], []>} : vector<8x256xf32>, vector<256x256xf32>, vector<8x256xf32> -> vector<8x256xf32>
    %87 = arith.addf %82, %86 : vector<8x256xf32>
    %88 = math.tanh %87 : vector<8x256xf32>
    %c0_68 = arith.constant 0 : index
    %c0_69 = arith.constant 0 : index
    %89 = vector.load %arg4[%c0_68, %c0_69] : memref<256x256xf32, #tpu.memory_space<vmem>>, vector<256x256xf32>
    %cst_70 = arith.constant dense<0.000000e+00> : vector<8x256xf32>
    %90 = tpu.matmul %88, %89, %cst_70 {dimension_numbers = #tpu.dot_dimension_numbers<[1], [0], [0], [1], [0, 0, 1, 1], [], []>} : vector<8x256xf32>, vector<256x256xf32>, vector<8x256xf32> -> vector<8x256xf32>
    %91 = arith.addf %84, %90 : vector<8x256xf32>
    %92 = arith.addf %91, %19 : vector<8x256xf32>
    %93 = math.tanh %92 : vector<8x256xf32>
    %c48 = arith.constant 48 : index
    %c0_71 = arith.constant 0 : index
    %94 = vector.load %arg10[%c48, %c0_71] : memref<64x256xf32, #tpu.memory_space<vmem>>, vector<8x256xf32>
    %c0_72 = arith.constant 0 : index
    %c0_73 = arith.constant 0 : index
    %95 = vector.load %arg5[%c0_72, %c0_73] : memref<256x256xf32, #tpu.memory_space<vmem>>, vector<256x256xf32>
    %cst_74 = arith.constant dense<0.000000e+00> : vector<8x256xf32>
    %96 = tpu.matmul %93, %95, %cst_74 {dimension_numbers = #tpu.dot_dimension_numbers<[1], [0], [0], [1], [0, 0, 1, 1], [], []>} : vector<8x256xf32>, vector<256x256xf32>, vector<8x256xf32> -> vector<8x256xf32>
    %c0_75 = arith.constant 0 : index
    %c0_76 = arith.constant 0 : index
    %97 = vector.load %arg3[%c0_75, %c0_76] : memref<256x256xf32, #tpu.memory_space<vmem>>, vector<256x256xf32>
    %cst_77 = arith.constant dense<0.000000e+00> : vector<8x256xf32>
    %98 = tpu.matmul %88, %97, %cst_77 {dimension_numbers = #tpu.dot_dimension_numbers<[1], [0], [0], [1], [0, 0, 1, 1], [], []>} : vector<8x256xf32>, vector<256x256xf32>, vector<8x256xf32> -> vector<8x256xf32>
    %99 = arith.addf %94, %98 : vector<8x256xf32>
    %100 = math.tanh %99 : vector<8x256xf32>
    %c0_78 = arith.constant 0 : index
    %c0_79 = arith.constant 0 : index
    %101 = vector.load %arg4[%c0_78, %c0_79] : memref<256x256xf32, #tpu.memory_space<vmem>>, vector<256x256xf32>
    %cst_80 = arith.constant dense<0.000000e+00> : vector<8x256xf32>
    %102 = tpu.matmul %100, %101, %cst_80 {dimension_numbers = #tpu.dot_dimension_numbers<[1], [0], [0], [1], [0, 0, 1, 1], [], []>} : vector<8x256xf32>, vector<256x256xf32>, vector<8x256xf32> -> vector<8x256xf32>
    %103 = arith.addf %96, %102 : vector<8x256xf32>
    %104 = arith.addf %103, %19 : vector<8x256xf32>
    %105 = math.tanh %104 : vector<8x256xf32>
    %c56 = arith.constant 56 : index
    %c0_81 = arith.constant 0 : index
    %106 = vector.load %arg10[%c56, %c0_81] : memref<64x256xf32, #tpu.memory_space<vmem>>, vector<8x256xf32>
    %c0_82 = arith.constant 0 : index
    %c0_83 = arith.constant 0 : index
    %107 = vector.load %arg5[%c0_82, %c0_83] : memref<256x256xf32, #tpu.memory_space<vmem>>, vector<256x256xf32>
    %cst_84 = arith.constant dense<0.000000e+00> : vector<8x256xf32>
    %108 = tpu.matmul %105, %107, %cst_84 {dimension_numbers = #tpu.dot_dimension_numbers<[1], [0], [0], [1], [0, 0, 1, 1], [], []>} : vector<8x256xf32>, vector<256x256xf32>, vector<8x256xf32> -> vector<8x256xf32>
    %c0_85 = arith.constant 0 : index
    %c0_86 = arith.constant 0 : index
    %109 = vector.load %arg3[%c0_85, %c0_86] : memref<256x256xf32, #tpu.memory_space<vmem>>, vector<256x256xf32>
    %cst_87 = arith.constant dense<0.000000e+00> : vector<8x256xf32>
    %110 = tpu.matmul %100, %109, %cst_87 {dimension_numbers = #tpu.dot_dimension_numbers<[1], [0], [0], [1], [0, 0, 1, 1], [], []>} : vector<8x256xf32>, vector<256x256xf32>, vector<8x256xf32> -> vector<8x256xf32>
    %111 = arith.addf %106, %110 : vector<8x256xf32>
    %112 = math.tanh %111 : vector<8x256xf32>
    %c0_88 = arith.constant 0 : index
    %c0_89 = arith.constant 0 : index
    %113 = vector.load %arg4[%c0_88, %c0_89] : memref<256x256xf32, #tpu.memory_space<vmem>>, vector<256x256xf32>
    %cst_90 = arith.constant dense<0.000000e+00> : vector<8x256xf32>
    %114 = tpu.matmul %112, %113, %cst_90 {dimension_numbers = #tpu.dot_dimension_numbers<[1], [0], [0], [1], [0, 0, 1, 1], [], []>} : vector<8x256xf32>, vector<256x256xf32>, vector<8x256xf32> -> vector<8x256xf32>
    %115 = arith.addf %108, %114 : vector<8x256xf32>
    %116 = arith.addf %115, %19 : vector<8x256xf32>
    %117 = math.tanh %116 : vector<8x256xf32>
    %c0_91 = arith.constant 0 : index
    %c0_92 = arith.constant 0 : index
    %118 = vector.load %arg7[%c0_91, %c0_92] : memref<256x128xf32, #tpu.memory_space<vmem>>, vector<256x128xf32>
    %cst_93 = arith.constant dense<0.000000e+00> : vector<8x128xf32>
    %119 = tpu.matmul %117, %118, %cst_93 {dimension_numbers = #tpu.dot_dimension_numbers<[1], [0], [0], [1], [0, 0, 1, 1], [], []>} : vector<8x256xf32>, vector<256x128xf32>, vector<8x128xf32> -> vector<8x128xf32>
    %c0_94 = arith.constant 0 : index
    %c0_95 = arith.constant 0 : index
    %120 = vector.load %arg8[%c0_94, %c0_95] : memref<1x128xf32, #tpu.memory_space<vmem>>, vector<1x128xf32>
    %121 = vector.broadcast %120 : vector<1x128xf32> to vector<8x128xf32>
    %122 = arith.addf %119, %121 : vector<8x128xf32>
    %c0_96 = arith.constant 0 : index
    %c0_97 = arith.constant 0 : index
    %123 = vector.load %arg9[%c0_96, %c0_97] : memref<8x128xf32, #tpu.memory_space<vmem>>, vector<8x128xf32>
    tpu.vector_store %arg9[%c0_96, %c0_97], %122 {strides = array<i32>} : memref<8x128xf32, #tpu.memory_space<vmem>>, vector<8x128xf32>,
    return
  }
}

</mosaic_0001>

<bundles_post_ra>
// kernel: rnn_forward.1
= control target key start
LH: loop header
LB: loop body
LE: loop exit
PB: predicated region body
PF: predicated region fallthrough
CT: control target
= control target key end

     0   :  { %v7763_v3 = vmov 0   ;;  %s7753_s3 = inlined_call_operand.vmem [shape: f32[256,256], index: 3, kind: input, shape index: {}]   ;;  %s7754_s0 = inlined_call_operand.vmem [shape: f32[64,2], index: 0, kind: input, shape index: {}]   ;;  %s7755_s4 = inlined_call_operand.vmem [shape: f32[256,256], index: 4, kind: input, shape index: {}]   ;;  %s7756_s5 = inlined_call_operand.vmem [shape: f32[256,256], index: 5, kind: input, shape index: {}]   ;;  %s7757_s1 = inlined_call_operand.vmem [shape: f32[2,256], index: 1, kind: input, shape index: {}]   ;;  %s7758_s2 = inlined_call_operand.vmem [shape: f32[1,256], index: 2, kind: input, shape index: {}]   ;;  %s7759_s6 = inlined_call_operand.vmem [shape: f32[1,256], index: 6, kind: input, shape index: {}]   ;;  %s7760_s7 = inlined_call_operand.vmem [shape: f32[256,128], index: 7, kind: input, shape index: {}]   ;;  %s7761_s8 = inlined_call_operand.vmem [shape: f32[1,128], index: 8, kind: input, shape index: {}]   ;;  %s7762_s9 = inlined_call_operand.vmem [shape: f32[8,128], index: 9, kind: output, shape index: {}]  }
   0x1   :  { %v3012_v0 = vld [vmem:[%s7753_s3 + $0xf0] sm:$0xff]  ;;  %v3022_v2 = vld [vmem:[%s7753_s3 + $0xf8] sm:$0xff]  ;;  %2494 = vset.pattern.permute.xlu0 %v7763_v3  ;;  %2496 = vset.pattern.permute.xlu1 %v7763_v3  ;;  %v3036_v5 = vld [vmem:[%s7753_s3 + $0xe0] sm:$0xff] }
   0x2   :  { %v3017_v1 = vld [vmem:[%s7753_s3 + $0x1f0] sm:$0xff]  ;;  %348 = vmatpush.msra.mxu0 %v3012_v0  ;;  %v3031_v4 = vld [vmem:[%s7753_s3 + $0x1f8] sm:$0xff]  ;;  %v3041_v6 = vld [vmem:[%s7753_s3 + $0x1e0] sm:$0xff]  ;;  %388 = vmatpush.msra.mxu2 %v3022_v2 }
   0x3   :  { %368 = vmatpush.msra.mxu1 %v3017_v1  ;;  %408 = vmatpush.msra.mxu3 %v3031_v4  ;;  %v3048_v7 = vld [vmem:[%s7753_s3 + $0xe8] sm:$0xff]  ;;  %v3058_v9 = vld [vmem:[%s7753_s3 + $0xd0] sm:$0xff]  ;;  %v3070_v11 = vld [vmem:[%s7753_s3 + $0xd8] sm:$0xff] }
   0x4   :  { %v3053_v8 = vld [vmem:[%s7753_s3 + $0x1e8] sm:$0xff]  ;;  %349 = vmatpush.msra.mxu0 %v3036_v5  ;;  %v3065_v10 = vld [vmem:[%s7753_s3 + $0x1d0] sm:$0xff]  ;;  %v3075_v12 = vld [vmem:[%s7753_s3 + $0x1d8] sm:$0xff]  ;;  %389 = vmatpush.msra.mxu2 %v3048_v7 }
   0x5   :  { %369 = vmatpush.msra.mxu1 %v3041_v6  ;;  %409 = vmatpush.msra.mxu3 %v3053_v8  ;;  %v3082_v13 = vld [vmem:[%s7753_s3 + $0xc0] sm:$0xff]  ;;  %v3094_v15 = vld [vmem:[%s7753_s3 + $0xc8] sm:$0xff]  ;;  %v3106_v17 = vld [vmem:[%s7753_s3 + $0xb0] sm:$0xff] }
   0x6   :  { %v3087_v14 = vld [vmem:[%s7753_s3 + $0x1c0] sm:$0xff]  ;;  %350 = vmatpush.msra.mxu0 %v3058_v9  ;;  %v3099_v16 = vld [vmem:[%s7753_s3 + $0x1c8] sm:$0xff]  ;;  %390 = vmatpush.msra.mxu2 %v3070_v11  ;;  %v3111_v18 = vld [vmem:[%s7753_s3 + $0x1b0] sm:$0xff] }
   0x7   :  { %370 = vmatpush.msra.mxu1 %v3065_v10  ;;  %410 = vmatpush.msra.mxu3 %v3075_v12  ;;  %v3118_v19 = vld [vmem:[%s7753_s3 + $0xb8] sm:$0xff]  ;;  %v3130_v21 = vld [vmem:[%s7753_s3 + $0xa0] sm:$0xff]  ;;  %v3142_v23 = vld [vmem:[%s7753_s3 + $0xa8] sm:$0xff] }
   0x8   :  { %351 = vmatpush.msra.mxu0 %v3082_v13  ;;  %v3123_v20 = vld [vmem:[%s7753_s3 + $0x1b8] sm:$0xff]  ;;  %391 = vmatpush.msra.mxu2 %v3094_v15  ;;  %v3135_v22 = vld [vmem:[%s7753_s3 + $0x1a0] sm:$0xff]  ;;  %v3147_v24 = vld [vmem:[%s7753_s3 + $0x1a8] sm:$0xff] }
   0x9   :  { %371 = vmatpush.msra.mxu1 %v3087_v14  ;;  %411 = vmatpush.msra.mxu3 %v3099_v16  ;;  %v3154_v25 = vld [vmem:[%s7753_s3 + $0x90] sm:$0xff]  ;;  %v3166_v27 = vld [vmem:[%s7753_s3 + $0x98] sm:$0xff]  ;;  %v3178_v29 = vld [vmem:[%s7753_s3 + $0x80] sm:$0xff] }
   0xa   :  { %352 = vmatpush.msra.mxu0 %v3106_v17  ;;  %392 = vmatpush.msra.mxu2 %v3118_v19  ;;  %v3159_v26 = vld [vmem:[%s7753_s3 + $0x190] sm:$0xff]  ;;  %v3171_v28 = vld [vmem:[%s7753_s3 + $0x198] sm:$0xff]  ;;  %v3183_v30 = vld [vmem:[%s7753_s3 + $0x180] sm:$0xff] }
   0xb   :  { %372 = vmatpush.msra.mxu1 %v3111_v18  ;;  %412 = vmatpush.msra.mxu3 %v3123_v20  ;;  %v3190_v31 = vld [vmem:[%s7753_s3 + $0x88] sm:$0xff]  ;;  %v3202_v33 = vld [vmem:[%s7753_s3 + $0x70] sm:$0xff]  ;;  %v3214_v35 = vld [vmem:[%s7753_s3 + $0x78] sm:$0xff] }
   0xc   :  { %353 = vmatpush.msra.mxu0 %v3130_v21  ;;  %393 = vmatpush.msra.mxu2 %v3142_v23  ;;  %v3195_v32 = vld [vmem:[%s7753_s3 + $0x188] sm:$0xff]  ;;  %v3207_v34 = vld [vmem:[%s7753_s3 + $0x170] sm:$0xff]  ;;  %v3219_v36 = vld [vmem:[%s7753_s3 + $0x178] sm:$0xff] }
   0xd   :  { %373 = vmatpush.msra.mxu1 %v3135_v22  ;;  %413 = vmatpush.msra.mxu3 %v3147_v24  ;;  %v3226_v37 = vld [vmem:[%s7753_s3 + $0x60] sm:$0xff]  ;;  %v3238_v39 = vld [vmem:[%s7753_s3 + $0x68] sm:$0xff]  ;;  %v3250_v41 = vld [vmem:[%s7753_s3 + $0x50] sm:$0xff] }
   0xe   :  { %354 = vmatpush.msra.mxu0 %v3154_v25  ;;  %394 = vmatpush.msra.mxu2 %v3166_v27  ;;  %v3231_v38 = vld [vmem:[%s7753_s3 + $0x160] sm:$0xff]  ;;  %v3243_v40 = vld [vmem:[%s7753_s3 + $0x168] sm:$0xff]  ;;  %v3255_v42 = vld [vmem:[%s7753_s3 + $0x150] sm:$0xff] }
   0xf   :  { %374 = vmatpush.msra.mxu1 %v3159_v26  ;;  %414 = vmatpush.msra.mxu3 %v3171_v28  ;;  %8574 = vst [vmem:[#allocation3_spill] sm:$0xff] %v3231_v38  ;;  %v3262_v43 = vld [vmem:[%s7753_s3 + $0x58] sm:$0xff]  ;;  %v3274_v45 = vld [vmem:[%s7753_s3 + $0x40] sm:$0xff]  ;;  %v3286_v47 = vld [vmem:[%s7753_s3 + $0x48] sm:$0xff] }
  0x10   :  { %355 = vmatpush.msra.mxu0 %v3178_v29  ;;  %395 = vmatpush.msra.mxu2 %v3190_v31  ;;  %8575 = vst [vmem:[#allocation4_spill] sm:$0xff] %v3243_v40  ;;  %v3267_v44 = vld [vmem:[%s7753_s3 + $0x158] sm:$0xff]  ;;  %v3279_v46 = vld [vmem:[%s7753_s3 + $0x140] sm:$0xff]  ;;  %v3291_v48 = vld [vmem:[%s7753_s3 + $0x148] sm:$0xff] }
  0x11   :  { %375 = vmatpush.msra.mxu1 %v3183_v30  ;;  %415 = vmatpush.msra.mxu3 %v3195_v32  ;;  %8576 = vst [vmem:[#allocation5_spill] sm:$0xff] %v3255_v42  ;;  %v3298_v49 = vld [vmem:[%s7753_s3 + $0x30] sm:$0xff]  ;;  %v3310_v51 = vld [vmem:[%s7753_s3 + $0x38] sm:$0xff]  ;;  %v3322_v53 = vld [vmem:[%s7753_s3 + $0x20] sm:$0xff] }
  0x12   :  { %356 = vmatpush.msra.mxu0 %v3202_v33  ;;  %396 = vmatpush.msra.mxu2 %v3214_v35  ;;  %8577 = vst [vmem:[#allocation6_spill] sm:$0xff] %v3267_v44  ;;  %v3303_v50 = vld [vmem:[%s7753_s3 + $0x130] sm:$0xff]  ;;  %v3315_v52 = vld [vmem:[%s7753_s3 + $0x138] sm:$0xff]  ;;  %v3327_v54 = vld [vmem:[%s7753_s3 + $0x120] sm:$0xff] }
  0x13   :  { %376 = vmatpush.msra.mxu1 %v3207_v34  ;;  %416 = vmatpush.msra.mxu3 %v3219_v36  ;;  %8578 = vst [vmem:[#allocation7_spill] sm:$0xff] %v3279_v46  ;;  %v3334_v55 = vld [vmem:[%s7753_s3 + $0x28] sm:$0xff]  ;;  %v32_v57 = vld [vmem:[%s7754_s0] sm:$0xff]  ;;  %v3349_v58 = vld [vmem:[%s7753_s3 + $0x10] sm:$0xff] }
  0x14   :  { %357 = vmatpush.msra.mxu0 %v3226_v37  ;;  %397 = vmatpush.msra.mxu2 %v3238_v39  ;;  %8579 = vst [vmem:[#allocation8_spill] sm:$0xff] %v3291_v48  ;;  %v3339_v56 = vld [vmem:[%s7753_s3 + $0x128] sm:$0xff]  ;;  %v3356_v59 = vld [vmem:[%s7753_s3 + $0x110] sm:$0xff]  ;;  %v3361_v60 = vld [vmem:[%s7753_s3 + $0x18] sm:$0xff] }
  0x15   :  { %377 = vmatpush.msra.mxu1 %v3231_v38  ;;  %417 = vmatpush.msra.mxu3 %v3243_v40  ;;  %8580 = vst [vmem:[#allocation9_spill] sm:$0xff] %v3298_v49  ;;  %v3368_v61 = vld [vmem:[%s7753_s3 + $0x118] sm:$0xff]  ;;  %v3373_v62 = vld [vmem:[%s7753_s3] sm:$0xff]  ;;  %v3384_v3 = vld [vmem:[%s7753_s3 + $0x8] sm:$0xff] }
  0x16   :  { %358 = vmatpush.msra.mxu0 %v3250_v41  ;;  %398 = vmatpush.msra.mxu2 %v3262_v43  ;;  %8581 = vst [vmem:[#allocation10_spill] sm:$0xff] %v3303_v50  ;;  %v3379_v63 = vld [vmem:[%s7753_s3 + $0x100] sm:$0xff] }
  0x17   :  { %378 = vmatpush.msra.mxu1 %v3255_v42  ;;  %418 = vmatpush.msra.mxu3 %v3267_v44  ;;  %8582 = vst [vmem:[#allocation11_spill] sm:$0xff] %v3310_v51 }
  0x18   :  { %359 = vmatpush.msra.mxu0 %v3274_v45  ;;  %8583 = vst [vmem:[#allocation12_spill] sm:$0xff] %v3315_v52  ;;  %399 = vmatpush.msra.mxu2 %v3286_v47 }
  0x19   :  { %379 = vmatpush.msra.mxu1 %v3279_v46  ;;  %419 = vmatpush.msra.mxu3 %v3291_v48  ;;  %8584 = vst [vmem:[#allocation13_spill] sm:$0xff] %v3322_v53 }
  0x1a   :  { %8585 = vst [vmem:[#allocation14_spill] sm:$0xff] %v3327_v54  ;;  %360 = vmatpush.msra.mxu0 %v3298_v49  ;;  %400 = vmatpush.msra.mxu2 %v3310_v51 }
  0x1b   :  { %380 = vmatpush.msra.mxu1 %v3303_v50  ;;  %8586 = vst [vmem:[#allocation15_spill] sm:$0xff] %v3334_v55  ;;  %420 = vmatpush.msra.mxu3 %v3315_v52  ;;  %v3426_v52 = vld [vmem:[%s7755_s4 + $0xe8] sm:$0xff]  ;;  %v3450_v50 = vld [vmem:[%s7755_s4 + $0x1e0] sm:$0xff] }
  0x1c   :  { %8587 = vst [vmem:[#allocation16_spill] sm:$0xff] %v3339_v56  ;;  %361 = vmatpush.msra.mxu0 %v3322_v53  ;;  %401 = vmatpush.msra.mxu2 %v3334_v55 }
  0x1d   :  { %8588 = vst [vmem:[#allocation17_spill] sm:$0xff] %v3349_v58  ;;  %381 = vmatpush.msra.mxu1 %v3327_v54  ;;  %421 = vmatpush.msra.mxu3 %v3339_v56  ;;  %v3391_v56 = vld [vmem:[%s7753_s3 + $0x108] sm:$0xff]  ;;  %v3400_v54 = vld [vmem:[%s7755_s4 + $0xf0] sm:$0xff] }
  0x1e   :  { %8589 = vst [vmem:[#allocation18_spill] sm:$0xff] %v3356_v59  ;;  %43 = vperm.xlu0 %2494, %v32_v57   ;;  %362 = vmatpush.msra.mxu0 %v3349_v58  ;;  %v174_v58 = vld [vmem:[%s7758_s2] sm:$0x3] }
  0x1f   :  { %8590 = vst [vmem:[#allocation19_spill] sm:$0xff] %v3361_v60  ;;  %382 = vmatpush.msra.mxu1 %v3356_v59  ;;  %402 = vmatpush.msra.mxu2 %v3361_v60  ;;  %v7773_v59 = vmov 0.0   ;;  %v4194_v51 = vperm.slane %v174_v58, 1 }
  0x20   :  { %8591 = vst [vmem:[#allocation20_spill] sm:$0xff] %v3368_v61  ;;  %422 = vmatpush.msra.mxu3 %v3368_v61  ;;  %363 = vmatpush.msra.mxu0 %v3373_v62  ;;  %v3407_v61 = vld [vmem:[%s7755_s4 + $0xf8] sm:$0xff] }
  0x21   :  { %8592 = vst [vmem:[#allocation21_spill] sm:$0xff] %v3373_v62  ;;  %383 = vmatpush.msra.mxu1 %v3379_v63  ;;  %403 = vmatpush.msra.mxu2 %v3384_v3 }
  0x22   :  { %8593 = vst [vmem:[#allocation22_spill] sm:$0xff] %v3379_v63  ;;  %423 = vmatpush.msra.mxu3 %v3391_v56  ;;  %364 = vmatmul.f32.vlgmr.msra.gmra.mxu0 %v7773_v59  ;;  %v3412_v63 = vld [vmem:[%s7755_s4 + $0x1f0] sm:$0xff] }
  0x23   :  { %8594 = vst [vmem:[#allocation23_spill] sm:$0xff] %v3384_v3  ;;  %384 = vmatmul.f32.vlgmr.msra.gmra.mxu1 %v7773_v59  ;;  %404 = vmatmul.f32.vlgmr.msra.gmra.mxu2 %v7773_v59  ;;  %v3432_v3 = vld [vmem:[%s7755_s4 + $0xd0] sm:$0xff] }
  0x24   :  { %8595 = vst [vmem:[#allocation24_spill] sm:$0xff] %v3391_v56  ;;  %v3419_v56 = vld [vmem:[%s7755_s4 + $0xe0] sm:$0xff]  ;;  %424 = vmatmul.f32.vlgmr.msra.gmra.mxu3 %v7773_v59  ;;  %496 = vmatpush.msrb.mxu0 %v3400_v54  ;;  %v3438_v59 = vld [vmem:[%s7755_s4 + $0x1f8] sm:$0xff] }
  0x25   :  { %8596 = vst [vmem:[#allocation25_spill] sm:$0xff] %v3400_v54  ;;  %536 = vmatpush.msrb.mxu2 %v3407_v61  ;;  %516 = vmatpush.msrb.mxu1 %v3412_v63  ;;  %v7779_v54 = vmov 1  }
  0x26   :  { %8597 = vst [vmem:[#allocation26_spill] sm:$0xff] %v3407_v61  ;;  %2495 = vset.pattern.permute.xlu0 %v7779_v54  ;;  %497 = vmatpush.msrb.mxu0 %v3419_v56  ;;  %v3445_v61 = vld [vmem:[%s7755_s4 + $0xd8] sm:$0xff]  ;;  %v3461_v54 = vld [vmem:[%s7755_s4 + $0x1e8] sm:$0xff] }
  0x27   :  { %8598 = vst [vmem:[#allocation27_spill] sm:$0xff] %v3412_v63  ;;  %105 = vperm.xlu0 %2495, %v32_v57   ;;  %537 = vmatpush.msrb.mxu2 %v3426_v52  ;;  %v3456_v63 = vld [vmem:[%s7755_s4 + $0xc0] sm:$0xff]  ;;  %v3473_v57 = vld [vmem:[%s7755_s4 + $0x1d0] sm:$0xff] }
  0x28   :  { %8599 = vst [vmem:[#allocation28_spill] sm:$0xff] %v3419_v56  ;;  %498 = vmatpush.msrb.mxu0 %v3432_v3  ;;  %v3467_v56 = vld [vmem:[%s7755_s4 + $0xc8] sm:$0xff]  ;;  %556 = vmatpush.msrb.mxu3 %v3438_v59 }
  0x29   :  { %8600 = vst [vmem:[#allocation29_spill] sm:$0xff] %v3426_v52  ;;  %538 = vmatpush.msrb.mxu2 %v3445_v61  ;;  %v3479_v52 = vld [vmem:[%s7755_s4 + $0xb0] sm:$0xff]  ;;  %517 = vmatpush.msrb.mxu1 %v3450_v50 }
  0x2a   :  { %8601 = vst [vmem:[#allocation30_spill] sm:$0xff] %v3432_v3  ;;  %v3485_v3 = vld [vmem:[%s7755_s4 + $0x1d8] sm:$0xff]  ;;  %499 = vmatpush.msrb.mxu0 %v3456_v63  ;;  %557 = vmatpush.msrb.mxu3 %v3461_v54 }
  0x2b   :  { %8602 = vst [vmem:[#allocation31_spill] sm:$0xff] %v3438_v59  ;;  %v3491_v59 = vld [vmem:[%s7755_s4 + $0xb8] sm:$0xff]  ;;  %539 = vmatpush.msrb.mxu2 %v3467_v56  ;;  %518 = vmatpush.msrb.mxu1 %v3473_v57 }
  0x2c   :  { %8603 = vst [vmem:[#allocation32_spill] sm:$0xff] %v3445_v61  ;;  %v3497_v61 = vld [vmem:[%s7755_s4 + $0x1c0] sm:$0xff]  ;;  %500 = vmatpush.msrb.mxu0 %v3479_v52  ;;  %558 = vmatpush.msrb.mxu3 %v3485_v3 }
  0x2d   :  { %8604 = vst [vmem:[#allocation33_spill] sm:$0xff] %v3450_v50  ;;  %v3503_v50 = vld [vmem:[%s7755_s4 + $0xa0] sm:$0xff]  ;;  %540 = vmatpush.msrb.mxu2 %v3491_v59  ;;  %519 = vmatpush.msrb.mxu1 %v3497_v61 }
  0x2e   :  { %8605 = vst [vmem:[#allocation34_spill] sm:$0xff] %v3456_v63  ;;  %v3509_v63 = vld [vmem:[%s7755_s4 + $0x1c8] sm:$0xff]  ;;  %501 = vmatpush.msrb.mxu0 %v3503_v50 }
  0x2f   :  { %8606 = vst [vmem:[#allocation35_spill] sm:$0xff] %v3461_v54  ;;  %v3515_v54 = vld [vmem:[%s7755_s4 + $0xa8] sm:$0xff]  ;;  %559 = vmatpush.msrb.mxu3 %v3509_v63 }
  0x30   :  { %8607 = vst [vmem:[#allocation36_spill] sm:$0xff] %v3467_v56  ;;  %v3521_v56 = vld [vmem:[%s7755_s4 + $0x1b0] sm:$0xff]  ;;  %541 = vmatpush.msrb.mxu2 %v3515_v54 }
  0x31   :  { %8608 = vst [vmem:[#allocation37_spill] sm:$0xff] %v3473_v57  ;;  %v3527_v57 = vld [vmem:[%s7755_s4 + $0x90] sm:$0xff]  ;;  %520 = vmatpush.msrb.mxu1 %v3521_v56 }
  0x32   :  { %8609 = vst [vmem:[#allocation38_spill] sm:$0xff] %v3479_v52  ;;  %v3533_v52 = vld [vmem:[%s7755_s4 + $0x1b8] sm:$0xff]  ;;  %502 = vmatpush.msrb.mxu0 %v3527_v57 }
  0x33   :  { %8610 = vst [vmem:[#allocation39_spill] sm:$0xff] %v3485_v3  ;;  %v3539_v3 = vld [vmem:[%s7755_s4 + $0x98] sm:$0xff]  ;;  %560 = vmatpush.msrb.mxu3 %v3533_v52 }
  0x34   :  { %8611 = vst [vmem:[#allocation40_spill] sm:$0xff] %v3491_v59  ;;  %v3545_v59 = vld [vmem:[%s7755_s4 + $0x1a0] sm:$0xff]  ;;  %542 = vmatpush.msrb.mxu2 %v3539_v3 }
  0x35   :  { %8612 = vst [vmem:[#allocation41_spill] sm:$0xff] %v3497_v61  ;;  %v3551_v61 = vld [vmem:[%s7755_s4 + $0x80] sm:$0xff]  ;;  %521 = vmatpush.msrb.mxu1 %v3545_v59 }
  0x36   :  { %8613 = vst [vmem:[#allocation42_spill] sm:$0xff] %v3503_v50  ;;  %v3557_v50 = vld [vmem:[%s7755_s4 + $0x1a8] sm:$0xff]  ;;  %503 = vmatpush.msrb.mxu0 %v3551_v61 }
  0x37   :  { %8614 = vst [vmem:[#allocation43_spill] sm:$0xff] %v3509_v63  ;;  %v3563_v63 = vld [vmem:[%s7755_s4 + $0x88] sm:$0xff]  ;;  %561 = vmatpush.msrb.mxu3 %v3557_v50 }
  0x38   :  { %8615 = vst [vmem:[#allocation44_spill] sm:$0xff] %v3515_v54  ;;  %v3569_v54 = vld [vmem:[%s7755_s4 + $0x190] sm:$0xff]  ;;  %543 = vmatpush.msrb.mxu2 %v3563_v63 }
  0x39   :  { %8616 = vst [vmem:[#allocation45_spill] sm:$0xff] %v3521_v56  ;;  %v3575_v56 = vld [vmem:[%s7755_s4 + $0x70] sm:$0xff]  ;;  %522 = vmatpush.msrb.mxu1 %v3569_v54 }
  0x3a   :  { %8617 = vst [vmem:[#allocation46_spill] sm:$0xff] %v3527_v57  ;;  %v3581_v57 = vld [vmem:[%s7755_s4 + $0x198] sm:$0xff]  ;;  %504 = vmatpush.msrb.mxu0 %v3575_v56 }
  0x3b   :  { %8618 = vst [vmem:[#allocation47_spill] sm:$0xff] %v3533_v52  ;;  %v3587_v52 = vld [vmem:[%s7755_s4 + $0x78] sm:$0xff]  ;;  %562 = vmatpush.msrb.mxu3 %v3581_v57 }
  0x3c   :  { %8619 = vst [vmem:[#allocation48_spill] sm:$0xff] %v3539_v3  ;;  %v3593_v3 = vld [vmem:[%s7755_s4 + $0x180] sm:$0xff]  ;;  %544 = vmatpush.msrb.mxu2 %v3587_v52 }
  0x3d   :  { %8620 = vst [vmem:[#allocation49_spill] sm:$0xff] %v3545_v59  ;;  %v3599_v59 = vld [vmem:[%s7755_s4 + $0x60] sm:$0xff]  ;;  %523 = vmatpush.msrb.mxu1 %v3593_v3 }
  0x3e   :  { %8621 = vst [vmem:[#allocation50_spill] sm:$0xff] %v3551_v61  ;;  %v3605_v61 = vld [vmem:[%s7755_s4 + $0x188] sm:$0xff]  ;;  %505 = vmatpush.msrb.mxu0 %v3599_v59 }
  0x3f   :  { %8622 = vst [vmem:[#allocation51_spill] sm:$0xff] %v3557_v50  ;;  %v3611_v50 = vld [vmem:[%s7755_s4 + $0x68] sm:$0xff]  ;;  %563 = vmatpush.msrb.mxu3 %v3605_v61 }
  0x40   :  { %8623 = vst [vmem:[#allocation52_spill] sm:$0xff] %v3563_v63  ;;  %v3617_v63 = vld [vmem:[%s7755_s4 + $0x170] sm:$0xff]  ;;  %545 = vmatpush.msrb.mxu2 %v3611_v50 }
  0x41   :  { %8624 = vst [vmem:[#allocation53_spill] sm:$0xff] %v3569_v54  ;;  %v3623_v54 = vld [vmem:[%s7755_s4 + $0x50] sm:$0xff]  ;;  %524 = vmatpush.msrb.mxu1 %v3617_v63 }
  0x42   :  { %8625 = vst [vmem:[#allocation54_spill] sm:$0xff] %v3575_v56  ;;  %v3629_v56 = vld [vmem:[%s7755_s4 + $0x178] sm:$0xff]  ;;  %506 = vmatpush.msrb.mxu0 %v3623_v54 }
  0x43   :  { %8626 = vst [vmem:[#allocation55_spill] sm:$0xff] %v3581_v57  ;;  %v3635_v57 = vld [vmem:[%s7755_s4 + $0x58] sm:$0xff]  ;;  %564 = vmatpush.msrb.mxu3 %v3629_v56 }
  0x44   :  { %8627 = vst [vmem:[#allocation56_spill] sm:$0xff] %v3587_v52  ;;  %v3641_v52 = vld [vmem:[%s7755_s4 + $0x160] sm:$0xff]  ;;  %546 = vmatpush.msrb.mxu2 %v3635_v57 }
  0x45   :  { %8628 = vst [vmem:[#allocation57_spill] sm:$0xff] %v3593_v3  ;;  %v3647_v3 = vld [vmem:[%s7755_s4 + $0x40] sm:$0xff]  ;;  %525 = vmatpush.msrb.mxu1 %v3641_v52 }
  0x46   :  { %8629 = vst [vmem:[#allocation58_spill] sm:$0xff] %v3599_v59  ;;  %v3653_v59 = vld [vmem:[%s7755_s4 + $0x168] sm:$0xff]  ;;  %507 = vmatpush.msrb.mxu0 %v3647_v3 }
  0x47   :  { %8630 = vst [vmem:[#allocation59_spill] sm:$0xff] %v3605_v61  ;;  %v3659_v61 = vld [vmem:[%s7755_s4 + $0x48] sm:$0xff]  ;;  %565 = vmatpush.msrb.mxu3 %v3653_v59 }
  0x48   :  { %8631 = vst [vmem:[#allocation60_spill] sm:$0xff] %v3611_v50  ;;  %v3665_v50 = vld [vmem:[%s7755_s4 + $0x150] sm:$0xff]  ;;  %547 = vmatpush.msrb.mxu2 %v3659_v61 }
  0x49   :  { %8632 = vst [vmem:[#allocation61_spill] sm:$0xff] %v3617_v63  ;;  %v3671_v63 = vld [vmem:[%s7755_s4 + $0x30] sm:$0xff]  ;;  %526 = vmatpush.msrb.mxu1 %v3665_v50 }
  0x4a   :  { %8633 = vst [vmem:[#allocation62_spill] sm:$0xff] %v3623_v54  ;;  %v3677_v54 = vld [vmem:[%s7755_s4 + $0x158] sm:$0xff]  ;;  %508 = vmatpush.msrb.mxu0 %v3671_v63 }
  0x4b   :  { %8634 = vst [vmem:[#allocation63_spill] sm:$0xff] %v3629_v56  ;;  %v3683_v56 = vld [vmem:[%s7755_s4 + $0x38] sm:$0xff]  ;;  %566 = vmatpush.msrb.mxu3 %v3677_v54 }
  0x4c   :  { %8635 = vst [vmem:[#allocation64_spill] sm:$0xff] %v3635_v57  ;;  %v3689_v57 = vld [vmem:[%s7755_s4 + $0x140] sm:$0xff]  ;;  %548 = vmatpush.msrb.mxu2 %v3683_v56 }
  0x4d   :  { %8636 = vst [vmem:[#allocation65_spill] sm:$0xff] %v3641_v52  ;;  %v3695_v52 = vld [vmem:[%s7755_s4 + $0x20] sm:$0xff]  ;;  %527 = vmatpush.msrb.mxu1 %v3689_v57 }
  0x4e   :  { %8637 = vst [vmem:[#allocation66_spill] sm:$0xff] %v3647_v3  ;;  %v3701_v3 = vld [vmem:[%s7755_s4 + $0x148] sm:$0xff]  ;;  %509 = vmatpush.msrb.mxu0 %v3695_v52 }
  0x4f   :  { %8638 = vst [vmem:[#allocation67_spill] sm:$0xff] %v3653_v59  ;;  %v3707_v59 = vld [vmem:[%s7755_s4 + $0x28] sm:$0xff]  ;;  %567 = vmatpush.msrb.mxu3 %v3701_v3 }
  0x50   :  { %8639 = vst [vmem:[#allocation68_spill] sm:$0xff] %v3659_v61  ;;  %v3713_v61 = vld [vmem:[%s7755_s4 + $0x130] sm:$0xff]  ;;  %549 = vmatpush.msrb.mxu2 %v3707_v59 }
  0x51   :  { %8640 = vst [vmem:[#allocation69_spill] sm:$0xff] %v3665_v50  ;;  %v3719_v50 = vld [vmem:[%s7755_s4 + $0x10] sm:$0xff]  ;;  %528 = vmatpush.msrb.mxu1 %v3713_v61 }
  0x52   :  { %8641 = vst [vmem:[#allocation70_spill] sm:$0xff] %v3671_v63  ;;  %v3725_v63 = vld [vmem:[%s7755_s4 + $0x138] sm:$0xff]  ;;  %510 = vmatpush.msrb.mxu0 %v3719_v50 }
  0x53   :  { %8642 = vst [vmem:[#allocation71_spill] sm:$0xff] %v3677_v54  ;;  %v3731_v54 = vld [vmem:[%s7755_s4 + $0x18] sm:$0xff]  ;;  %568 = vmatpush.msrb.mxu3 %v3725_v63 }
  0x54   :  { %8643 = vst [vmem:[#allocation72_spill] sm:$0xff] %v3683_v56  ;;  %v3737_v56 = vld [vmem:[%s7755_s4 + $0x120] sm:$0xff]  ;;  %550 = vmatpush.msrb.mxu2 %v3731_v54 }
  0x55   :  { %8644 = vst [vmem:[#allocation73_spill] sm:$0xff] %v3689_v57  ;;  %v3743_v57 = vld [vmem:[%s7755_s4] sm:$0xff]  ;;  %529 = vmatpush.msrb.mxu1 %v3737_v56 }
  0x56   :  { %8645 = vst [vmem:[#allocation74_spill] sm:$0xff] %v3695_v52  ;;  %v3749_v52 = vld [vmem:[%s7755_s4 + $0x128] sm:$0xff]  ;;  %511 = vmatpush.msrb.mxu0 %v3743_v57 }
  0x57   :  { %8646 = vst [vmem:[#allocation75_spill] sm:$0xff] %v3701_v3  ;;  %v3755_v3 = vld [vmem:[%s7755_s4 + $0x8] sm:$0xff]  ;;  %569 = vmatpush.msrb.mxu3 %v3749_v52 }
  0x58   :  { %8647 = vst [vmem:[#allocation76_spill] sm:$0xff] %v3707_v59  ;;  %v3761_v59 = vld [vmem:[%s7756_s5 + $0xf0] sm:$0xff]  ;;  %551 = vmatpush.msrb.mxu2 %v3755_v3 }
  0x59   :  { %8648 = vst [vmem:[#allocation77_spill] sm:$0xff] %v3713_v61  ;;  %v3767_v61 = vld [vmem:[%s7756_s5 + $0xf8] sm:$0xff]  ;;  %576 = vmatpush.msra.mxu0 %v3761_v59 }
  0x5a   :  { %8649 = vst [vmem:[#allocation78_spill] sm:$0xff] %v3719_v50  ;;  %v3773_v50 = vld [vmem:[%s7755_s4 + $0x110] sm:$0xff]  ;;  %616 = vmatpush.msra.mxu2 %v3767_v61 }
  0x5b   :  { %8650 = vst [vmem:[#allocation79_spill] sm:$0xff] %v3725_v63  ;;  %v3785_v63 = vld [vmem:[%s7755_s4 + $0x118] sm:$0xff]  ;;  %530 = vmatpush.msrb.mxu1 %v3773_v50 }
  0x5c   :  { %8651 = vst [vmem:[#allocation80_spill] sm:$0xff] %v3731_v54  ;;  %v3780_v54 = vld [vmem:[%s7756_s5 + $0xe0] sm:$0xff]  ;;  %570 = vmatpush.msrb.mxu3 %v3785_v63 }
  0x5d   :  { %8652 = vst [vmem:[#allocation81_spill] sm:$0xff] %v3737_v56  ;;  %577 = vmatpush.msra.mxu0 %v3780_v54 }
  0x5e   :  { %8653 = vst [vmem:[#allocation82_spill] sm:$0xff] %v3743_v57  ;;  %v3792_v57 = vld [vmem:[%s7756_s5 + $0xe8] sm:$0xff] }
  0x5f   :  { %8654 = vst [vmem:[#allocation83_spill] sm:$0xff] %v3749_v52  ;;  %v3799_v52 = vld [vmem:[%s7756_s5 + $0xd0] sm:$0xff]  ;;  %617 = vmatpush.msra.mxu2 %v3792_v57 }
  0x60   :  { %8655 = vst [vmem:[#allocation84_spill] sm:$0xff] %v3755_v3  ;;  %v8664_v3 = vmov 0   ;;  %578 = vmatpush.msra.mxu0 %v3799_v52 }
  0x61   :  { %8656 = vst [vmem:[#allocation85_spill] sm:$0xff] %v3761_v59  ;;  %v3806_v59 = vld [vmem:[%s7756_s5 + $0xd8] sm:$0xff]  ;;  %2498 = vset.pattern.permute.xlu2 %v8664_v3  ;;  %2501 = vset.pattern.permute.xlu0 %v8664_v3  ;;  %v3833_v3 = vld [vmem:[%s7756_s5 + $0x1f0] sm:$0xff] }
  0x62   :  { %8657 = vst [vmem:[#allocation86_spill] sm:$0xff] %v3767_v61  ;;  %618 = vmatpush.msra.mxu2 %v3806_v59  ;;  %v3877_v61 = vld [vmem:[%s7756_s5 + $0x1d0] sm:$0xff] }
  0x63   :  { %8658 = vst [vmem:[#allocation87_spill] sm:$0xff] %v3773_v50  ;;  %v3860_v50 = vld [vmem:[%s7756_s5 + $0xb8] sm:$0xff] }
  0x64   :  { %8659 = vst [vmem:[#allocation88_spill] sm:$0xff] %v3780_v54  ;;  %v3816_v54 = vld [vmem:[%s7755_s4 + $0x100] sm:$0xff] }
  0x65   :  { %8660 = vst [vmem:[#allocation89_spill] sm:$0xff] %v3785_v63  ;;  %v3821_v63 = vld [vmem:[%s7755_s4 + $0x108] sm:$0xff]  ;;  %531 = vmatpush.msrb.mxu1 %v3816_v54 }
  0x66   :  { %8661 = vst [vmem:[#allocation90_spill] sm:$0xff] %v3792_v57  ;;  %v3826_v57 = vld [vmem:[%s7756_s5 + $0xc0] sm:$0xff]  ;;  %571 = vmatpush.msrb.mxu3 %v3821_v63 }
  0x67   :  { %8662 = vst [vmem:[#allocation91_spill] sm:$0xff] %v3799_v52  ;;  %v3843_v52 = vld [vmem:[%s7756_s5 + $0x1f8] sm:$0xff]  ;;  %579 = vmatpush.msra.mxu0 %v3826_v57  ;;  %596 = vmatpush.msra.mxu1 %v3833_v3 }
  0x68   :  { %8663 = vst [vmem:[#allocation92_spill] sm:$0xff] %v3806_v59  ;;  %v3838_v59 = vld [vmem:[%s7756_s5 + $0xc8] sm:$0xff]  ;;  %636 = vmatpush.msra.mxu3 %v3843_v52 }
  0x69   :  { %8665 = vst [vmem:[#allocation93_spill] sm:$0xff] %v3816_v54  ;;  %v3855_v54 = vld [vmem:[%s7756_s5 + $0x1e0] sm:$0xff]  ;;  %619 = vmatpush.msra.mxu2 %v3838_v59 }
  0x6a   :  { %8666 = vst [vmem:[#allocation94_spill] sm:$0xff] %v3821_v63  ;;  %v3850_v63 = vld [vmem:[%s7756_s5 + $0xb0] sm:$0xff]  ;;  %597 = vmatpush.msra.mxu1 %v3855_v54 }
  0x6b   :  { %8667 = vst [vmem:[#allocation95_spill] sm:$0xff] %v3826_v57  ;;  %v3867_v57 = vld [vmem:[%s7756_s5 + $0x1e8] sm:$0xff]  ;;  %580 = vmatpush.msra.mxu0 %v3850_v63  ;;  %620 = vmatpush.msra.mxu2 %v3860_v50 }
  0x6c   :  { %8668 = vst [vmem:[#allocation96_spill] sm:$0xff] %v3833_v3  ;;  %v3872_v3 = vld [vmem:[%s7756_s5 + $0xa0] sm:$0xff]  ;;  %637 = vmatpush.msra.mxu3 %v3867_v57  ;;  %598 = vmatpush.msra.mxu1 %v3877_v61 }
  0x6d   :  { %8669 = vst [vmem:[#allocation97_spill] sm:$0xff] %v3838_v59  ;;  %v3884_v59 = vld [vmem:[%s7756_s5 + $0xa8] sm:$0xff]  ;;  %581 = vmatpush.msra.mxu0 %v3872_v3 }
  0x6e   :  { %8670 = vst [vmem:[#allocation98_spill] sm:$0xff] %v3843_v52  ;;  %v3889_v52 = vld [vmem:[%s7756_s5 + $0x1d8] sm:$0xff]  ;;  %621 = vmatpush.msra.mxu2 %v3884_v59 }
  0x6f   :  { %8671 = vst [vmem:[#allocation99_spill] sm:$0xff] %v3850_v63  ;;  %v3896_v63 = vld [vmem:[%s7756_s5 + $0x90] sm:$0xff]  ;;  %638 = vmatpush.msra.mxu3 %v3889_v52 }
  0x70   :  { %8672 = vst [vmem:[#allocation100_spill] sm:$0xff] %v3855_v54  ;;  %v3901_v54 = vld [vmem:[%s7756_s5 + $0x1c0] sm:$0xff]  ;;  %582 = vmatpush.msra.mxu0 %v3896_v63 }
  0x71   :  { %8673 = vst [vmem:[#allocation101_spill] sm:$0xff] %v3860_v50  ;;  %v3908_v50 = vld [vmem:[%s7756_s5 + $0x98] sm:$0xff]  ;;  %599 = vmatpush.msra.mxu1 %v3901_v54 }
  0x72   :  { %8674 = vst [vmem:[#allocation102_spill] sm:$0xff] %v3867_v57  ;;  %v3913_v57 = vld [vmem:[%s7756_s5 + $0x1c8] sm:$0xff]  ;;  %622 = vmatpush.msra.mxu2 %v3908_v50 }
  0x73   :  { %8675 = vst [vmem:[#allocation103_spill] sm:$0xff] %v3872_v3  ;;  %639 = vmatpush.msra.mxu3 %v3913_v57  ;;  %v3924_v3 = vld [vmem:[%s7756_s5 + $0x80] sm:$0xff] }
  0x74   :  { %8676 = vst [vmem:[#allocation104_spill] sm:$0xff] %v3877_v61  ;;  %v3929_v61 = vld [vmem:[%s7756_s5 + $0x1b0] sm:$0xff]  ;;  %583 = vmatpush.msra.mxu0 %v3924_v3 }
  0x75   :  { %8677 = vst [vmem:[#allocation105_spill] sm:$0xff] %v3884_v59  ;;  %600 = vmatpush.msra.mxu1 %v3929_v61  ;;  %v3968_v59 = vld [vmem:[%s7756_s5 + $0x60] sm:$0xff] }
  0x76   :  { %8678 = vst [vmem:[#allocation106_spill] sm:$0xff] %v3889_v52  ;;  %v3985_v52 = vld [vmem:[%s7756_s5 + $0x198] sm:$0xff] }
  0x77   :  { %8679 = vst [vmem:[#allocation107_spill] sm:$0xff] %v3896_v63  ;;  %v3934_v63 = vld [vmem:[%s7756_s5 + $0x88] sm:$0xff] }
  0x78   :  { %8680 = vst [vmem:[#allocation108_spill] sm:$0xff] %v3901_v54  ;;  %v3951_v54 = vld [vmem:[%s7756_s5 + $0x1a0] sm:$0xff]  ;;  %623 = vmatpush.msra.mxu2 %v3934_v63 }
  0x79   :  { %8681 = vst [vmem:[#allocation109_spill] sm:$0xff] %v3908_v50  ;;  %v3941_v50 = vld [vmem:[%s7756_s5 + $0x1b8] sm:$0xff]  ;;  %601 = vmatpush.msra.mxu1 %v3951_v54 }
  0x7a   :  { %8682 = vst [vmem:[#allocation110_spill] sm:$0xff] %v3913_v57  ;;  %v3946_v57 = vld [vmem:[%s7756_s5 + $0x70] sm:$0xff]  ;;  %640 = vmatpush.msra.mxu3 %v3941_v50 }
  0x7b   :  { %8683 = vst [vmem:[#allocation111_spill] sm:$0xff] %v3924_v3  ;;  %v3958_v3 = vld [vmem:[%s7756_s5 + $0x78] sm:$0xff]  ;;  %584 = vmatpush.msra.mxu0 %v3946_v57 }
  0x7c   :  { %8684 = vst [vmem:[#allocation112_spill] sm:$0xff] %v3929_v61  ;;  %v3963_v61 = vld [vmem:[%s7756_s5 + $0x1a8] sm:$0xff]  ;;  %624 = vmatpush.msra.mxu2 %v3958_v3 }
  0x7d   :  { %8685 = vst [vmem:[#allocation113_spill] sm:$0xff] %v3934_v63  ;;  %v3975_v63 = vld [vmem:[%s7756_s5 + $0x190] sm:$0xff]  ;;  %641 = vmatpush.msra.mxu3 %v3963_v61  ;;  %585 = vmatpush.msra.mxu0 %v3968_v59 }
  0x7e   :  { %8686 = vst [vmem:[#allocation114_spill] sm:$0xff] %v3941_v50  ;;  %v3980_v50 = vld [vmem:[%s7756_s5 + $0x68] sm:$0xff]  ;;  %602 = vmatpush.msra.mxu1 %v3975_v63 }
  0x7f   :  { %8687 = vst [vmem:[#allocation115_spill] sm:$0xff] %v3946_v57  ;;  %625 = vmatpush.msra.mxu2 %v3980_v50  ;;  %642 = vmatpush.msra.mxu3 %v3985_v52  ;;  %v3996_v57 = vld [vmem:[%s7756_s5 + $0x50] sm:$0xff] }
  0x80   :  { %8688 = vst [vmem:[#allocation116_spill] sm:$0xff] %v3951_v54  ;;  %v4001_v54 = vld [vmem:[%s7756_s5 + $0x180] sm:$0xff]  ;;  %586 = vmatpush.msra.mxu0 %v3996_v57 }
  0x81   :  { %8689 = vst [vmem:[#allocation117_spill] sm:$0xff] %v3958_v3  ;;  %603 = vmatpush.msra.mxu1 %v4001_v54 }
  0x82   :  { %8690 = vst [vmem:[#allocation118_spill] sm:$0xff] %v3963_v61 }
  0x83   :  { %8691 = vst [vmem:[#allocation119_spill] sm:$0xff] %v3968_v59  ;;  %v4006_v59 = vld [vmem:[%s7756_s5 + $0x58] sm:$0xff] }
  0x84   :  { %8692 = vst [vmem:[#allocation120_spill] sm:$0xff] %v3975_v63  ;;  %626 = vmatpush.msra.mxu2 %v4006_v59 }
  0x85   :  { %8693 = vst [vmem:[#allocation121_spill] sm:$0xff] %v3980_v50  ;;  %v4013_v50 = vld [vmem:[%s7756_s5 + $0x188] sm:$0xff] }
  0x86   :  { %8694 = vst [vmem:[#allocation122_spill] sm:$0xff] %v3985_v52  ;;  %643 = vmatpush.msra.mxu3 %v4013_v50  ;;  %v4020_v52 = vld [vmem:[%s7756_s5 + $0x40] sm:$0xff] }
  0x87   :  { %8695 = vst [vmem:[#allocation123_spill] sm:$0xff] %v3996_v57  ;;  %v4025_v57 = vld [vmem:[%s7756_s5 + $0x170] sm:$0xff]  ;;  %587 = vmatpush.msra.mxu0 %v4020_v52 }
  0x88   :  { %8696 = vst [vmem:[#allocation124_spill] sm:$0xff] %v4001_v54  ;;  %v4030_v54 = vld [vmem:[%s7756_s5 + $0x48] sm:$0xff]  ;;  %604 = vmatpush.msra.mxu1 %v4025_v57 }
  0x89   :  { %8697 = vst [vmem:[#allocation125_spill] sm:$0xff] %v4006_v59  ;;  %v4037_v59 = vld [vmem:[%s7756_s5 + $0x178] sm:$0xff]  ;;  %627 = vmatpush.msra.mxu2 %v4030_v54 }
  0x8a   :  { %8698 = vst [vmem:[#allocation126_spill] sm:$0xff] %v4013_v50  ;;  %644 = vmatpush.msra.mxu3 %v4037_v59  ;;  %v4044_v50 = vld [vmem:[%s7756_s5 + $0x30] sm:$0xff] }
  0x8b   :  { %8699 = vst [vmem:[#allocation127_spill] sm:$0xff] %v4020_v52  ;;  %v4049_v52 = vld [vmem:[%s7756_s5 + $0x160] sm:$0xff]  ;;  %588 = vmatpush.msra.mxu0 %v4044_v50 }
  0x8c   :  { %8700 = vst [vmem:[#allocation128_spill] sm:$0xff] %v4025_v57  ;;  %v4054_v57 = vld [vmem:[%s7756_s5 + $0x38] sm:$0xff]  ;;  %605 = vmatpush.msra.mxu1 %v4049_v52 }
  0x8d   :  { %8701 = vst [vmem:[#allocation129_spill] sm:$0xff] %v4030_v54  ;;  %v4061_v54 = vld [vmem:[%s7756_s5 + $0x168] sm:$0xff]  ;;  %628 = vmatpush.msra.mxu2 %v4054_v57 }
  0x8e   :  { %8702 = vst [vmem:[#allocation130_spill] sm:$0xff] %v4037_v59  ;;  %645 = vmatpush.msra.mxu3 %v4061_v54  ;;  %v4068_v59 = vld [vmem:[%s7756_s5 + $0x20] sm:$0xff] }
  0x8f   :  { %8703 = vst [vmem:[#allocation131_spill] sm:$0xff] %v4044_v50  ;;  %v4073_v50 = vld [vmem:[%s7756_s5 + $0x150] sm:$0xff]  ;;  %589 = vmatpush.msra.mxu0 %v4068_v59 }
  0x90   :  { %8704 = vst [vmem:[#allocation132_spill] sm:$0xff] %v4049_v52  ;;  %v4078_v52 = vld [vmem:[%s7756_s5 + $0x28] sm:$0xff]  ;;  %606 = vmatpush.msra.mxu1 %v4073_v50  ;;  %v44_v63 = vpop.permute.xlu0 %43 }
  0x91   :  { %8705 = vst [vmem:[#allocation133_spill] sm:$0xff] %v4054_v57  ;;  %v4085_v57 = vld [vmem:[%s7756_s5 + $0x158] sm:$0xff]  ;;  %629 = vmatpush.msra.mxu2 %v4078_v52 }
  0x92   :  { %8706 = vst [vmem:[#allocation134_spill] sm:$0xff] %v4061_v54  ;;  %646 = vmatpush.msra.mxu3 %v4085_v57  ;;  %v4092_v54 = vld [vmem:[%s7756_s5 + $0x10] sm:$0xff] }
  0x93   :  { %8707 = vst [vmem:[#allocation135_spill] sm:$0xff] %v4068_v59  ;;  %v4097_v59 = vld [vmem:[%s7756_s5 + $0x140] sm:$0xff]  ;;  %590 = vmatpush.msra.mxu0 %v4092_v54 }
  0x94   :  { %8708 = vst [vmem:[#allocation136_spill] sm:$0xff] %v4073_v50  ;;  %v4102_v50 = vld [vmem:[%s7756_s5 + $0x18] sm:$0xff]  ;;  %607 = vmatpush.msra.mxu1 %v4097_v59 }
  0x95   :  { %8709 = vst [vmem:[#allocation137_spill] sm:$0xff] %v4078_v52  ;;  %v4109_v52 = vld [vmem:[%s7756_s5 + $0x148] sm:$0xff]  ;;  %630 = vmatpush.msra.mxu2 %v4102_v50 }
  0x96   :  { %8710 = vst [vmem:[#allocation138_spill] sm:$0xff] %v4085_v57  ;;  %647 = vmatpush.msra.mxu3 %v4109_v52  ;;  %v4116_v57 = vld [vmem:[%s7756_s5] sm:$0xff] }
  0x97   :  { %8711 = vst [vmem:[#allocation139_spill] sm:$0xff] %v4092_v54  ;;  %v4121_v54 = vld [vmem:[%s7756_s5 + $0x130] sm:$0xff]  ;;  %591 = vmatpush.msra.mxu0 %v4116_v57 }
  0x98   :  { %8712 = vst [vmem:[#allocation140_spill] sm:$0xff] %v4097_v59  ;;  %v4126_v59 = vld [vmem:[%s7756_s5 + $0x8] sm:$0xff]  ;;  %608 = vmatpush.msra.mxu1 %v4121_v54 }
  0x99   :  { %8713 = vst [vmem:[#allocation141_spill] sm:$0xff] %v4102_v50  ;;  %v4133_v50 = vld [vmem:[%s7756_s5 + $0x138] sm:$0xff]  ;;  %631 = vmatpush.msra.mxu2 %v4126_v59  ;;  %v106_v60 = vpop.permute.xlu0 %105 }
  0x9a   :  { %8714 = vst [vmem:[#allocation142_spill] sm:$0xff] %v4109_v52  ;;  %648 = vmatpush.msra.mxu3 %v4133_v50  ;;  %v4140_v52 = vld [vmem:[%s7756_s5 + $0x120] sm:$0xff] }
  0x9b   :  { %8715 = vst [vmem:[#allocation143_spill] sm:$0xff] %v4116_v57  ;;  %v4145_v57 = vld [vmem:[%s7756_s5 + $0x128] sm:$0xff]  ;;  %609 = vmatpush.msra.mxu1 %v4140_v52 }
  0x9c   :  { %8716 = vst [vmem:[#allocation144_spill] sm:$0xff] %v4121_v54  ;;  %v40_v54 = vld [vmem:[%s7757_s1] sm:$0xf]  ;;  %649 = vmatpush.msra.mxu3 %v4145_v57 }
  0x9d   :  { %8717 = vst [vmem:[#allocation145_spill] sm:$0xff] %v4126_v59  ;;  %v4155_v59 = vld [vmem:[%s7756_s5 + $0x110] sm:$0xff]  ;;  %v82_v3 = vperm.slane %v40_v54, 0  ;;  %v136_v61 = vperm.slane %v40_v54, 1  ;;  %v137_v62 = vperm.slane %v40_v54, 3 }
  0x9e   :  { %8718 = vst [vmem:[#allocation146_spill] sm:$0xff] %v4133_v50  ;;  %v4160_v50 = vld [vmem:[%s7756_s5 + $0x118] sm:$0xff]  ;;  %610 = vmatpush.msra.mxu1 %v4155_v59 }
  0x9f   :  { %8719 = vst [vmem:[#allocation147_spill] sm:$0xff] %v4140_v52  ;;  %650 = vmatpush.msra.mxu3 %v4160_v50  ;;  %v4172_v52 = vld [vmem:[%s7756_s5 + $0x108] sm:$0xff]  ;;  %v4176_v56 = vperm.slane %v82_v3, 0  ;;  %v4189_v3 = vperm.slane %v174_v58, 0  ;;  %v8775_v58 = vld [vmem:[#allocation49_spill] sm:$0xff] }
  0xa0   :  { %8720 = vst [vmem:[#allocation148_spill] sm:$0xff] %v4145_v57  ;;  %v4167_v57 = vld [vmem:[%s7756_s5 + $0x100] sm:$0xff] }
  0xa1   :  { %8721 = vst [vmem:[#allocation149_spill] sm:$0xff] %v4155_v59  ;;  %611 = vmatpush.msra.mxu1 %v4167_v57  ;;  %651 = vmatpush.msra.mxu3 %v4172_v52  ;;  %v4178_v59 = vperm.slane %v136_v61, 1  ;;  %v88_v48 = vmul.f32 %v4176_v56, %v44_v63  ;;  %v365_v61 = vpop.f32.mrf.mxu0 }
  0xa2   :  { %8722 = vst [vmem:[#allocation150_spill] sm:$0xff] %v4160_v50  ;;  %v83_v50 = vperm.slane %v40_v54, 2 }
  0xa3   :  { %8723 = vst [vmem:[#allocation151_spill] sm:$0xff] %v4167_v57  ;;  %v142_v46 = vmul.f32 %v4178_v59, %v106_v60  ;;  %v4187_v57 = vperm.slane %v137_v62, 1 }
  0xa4   :  { %8724 = vst [vmem:[#allocation152_spill] sm:$0xff] %v4172_v52  ;;  %v4185_v44 = vperm.slane %v83_v50, 0 }
  0xa5   :  { %8725 = vst [vmem:[#allocation153_spill] sm:$0xff] %v4176_v56  ;;  %v158_v52 = vadd.f32 %v142_v46, %v88_v48  ;;  %v143_v54 = vmul.f32 %v4187_v57, %v106_v60  ;;  %v385_v56 = vpop.f32.mrf.mxu1  ;;  %v8777_v60 = vld [vmem:[#allocation50_spill] sm:$0xff] }
  0xa6   :  { %8726 = vst [vmem:[#allocation154_spill] sm:$0xff] %v4178_v59  ;;  %v89_v55 = vmul.f32 %v4185_v44, %v44_v63  ;;  %v386_v59 = vadd.f32 %v385_v56, %v365_v61  ;;  %v405_v50 = vpop.f32.mrf.mxu2  ;;  %v8774_v56 = vld [vmem:[#allocation48_spill] sm:$0xff]  ;;  %v8779_v61 = vld [vmem:[#allocation53_spill] sm:$0xff] }
  0xa7   :  { %v180_v42 = vadd.f32 %v4189_v3, %v158_v52  ;;  %v425_v62 = vpop.f32.mrf.mxu3  ;;  %v8771_v52 = vld [vmem:[#allocation45_spill] sm:$0xff]  ;;  %v8778_v63 = vld [vmem:[#allocation52_spill] sm:$0xff] }
  0xa8   :  { %v159_v40 = vadd.f32 %v143_v54, %v89_v55  ;;  %v426_v48 = vadd.f32 %v425_v62, %v405_v50  ;;  %v8773_v55 = vld [vmem:[#allocation46_spill] sm:$0xff]  ;;  %v8780_v54 = vld [vmem:[#allocation55_spill] sm:$0xff]  ;;  %v8782_v62 = vld [vmem:[#allocation56_spill] sm:$0xff] }
  0xa9   :  { %v428_v53 = vadd.f32 %v386_v59, %v180_v42  ;;  %v8766_v42 = vld [vmem:[#allocation40_spill] sm:$0xff]  ;;  %v8776_v59 = vld [vmem:[#allocation51_spill] sm:$0xff]  ;;  %v8781_v50 = vld [vmem:[#allocation54_spill] sm:$0xff] }
  0xaa   :  { %v181_v46 = vadd.f32 %v4194_v51, %v159_v40  ;;  %v4208_v40 = vld [vmem:[%s7754_s0 + $0x8] sm:$0xff] }
  0xab   :  { %2508 = vtanh.f32 %v428_v53  ;;  %48 = vperm.xlu1 %2496, %v4208_v40   ;;  %v8772_v53 = vld [vmem:[#allocation47_spill] sm:$0xff] }
  0xac   :  { %v429_v38 = vadd.f32 %v426_v48, %v181_v46  ;;  %v8783_v46 = vld [vmem:[#allocation57_spill] sm:$0xff]  ;;  %v8784_v48 = vld [vmem:[#allocation59_spill] sm:$0xff] }
  0xae   :  { %2510 = vtanh.f32 %v429_v38 }
  0xb1   :  { %v4197_v49 = vpop.eup %2508 }
  0xb2   :  { %512 = vmatmul.f32.vlgmr.msrb.gmra.mxu0 %v4197_v49  ;;  %552 = vmatmul.f32.vlgmr.msrb.gmra.mxu2 %v4197_v49 }
  0xb3   :  { %662 = vmatpush.msrb.mxu0 %v3012_v0  ;;  %702 = vmatpush.msrb.mxu2 %v3022_v2  ;;  %v8727_v0 = vmov 0.0   ;;  %v8729_v2 = vld [vmem:[#allocation3_spill] sm:$0xff] }
  0xb4   :  { %v4212_v38 = vpop.eup %2510 }
  0xb5   :  { %663 = vmatpush.msrb.mxu0 %v3036_v5  ;;  %703 = vmatpush.msrb.mxu2 %v3048_v7  ;;  %v8731_v5 = vld [vmem:[#allocation4_spill] sm:$0xff]  ;;  %v8733_v7 = vld [vmem:[#allocation5_spill] sm:$0xff] }
  0xb6   :  { %532 = vmatmul.f32.vlgmr.msrb.gmra.mxu1 %v4212_v38  ;;  %572 = vmatmul.f32.vlgmr.msrb.gmra.mxu3 %v4212_v38 }
  0xb7   :  { %664 = vmatpush.msrb.mxu0 %v3058_v9  ;;  %704 = vmatpush.msrb.mxu2 %v3070_v11  ;;  %v8735_v9 = vld [vmem:[#allocation6_spill] sm:$0xff]  ;;  %v8737_v11 = vld [vmem:[#allocation7_spill] sm:$0xff] }
  0xb8   :  { %682 = vmatpush.msrb.mxu1 %v3017_v1  ;;  %722 = vmatpush.msrb.mxu3 %v3031_v4  ;;  %v8728_v1 = vld [vmem:[#allocation9_spill] sm:$0xff]  ;;  %v8730_v4 = vld [vmem:[#allocation11_spill] sm:$0xff] }
  0xb9   :  { %665 = vmatpush.msrb.mxu0 %v3082_v13  ;;  %705 = vmatpush.msrb.mxu2 %v3094_v15  ;;  %v8739_v13 = vld [vmem:[#allocation8_spill] sm:$0xff]  ;;  %v8741_v15 = vld [vmem:[#allocation10_spill] sm:$0xff] }
  0xba   :  { %592 = vmatmul.f32.vlgmr.msra.gmra.mxu0 %v8727_v0  ;;  %632 = vmatmul.f32.vlgmr.msra.gmra.mxu2 %v8727_v0 }
  0xbb   :  { %666 = vmatpush.msrb.mxu0 %v3106_v17  ;;  %683 = vmatpush.msrb.mxu1 %v3041_v6  ;;  %v8732_v6 = vld [vmem:[#allocation13_spill] sm:$0xff]  ;;  %v8743_v17 = vld [vmem:[#allocation12_spill] sm:$0xff] }
  0xbc   :  { %706 = vmatpush.msrb.mxu2 %v3118_v19  ;;  %723 = vmatpush.msrb.mxu3 %v3053_v8  ;;  %v8734_v8 = vld [vmem:[#allocation15_spill] sm:$0xff]  ;;  %v8745_v19 = vld [vmem:[#allocation16_spill] sm:$0xff] }
  0xbd   :  { %667 = vmatpush.msrb.mxu0 %v3130_v21  ;;  %684 = vmatpush.msrb.mxu1 %v3065_v10  ;;  %v8736_v10 = vld [vmem:[#allocation17_spill] sm:$0xff] }
  0xbe   :  { %707 = vmatpush.msrb.mxu2 %v3142_v23  ;;  %724 = vmatpush.msrb.mxu3 %v3075_v12  ;;  %v8738_v12 = vld [vmem:[#allocation19_spill] sm:$0xff]  ;;  %v8747_v21 = vld [vmem:[#allocation25_spill] sm:$0xff]  ;;  %v8749_v23 = vld [vmem:[#allocation20_spill] sm:$0xff] }
  0xbf   :  { %668 = vmatpush.msrb.mxu0 %v3154_v25  ;;  %685 = vmatpush.msrb.mxu1 %v3087_v14  ;;  %v8740_v14 = vld [vmem:[#allocation21_spill] sm:$0xff]  ;;  %v8751_v25 = vld [vmem:[#allocation22_spill] sm:$0xff] }
  0xc0   :  { %708 = vmatpush.msrb.mxu2 %v3166_v27  ;;  %725 = vmatpush.msrb.mxu3 %v3099_v16  ;;  %v8742_v16 = vld [vmem:[#allocation23_spill] sm:$0xff]  ;;  %v8753_v27 = vld [vmem:[#allocation28_spill] sm:$0xff] }
  0xc1   :  { %612 = vmatmul.f32.vlgmr.msra.gmra.mxu1 %v8727_v0  ;;  %652 = vmatmul.f32.vlgmr.msra.gmra.mxu3 %v8727_v0  ;;  %v8787_v0 = vld [vmem:[#allocation61_spill] sm:$0xff] }
  0xc2   :  { %669 = vmatpush.msrb.mxu0 %v3178_v29  ;;  %686 = vmatpush.msrb.mxu1 %v3111_v18  ;;  %v8744_v18 = vld [vmem:[#allocation14_spill] sm:$0xff]  ;;  %v8755_v29 = vld [vmem:[#allocation27_spill] sm:$0xff] }
  0xc3   :  { %709 = vmatpush.msrb.mxu2 %v3190_v31  ;;  %726 = vmatpush.msrb.mxu3 %v3123_v20  ;;  %v8746_v20 = vmov 1   ;;  %v8757_v31 = vld [vmem:[#allocation30_spill] sm:$0xff] }
  0xc4   :  { %670 = vmatpush.msrb.mxu0 %v3202_v33  ;;  %687 = vmatpush.msrb.mxu1 %v3135_v22  ;;  %v8748_v22 = vld [vmem:[#allocation18_spill] sm:$0xff]  ;;  %v8759_v33 = vld [vmem:[#allocation33_spill] sm:$0xff] }
  0xc5   :  { %710 = vmatpush.msrb.mxu2 %v3214_v35  ;;  %727 = vmatpush.msrb.mxu3 %v3147_v24  ;;  %v8750_v24 = vld [vmem:[#allocation26_spill] sm:$0xff] }
  0xc6   :  { %671 = vmatpush.msrb.mxu0 %v3226_v37  ;;  %688 = vmatpush.msrb.mxu1 %v3159_v26  ;;  %v8752_v26 = vld [vmem:[#allocation24_spill] sm:$0xff]  ;;  %v8761_v35 = vld [vmem:[#allocation34_spill] sm:$0xff]  ;;  %v8763_v37 = vld [vmem:[#allocation37_spill] sm:$0xff] }
  0xc7   :  { %711 = vmatpush.msrb.mxu2 %v3238_v39  ;;  %728 = vmatpush.msrb.mxu3 %v3171_v28  ;;  %v8754_v28 = vld [vmem:[#allocation29_spill] sm:$0xff]  ;;  %v8764_v39 = vld [vmem:[#allocation39_spill] sm:$0xff] }
  0xc8   :  { %672 = vmatpush.msrb.mxu0 %v3250_v41  ;;  %689 = vmatpush.msrb.mxu1 %v3183_v30  ;;  %v8756_v30 = vld [vmem:[#allocation31_spill] sm:$0xff]  ;;  %v8765_v41 = vld [vmem:[#allocation38_spill] sm:$0xff] }
  0xc9   :  { %712 = vmatpush.msrb.mxu2 %v3262_v43  ;;  %729 = vmatpush.msrb.mxu3 %v3195_v32  ;;  %v8758_v32 = vld [vmem:[#allocation32_spill] sm:$0xff]  ;;  %v8767_v43 = vld [vmem:[#allocation41_spill] sm:$0xff] }
  0xca   :  { %673 = vmatpush.msrb.mxu0 %v3274_v45  ;;  %690 = vmatpush.msrb.mxu1 %v3207_v34  ;;  %v8760_v34 = vld [vmem:[#allocation35_spill] sm:$0xff] }
  0xcb   :  { %713 = vmatpush.msrb.mxu2 %v3286_v47  ;;  %730 = vmatpush.msrb.mxu3 %v3219_v36  ;;  %v8762_v36 = vld [vmem:[#allocation36_spill] sm:$0xff]  ;;  %v8768_v45 = vld [vmem:[#allocation43_spill] sm:$0xff]  ;;  %v8769_v47 = vld [vmem:[#allocation42_spill] sm:$0xff] }
  0xcc   :  { %674 = vmatpush.msrb.mxu0 %v8728_v1  ;;  %691 = vmatpush.msrb.mxu1 %v8729_v2  ;;  %v8788_v1 = vld [vmem:[#allocation63_spill] sm:$0xff]  ;;  %v8789_v2 = vld [vmem:[#allocation62_spill] sm:$0xff] }
  0xcd   :  { %714 = vmatpush.msrb.mxu2 %v8730_v4  ;;  %731 = vmatpush.msrb.mxu3 %v8731_v5  ;;  %v8790_v4 = vld [vmem:[#allocation64_spill] sm:$0xff]  ;;  %v8791_v5 = vld [vmem:[#allocation65_spill] sm:$0xff] }
  0xce   :  { %675 = vmatpush.msrb.mxu0 %v8732_v6  ;;  %692 = vmatpush.msrb.mxu1 %v8733_v7  ;;  %v8792_v6 = vld [vmem:[#allocation67_spill] sm:$0xff]  ;;  %v8793_v7 = vld [vmem:[#allocation66_spill] sm:$0xff] }
  0xcf   :  { %715 = vmatpush.msrb.mxu2 %v8734_v8  ;;  %732 = vmatpush.msrb.mxu3 %v8735_v9  ;;  %v8794_v8 = vld [vmem:[#allocation68_spill] sm:$0xff]  ;;  %v8795_v9 = vld [vmem:[#allocation69_spill] sm:$0xff] }
  0xd0   :  { %676 = vmatpush.msrb.mxu0 %v8736_v10  ;;  %693 = vmatpush.msrb.mxu1 %v8737_v11  ;;  %v8796_v10 = vld [vmem:[#allocation71_spill] sm:$0xff]  ;;  %v8797_v11 = vld [vmem:[#allocation70_spill] sm:$0xff] }
  0xd1   :  { %716 = vmatpush.msrb.mxu2 %v8738_v12  ;;  %733 = vmatpush.msrb.mxu3 %v8739_v13  ;;  %v8798_v12 = vld [vmem:[#allocation72_spill] sm:$0xff]  ;;  %v8799_v13 = vld [vmem:[#allocation73_spill] sm:$0xff] }
  0xd2   :  { %677 = vmatpush.msrb.mxu0 %v8740_v14  ;;  %694 = vmatpush.msrb.mxu1 %v8741_v15  ;;  %v8800_v14 = vld [vmem:[#allocation75_spill] sm:$0xff]  ;;  %v8801_v15 = vld [vmem:[#allocation74_spill] sm:$0xff] }
  0xd3   :  { %717 = vmatpush.msrb.mxu2 %v8742_v16  ;;  %734 = vmatpush.msrb.mxu3 %v8743_v17  ;;  %v8802_v16 = vld [vmem:[#allocation76_spill] sm:$0xff]  ;;  %v8803_v17 = vld [vmem:[#allocation77_spill] sm:$0xff] }
  0xd4   :  { %678 = vmatmul.f32.vlgmr.msrb.gmra.mxu0 %v4197_v49  ;;  %718 = vmatmul.f32.vlgmr.msrb.gmra.mxu2 %v4197_v49  ;;  %v8770_v49 = vld [vmem:[#allocation44_spill] sm:$0xff] }
  0xd5   :  { %695 = vmatpush.msrb.mxu1 %v8744_v18  ;;  %735 = vmatpush.msrb.mxu3 %v8745_v19  ;;  %v8804_v18 = vld [vmem:[#allocation79_spill] sm:$0xff]  ;;  %v8805_v19 = vld [vmem:[#allocation78_spill] sm:$0xff] }
  0xd6   :  { %2497 = vset.pattern.permute.xlu1 %v8746_v20  ;;  %746 = vmatpush.msra.mxu0 %v8747_v21  ;;  %v8806_v21 = vld [vmem:[#allocation80_spill] sm:$0xff] }
  0xd7   :  { %696 = vmatpush.msrb.mxu1 %v8748_v22  ;;  %736 = vmatpush.msrb.mxu3 %v8749_v23  ;;  %v8807_v22 = vld [vmem:[#allocation81_spill] sm:$0xff]  ;;  %v8808_v23 = vld [vmem:[#allocation83_spill] sm:$0xff] }
  0xd8   :  { %109 = vperm.xlu1 %2497, %v4208_v40   ;;  %786 = vmatpush.msra.mxu2 %v8750_v24  ;;  %v8785_v40 = vld [vmem:[#allocation58_spill] sm:$0xff] }
  0xd9   :  { %697 = vmatpush.msrb.mxu1 %v8751_v25  ;;  %737 = vmatpush.msrb.mxu3 %v8752_v26  ;;  %v8809_v24 = vld [vmem:[#allocation82_spill] sm:$0xff]  ;;  %v8810_v25 = vld [vmem:[#allocation84_spill] sm:$0xff]  ;;  %v8811_v26 = vld [vmem:[#allocation85_spill] sm:$0xff] }
  0xda   :  { %698 = vmatmul.f32.vlgmr.msrb.gmra.mxu1 %v4212_v38  ;;  %738 = vmatmul.f32.vlgmr.msrb.gmra.mxu3 %v4212_v38  ;;  %v8786_v38 = vld [vmem:[#allocation60_spill] sm:$0xff] }
  0xdb   :  { %747 = vmatpush.msra.mxu0 %v8753_v27  ;;  %787 = vmatpush.msra.mxu2 %v8754_v28  ;;  %v8812_v27 = vld [vmem:[#allocation86_spill] sm:$0xff]  ;;  %v8813_v28 = vld [vmem:[#allocation87_spill] sm:$0xff] }
  0xdc   :  { %766 = vmatpush.msra.mxu1 %v8755_v29  ;;  %806 = vmatpush.msra.mxu3 %v8756_v30  ;;  %v8814_v29 = vld [vmem:[#allocation89_spill] sm:$0xff]  ;;  %v8815_v30 = vld [vmem:[#allocation88_spill] sm:$0xff] }
  0xdd   :  { %748 = vmatpush.msra.mxu0 %v8757_v31  ;;  %788 = vmatpush.msra.mxu2 %v8758_v32  ;;  %v8816_v31 = vld [vmem:[#allocation90_spill] sm:$0xff]  ;;  %v8817_v32 = vld [vmem:[#allocation93_spill] sm:$0xff] }
  0xde   :  { %767 = vmatpush.msra.mxu1 %v8759_v33  ;;  %807 = vmatpush.msra.mxu3 %v8760_v34  ;;  %v8818_v33 = vld [vmem:[#allocation94_spill] sm:$0xff]  ;;  %v8819_v34 = vld [vmem:[#allocation91_spill] sm:$0xff] }
  0xdf   :  { %749 = vmatpush.msra.mxu0 %v8761_v35  ;;  %789 = vmatpush.msra.mxu2 %v8762_v36  ;;  %v8820_v35 = vld [vmem:[#allocation92_spill] sm:$0xff] }
  0xe0   :  { %768 = vmatpush.msra.mxu1 %v8763_v37  ;;  %808 = vmatpush.msra.mxu3 %v8764_v39  ;;  %v8821_v36 = vld [vmem:[#allocation96_spill] sm:$0xff]  ;;  %v8822_v37 = vld [vmem:[#allocation98_spill] sm:$0xff]  ;;  %v8823_v39 = vld [vmem:[#allocation95_spill] sm:$0xff] }
  0xe1   :  { %750 = vmatpush.msra.mxu0 %v8765_v41  ;;  %790 = vmatpush.msra.mxu2 %v8766_v42  ;;  %v8824_v41 = vld [vmem:[#allocation97_spill] sm:$0xff]  ;;  %v8825_v42 = vld [vmem:[#allocation100_spill] sm:$0xff] }
  0xe2   :  { %769 = vmatpush.msra.mxu1 %v8767_v43  ;;  %809 = vmatpush.msra.mxu3 %v8768_v45  ;;  %v8826_v43 = vld [vmem:[#allocation102_spill] sm:$0xff]  ;;  %v8827_v45 = vld [vmem:[#allocation99_spill] sm:$0xff] }
  0xe3   :  { %751 = vmatpush.msra.mxu0 %v8769_v47  ;;  %791 = vmatpush.msra.mxu2 %v8770_v49  ;;  %v8828_v47 = vld [vmem:[#allocation101_spill] sm:$0xff]  ;;  %v8829_v49 = vld [vmem:[#allocation104_spill] sm:$0xff] }
  0xe4   :  { %770 = vmatpush.msra.mxu1 %v8771_v52  ;;  %810 = vmatpush.msra.mxu3 %v8772_v53  ;;  %v8830_v52 = vld [vmem:[#allocation106_spill] sm:$0xff]  ;;  %v8831_v53 = vld [vmem:[#allocation103_spill] sm:$0xff] }
  0xe5   :  { %752 = vmatpush.msra.mxu0 %v8773_v55  ;;  %792 = vmatpush.msra.mxu2 %v8774_v56  ;;  %v8832_v55 = vld [vmem:[#allocation105_spill] sm:$0xff]  ;;  %v8833_v56 = vld [vmem:[#allocation108_spill] sm:$0xff] }
  0xe6   :  { %771 = vmatpush.msra.mxu1 %v8775_v58  ;;  %811 = vmatpush.msra.mxu3 %v8776_v59  ;;  %v8834_v58 = vld [vmem:[#allocation110_spill] sm:$0xff]  ;;  %v8835_v59 = vld [vmem:[#allocation107_spill] sm:$0xff] }
  0xe7   :  { %753 = vmatpush.msra.mxu0 %v8777_v60  ;;  %793 = vmatpush.msra.mxu2 %v8778_v63  ;;  %v8836_v60 = vld [vmem:[#allocation109_spill] sm:$0xff]  ;;  %v8837_v63 = vld [vmem:[#allocation112_spill] sm:$0xff] }
  0xe8   :  { %772 = vmatpush.msra.mxu1 %v8779_v61  ;;  %812 = vmatpush.msra.mxu3 %v8780_v54  ;;  %v8838_v61 = vld [vmem:[#allocation114_spill] sm:$0xff]  ;;  %v8839_v54 = vld [vmem:[#allocation111_spill] sm:$0xff] }
  0xe9   :  { %754 = vmatpush.msra.mxu0 %v8781_v50  ;;  %794 = vmatpush.msra.mxu2 %v8782_v62  ;;  %v8840_v50 = vld [vmem:[#allocation113_spill] sm:$0xff]  ;;  %v8841_v62 = vld [vmem:[#allocation116_spill] sm:$0xff] }
  0xea   :  { %773 = vmatpush.msra.mxu1 %v8783_v46  ;;  %813 = vmatpush.msra.mxu3 %v8784_v48  ;;  %v8842_v46 = vld [vmem:[#allocation118_spill] sm:$0xff]  ;;  %v8843_v48 = vld [vmem:[#allocation115_spill] sm:$0xff] }
  0xeb   :  { %755 = vmatpush.msra.mxu0 %v8785_v40  ;;  %795 = vmatpush.msra.mxu2 %v8786_v38  ;;  %v8844_v40 = vld [vmem:[#allocation117_spill] sm:$0xff]  ;;  %v8845_v38 = vld [vmem:[#allocation120_spill] sm:$0xff] }
  0xec   :  { %774 = vmatpush.msra.mxu1 %v8787_v0  ;;  %814 = vmatpush.msra.mxu3 %v8788_v1  ;;  %v8846_v0 = vld [vmem:[#allocation122_spill] sm:$0xff]  ;;  %v8847_v1 = vld [vmem:[#allocation119_spill] sm:$0xff] }
  0xed   :  { %756 = vmatpush.msra.mxu0 %v8789_v2  ;;  %796 = vmatpush.msra.mxu2 %v8790_v4  ;;  %v8848_v2 = vld [vmem:[#allocation121_spill] sm:$0xff]  ;;  %v8849_v4 = vld [vmem:[#allocation124_spill] sm:$0xff] }
  0xee   :  { %775 = vmatpush.msra.mxu1 %v8791_v5  ;;  %815 = vmatpush.msra.mxu3 %v8792_v6  ;;  %v8850_v5 = vld [vmem:[#allocation126_spill] sm:$0xff]  ;;  %v8851_v6 = vld [vmem:[#allocation123_spill] sm:$0xff] }
  0xef   :  { %757 = vmatpush.msra.mxu0 %v8793_v7  ;;  %797 = vmatpush.msra.mxu2 %v8794_v8  ;;  %v8852_v7 = vld [vmem:[#allocation125_spill] sm:$0xff]  ;;  %v8853_v8 = vld [vmem:[#allocation128_spill] sm:$0xff] }
  0xf0   :  { %776 = vmatpush.msra.mxu1 %v8795_v9  ;;  %816 = vmatpush.msra.mxu3 %v8796_v10  ;;  %v8854_v9 = vld [vmem:[#allocation130_spill] sm:$0xff]  ;;  %v8855_v10 = vld [vmem:[#allocation127_spill] sm:$0xff] }
  0xf1   :  { %758 = vmatpush.msra.mxu0 %v8797_v11  ;;  %798 = vmatpush.msra.mxu2 %v8798_v12  ;;  %v8856_v11 = vld [vmem:[#allocation129_spill] sm:$0xff]  ;;  %v8857_v12 = vld [vmem:[#allocation132_spill] sm:$0xff] }
  0xf2   :  { %777 = vmatpush.msra.mxu1 %v8799_v13  ;;  %817 = vmatpush.msra.mxu3 %v8800_v14  ;;  %v8858_v13 = vld [vmem:[#allocation134_spill] sm:$0xff]  ;;  %v8859_v14 = vld [vmem:[#allocation131_spill] sm:$0xff] }
  0xf3   :  { %759 = vmatpush.msra.mxu0 %v8801_v15  ;;  %799 = vmatpush.msra.mxu2 %v8802_v16  ;;  %v8860_v15 = vld [vmem:[#allocation133_spill] sm:$0xff]  ;;  %v8861_v16 = vld [vmem:[#allocation136_spill] sm:$0xff] }
  0xf4   :  { %778 = vmatpush.msra.mxu1 %v8803_v17  ;;  %818 = vmatpush.msra.mxu3 %v8804_v18  ;;  %v8862_v17 = vld [vmem:[#allocation138_spill] sm:$0xff]  ;;  %v8863_v18 = vld [vmem:[#allocation135_spill] sm:$0xff] }
  0xf5   :  { %760 = vmatpush.msra.mxu0 %v8805_v19  ;;  %800 = vmatpush.msra.mxu2 %v8806_v21  ;;  %v8864_v19 = vld [vmem:[#allocation137_spill] sm:$0xff]  ;;  %v8865_v21 = vld [vmem:[#allocation140_spill] sm:$0xff] }
  0xf6   :  { %779 = vmatpush.msra.mxu1 %v8807_v22  ;;  %819 = vmatpush.msra.mxu3 %v8808_v23  ;;  %v8866_v22 = vld [vmem:[#allocation142_spill] sm:$0xff]  ;;  %v8867_v23 = vld [vmem:[#allocation139_spill] sm:$0xff] }
  0xf7   :  { %761 = vmatpush.msra.mxu0 %v8809_v24  ;;  %801 = vmatpush.msra.mxu2 %v8810_v25  ;;  %v8868_v24 = vld [vmem:[#allocation141_spill] sm:$0xff]  ;;  %v8869_v25 = vld [vmem:[#allocation144_spill] sm:$0xff] }
  0xf8   :  { %780 = vmatpush.msra.mxu1 %v8813_v28  ;;  %820 = vmatpush.msra.mxu3 %v8814_v29  ;;  %v8872_v28 = vld [vmem:[#allocation145_spill] sm:$0xff]  ;;  %v8873_v29 = vld [vmem:[#allocation147_spill] sm:$0xff] }
  0xf9   :  { %826 = vmatpush.msrb.mxu0 %v8811_v26  ;;  %866 = vmatpush.msrb.mxu2 %v8812_v27  ;;  %v8870_v26 = vld [vmem:[#allocation146_spill] sm:$0xff]  ;;  %v8871_v27 = vld [vmem:[#allocation143_spill] sm:$0xff] }
  0xfa   :  { %781 = vmatpush.msra.mxu1 %v8817_v32  ;;  %821 = vmatpush.msra.mxu3 %v8818_v33  ;;  %v8876_v32 = vld [vmem:[#allocation149_spill] sm:$0xff]  ;;  %v8877_v33 = vld [vmem:[#allocation150_spill] sm:$0xff] }
  0xfb   :  { %827 = vmatpush.msrb.mxu0 %v8815_v30  ;;  %867 = vmatpush.msrb.mxu2 %v8816_v31  ;;  %v8874_v30 = vld [vmem:[#allocation148_spill] sm:$0xff]  ;;  %v8875_v31 = vmov 0  }
  0xfc   :  { %846 = vmatpush.msrb.mxu1 %v8821_v36  ;;  %886 = vmatpush.msrb.mxu3 %v8822_v37 }
  0xfd   :  { %828 = vmatpush.msrb.mxu0 %v8819_v34  ;;  %868 = vmatpush.msrb.mxu2 %v8820_v35  ;;  %v8878_v34 = vld [vmem:[#allocation151_spill] sm:$0xff]  ;;  %v8879_v35 = vld [vmem:[#allocation152_spill] sm:$0xff] }
  0xfe   :  { %847 = vmatpush.msrb.mxu1 %v8825_v42  ;;  %887 = vmatpush.msrb.mxu3 %v8826_v43 }
  0xff   :  { %829 = vmatpush.msrb.mxu0 %v8823_v39  ;;  %869 = vmatpush.msrb.mxu2 %v8824_v41 }
 0x100   :  { %848 = vmatpush.msrb.mxu1 %v8829_v49  ;;  %888 = vmatpush.msrb.mxu3 %v8830_v52  ;;  %v8880_v49 = vld [vmem:[#allocation153_spill] sm:$0xff] }
 0x101   :  { %830 = vmatpush.msrb.mxu0 %v8827_v45  ;;  %870 = vmatpush.msrb.mxu2 %v8828_v47 }
 0x102   :  { %849 = vmatpush.msrb.mxu1 %v8833_v56  ;;  %889 = vmatpush.msrb.mxu3 %v8834_v58 }
 0x103   :  { %831 = vmatpush.msrb.mxu0 %v8831_v53  ;;  %871 = vmatpush.msrb.mxu2 %v8832_v55  ;;  %v8881_v53 = vld [vmem:[#allocation154_spill] sm:$0xff] }
 0x104   :  { %850 = vmatpush.msrb.mxu1 %v8837_v63  ;;  %890 = vmatpush.msrb.mxu3 %v8838_v61 }
 0x105   :  { %832 = vmatpush.msrb.mxu0 %v8835_v59  ;;  %872 = vmatpush.msrb.mxu2 %v8836_v60 }
 0x106   :  { %851 = vmatpush.msrb.mxu1 %v8841_v62  ;;  %891 = vmatpush.msrb.mxu3 %v8842_v46 }
 0x107   :  { %833 = vmatpush.msrb.mxu0 %v8839_v54  ;;  %873 = vmatpush.msrb.mxu2 %v8840_v50 }
 0x108   :  { %852 = vmatpush.msrb.mxu1 %v8845_v38  ;;  %892 = vmatpush.msrb.mxu3 %v8846_v0 }
 0x109   :  { %834 = vmatpush.msrb.mxu0 %v8843_v48  ;;  %874 = vmatpush.msrb.mxu2 %v8844_v40  ;;  %v212_v48 = vld [vmem:[%s7759_s6] sm:$0x3] }
 0x10a   :  { %853 = vmatpush.msrb.mxu1 %v8849_v4  ;;  %893 = vmatpush.msrb.mxu3 %v8850_v5 }
 0x10b   :  { %835 = vmatpush.msrb.mxu0 %v8847_v1  ;;  %875 = vmatpush.msrb.mxu2 %v8848_v2  ;;  %v4422_v1 = vperm.slane %v212_v48, 0 }
 0x10c   :  { %854 = vmatpush.msrb.mxu1 %v8853_v8  ;;  %894 = vmatpush.msrb.mxu3 %v8854_v9 }
 0x10d   :  { %836 = vmatpush.msrb.mxu0 %v8851_v6  ;;  %876 = vmatpush.msrb.mxu2 %v8852_v7 }
 0x10e   :  { %855 = vmatpush.msrb.mxu1 %v8857_v12  ;;  %895 = vmatpush.msrb.mxu3 %v8858_v13  ;;  %v4430_v13 = vperm.slane %v212_v48, 1  ;;  %v4590_v48 = vld [vmem:[%s7753_s3 + $0x1b8] sm:$0xff] }
 0x10f   :  { %837 = vmatpush.msrb.mxu0 %v8855_v10  ;;  %877 = vmatpush.msrb.mxu2 %v8856_v11 }
 0x110   :  { %856 = vmatpush.msrb.mxu1 %v8861_v16  ;;  %896 = vmatpush.msrb.mxu3 %v8862_v17  ;;  %v4441_v16 = vld [vmem:[%s7753_s3 + $0xf8] sm:$0xff]  ;;  %v4447_v17 = vld [vmem:[%s7753_s3 + $0xe0] sm:$0xff] }
 0x111   :  { %838 = vmatpush.msrb.mxu0 %v8859_v14  ;;  %878 = vmatpush.msrb.mxu2 %v8860_v15  ;;  %v4435_v15 = vld [vmem:[%s7753_s3 + $0xf0] sm:$0xff] }
 0x112   :  { %857 = vmatpush.msrb.mxu1 %v8865_v21  ;;  %897 = vmatpush.msrb.mxu3 %v8866_v22  ;;  %v4462_v22 = vld [vmem:[%s7753_s3 + $0xd0] sm:$0xff] }
 0x113   :  { %839 = vmatpush.msrb.mxu0 %v8863_v18  ;;  %879 = vmatpush.msrb.mxu2 %v8864_v19  ;;  %v4453_v18 = vld [vmem:[%s7753_s3 + $0xe8] sm:$0xff] }
 0x114   :  { %858 = vmatpush.msrb.mxu1 %v8869_v25  ;;  %898 = vmatpush.msrb.mxu3 %v8870_v26 }
 0x115   :  { %840 = vmatpush.msrb.mxu0 %v8867_v23  ;;  %880 = vmatpush.msrb.mxu2 %v8868_v24  ;;  %v4468_v23 = vld [vmem:[%s7753_s3 + $0xd8] sm:$0xff]  ;;  %v4476_v24 = vld [vmem:[%s7753_s3 + $0xc0] sm:$0xff] }
 0x116   :  { %859 = vmatpush.msrb.mxu1 %v8873_v29  ;;  %899 = vmatpush.msrb.mxu3 %v8874_v30 }
 0x117   :  { %841 = vmatpush.msrb.mxu0 %v8871_v27  ;;  %881 = vmatpush.msrb.mxu2 %v8872_v28 }
 0x118   :  { %2500 = vset.pattern.permute.xlu1 %v8875_v31  ;;  %860 = vmatpush.msrb.mxu1 %v8876_v32 }
 0x119   :  { %900 = vmatpush.msrb.mxu3 %v8877_v33 }
 0x11a   :  { %861 = vmatpush.msrb.mxu1 %v8878_v34 }
 0x11b   :  { %901 = vmatpush.msrb.mxu3 %v8879_v35 }
 0x11d   :  { %v49_v36 = vpop.permute.xlu1 %48 }
 0x11e   :  { %v90_v52 = vmul.f32 %v8880_v49, %v49_v36  ;;  %v91_v60 = vmul.f32 %v4185_v44, %v49_v36  ;;  %v4482_v36 = vld [vmem:[%s7753_s3 + $0x1f0] sm:$0xff] }
 0x12f   :  { %v513_v37 = vpop.f32.mrf.mxu0 }
 0x133   :  { %v533_v39 = vpop.f32.mrf.mxu1 }
 0x134   :  { %v534_v61 = vadd.f32 %v533_v39, %v513_v37  ;;  %v4488_v39 = vld [vmem:[%s7753_s3 + $0xc8] sm:$0xff] }
 0x135   :  { %v553_v41 = vpop.f32.mrf.mxu2 }
 0x137   :  { %v593_v45 = vpop.f32.mrf.mxu0 }
 0x138   :  { %v594_v0 = vadd.f32 %v593_v45, %v534_v61  ;;  %v4512_v45 = vld [vmem:[%s7753_s3 + $0xb8] sm:$0xff] }
 0x139   :  { %v573_v42 = vpop.f32.mrf.mxu3  ;;  %v4560_v61 = vld [vmem:[%s7753_s3 + $0x98] sm:$0xff] }
 0x13a   :  { %v574_v6 = vadd.f32 %v573_v42, %v553_v41  ;;  %v4494_v41 = vld [vmem:[%s7753_s3 + $0x1f8] sm:$0xff]  ;;  %v4500_v42 = vld [vmem:[%s7753_s3 + $0xb0] sm:$0xff] }
 0x13d   :  { %v633_v58 = vpop.f32.mrf.mxu2 }
 0x13e   :  { %v613_v47 = vpop.f32.mrf.mxu1  ;;  %v634_v12 = vadd.f32 %v633_v58, %v574_v6  ;;  %v4542_v58 = vld [vmem:[%s7753_s3 + $0x1d8] sm:$0xff]  ;;  %v4632_v6 = vld [vmem:[%s7753_s3 + $0x68] sm:$0xff] }
 0x13f   :  { %v614_v2 = vadd.f32 %v613_v47, %v594_v0  ;;  %v4518_v47 = vld [vmem:[%s7753_s3 + $0x1e8] sm:$0xff]  ;;  %v4608_v0 = vld [vmem:[%s7753_s3 + $0x78] sm:$0xff]  ;;  %8883 = vst [vmem:[#allocation3_spill] sm:$0xff] %v4632_v6 }
 0x141   :  { %v656_v10 = vadd.f32 %v614_v2, %v4422_v1  ;;  %v4614_v2 = vld [vmem:[%s7753_s3 + $0x1a8] sm:$0xff] }
 0x144   :  { %v653_v59 = vpop.f32.mrf.mxu3 }
 0x145   :  { %v654_v14 = vadd.f32 %v653_v59, %v634_v12  ;;  %v4548_v59 = vld [vmem:[%s7753_s3 + $0x90] sm:$0xff]  ;;  %v4662_v12 = vld [vmem:[%s7753_s3 + $0x188] sm:$0xff] }
 0x146   :  { %8888 = vst [vmem:[#allocation15_spill] sm:$0xff] %v4662_v12 }
 0x147   :  { %v657_v21 = vadd.f32 %v654_v14, %v4430_v13  ;;  %v4668_v14 = vld [vmem:[%s7753_s3 + $0x40] sm:$0xff] }
 0x148   :  { %8889 = vst [vmem:[#allocation6_spill] sm:$0xff] %v4668_v14 }
 0x14a   :  { %v110_v43 = vpop.permute.xlu1 %109 }
 0x14b   :  { %v144_v55 = vmul.f32 %v8881_v53, %v110_v43  ;;  %v145_v63 = vmul.f32 %v4187_v57, %v110_v43  ;;  %v4506_v43 = vld [vmem:[%s7753_s3 + $0x1e0] sm:$0xff] }
 0x14d   :  { %v160_v56 = vadd.f32 %v144_v55, %v90_v52  ;;  %v161_v40 = vadd.f32 %v145_v63, %v91_v60  ;;  %v4524_v52 = vld [vmem:[%s7753_s3 + $0xa0] sm:$0xff]  ;;  %v4530_v55 = vld [vmem:[%s7753_s3 + $0x1d0] sm:$0xff] }
 0x14e   :  { %v4554_v60 = vld [vmem:[%s7753_s3 + $0x1c0] sm:$0xff] }
 0x14f   :  { %v182_v62 = vadd.f32 %v4189_v3, %v160_v56  ;;  %v183_v7 = vadd.f32 %v4194_v51, %v161_v40  ;;  %v4536_v56 = vld [vmem:[%s7753_s3 + $0xa8] sm:$0xff]  ;;  %v4596_v40 = vld [vmem:[%s7753_s3 + $0x70] sm:$0xff] }
 0x151   :  { %v679_v54 = vpop.f32.mrf.mxu0 }
 0x157   :  { %v699_v50 = vpop.f32.mrf.mxu1  ;;  %v719_v4 = vpop.f32.mrf.mxu2 }
 0x158   :  { %v700_v46 = vadd.f32 %v699_v50, %v679_v54  ;;  %v4566_v54 = vld [vmem:[%s7753_s3 + $0x1c8] sm:$0xff]  ;;  %v4572_v50 = vld [vmem:[%s7753_s3 + $0x80] sm:$0xff] }
 0x15a   :  { %v742_v38 = vadd.f32 %v700_v46, %v182_v62  ;;  %v4578_v62 = vld [vmem:[%s7753_s3 + $0x1b0] sm:$0xff]  ;;  %v4584_v46 = vld [vmem:[%s7753_s3 + $0x88] sm:$0xff] }
 0x15c   :  { %2512 = vtanh.f32 %v742_v38  ;;  %v4602_v38 = vld [vmem:[%s7753_s3 + $0x1a0] sm:$0xff] }
 0x15d   :  { %v739_v5 = vpop.f32.mrf.mxu3 }
 0x15e   :  { %v740_v8 = vadd.f32 %v739_v5, %v719_v4  ;;  %v4620_v4 = vld [vmem:[%s7753_s3 + $0x60] sm:$0xff]  ;;  %v4626_v5 = vld [vmem:[%s7753_s3 + $0x190] sm:$0xff] }
 0x15f   :  { %8882 = vst [vmem:[#allocation9_spill] sm:$0xff] %v4626_v5 }
 0x160   :  { %v743_v9 = vadd.f32 %v740_v8, %v183_v7  ;;  %v4638_v7 = vld [vmem:[%s7753_s3 + $0x198] sm:$0xff]  ;;  %v4644_v8 = vld [vmem:[%s7753_s3 + $0x50] sm:$0xff] }
 0x161   :  { %8884 = vst [vmem:[#allocation11_spill] sm:$0xff] %v4638_v7 }
 0x162   :  { %v4426_v11 = vpop.eup %2512  ;;  %2514 = vtanh.f32 %v743_v9  ;;  %8885 = vst [vmem:[#allocation4_spill] sm:$0xff] %v4644_v8  ;;  %v4650_v9 = vld [vmem:[%s7753_s3 + $0x180] sm:$0xff] }
 0x163   :  { %762 = vmatmul.f32.vlgmr.msra.gmra.mxu0 %v4426_v11  ;;  %802 = vmatmul.f32.vlgmr.msra.gmra.mxu2 %v4426_v11  ;;  %2516 = vtanh.f32 %v656_v10  ;;  %8886 = vst [vmem:[#allocation13_spill] sm:$0xff] %v4650_v9  ;;  %v4656_v10 = vld [vmem:[%s7753_s3 + $0x58] sm:$0xff] }
 0x164   :  { %912 = vmatpush.msra.mxu0 %v4435_v15  ;;  %952 = vmatpush.msra.mxu2 %v4441_v16  ;;  %2518 = vtanh.f32 %v657_v21  ;;  %8887 = vst [vmem:[#allocation5_spill] sm:$0xff] %v4656_v10  ;;  %v4674_v21 = vld [vmem:[%s7753_s3 + $0x170] sm:$0xff] }
 0x165   :  { %8890 = vst [vmem:[#allocation17_spill] sm:$0xff] %v4674_v21 }
 0x166   :  { %913 = vmatpush.msra.mxu0 %v4447_v17  ;;  %953 = vmatpush.msra.mxu2 %v4453_v18 }
 0x168   :  { %v4456_v19 = vpop.eup %2514  ;;  %914 = vmatpush.msra.mxu0 %v4462_v22  ;;  %954 = vmatpush.msra.mxu2 %v4468_v23 }
 0x169   :  { %782 = vmatmul.f32.vlgmr.msra.gmra.mxu1 %v4456_v19  ;;  %822 = vmatmul.f32.vlgmr.msra.gmra.mxu3 %v4456_v19  ;;  %v2517_v37 = vpop.eup %2516 }
 0x16a   :  { %915 = vmatpush.msra.mxu0 %v4476_v24  ;;  %932 = vmatpush.msra.mxu1 %v4482_v36  ;;  %v2519_v63 = vpop.eup %2518 }
 0x16b   :  { %955 = vmatpush.msra.mxu2 %v4488_v39  ;;  %972 = vmatpush.msra.mxu3 %v4494_v41 }
 0x16c   :  { %842 = vmatmul.f32.vlgmr.msrb.gmra.mxu0 %v2517_v37  ;;  %882 = vmatmul.f32.vlgmr.msrb.gmra.mxu2 %v2517_v37  ;;  %v4680_v37 = vld [vmem:[%s7753_s3 + $0x48] sm:$0xff] }
 0x16d   :  { %916 = vmatpush.msra.mxu0 %v4500_v42  ;;  %933 = vmatpush.msra.mxu1 %v4506_v43  ;;  %8891 = vst [vmem:[#allocation7_spill] sm:$0xff] %v4680_v37 }
 0x16e   :  { %956 = vmatpush.msra.mxu2 %v4512_v45  ;;  %973 = vmatpush.msra.mxu3 %v4518_v47 }
 0x16f   :  { %917 = vmatpush.msra.mxu0 %v4524_v52  ;;  %934 = vmatpush.msra.mxu1 %v4530_v55 }
 0x170   :  { %957 = vmatpush.msra.mxu2 %v4536_v56  ;;  %974 = vmatpush.msra.mxu3 %v4542_v58 }
 0x171   :  { %918 = vmatpush.msra.mxu0 %v4548_v59  ;;  %935 = vmatpush.msra.mxu1 %v4554_v60 }
 0x172   :  { %958 = vmatpush.msra.mxu2 %v4560_v61  ;;  %975 = vmatpush.msra.mxu3 %v4566_v54 }
 0x173   :  { %862 = vmatmul.f32.vlgmr.msrb.gmra.mxu1 %v2519_v63  ;;  %902 = vmatmul.f32.vlgmr.msrb.gmra.mxu3 %v2519_v63  ;;  %v4686_v63 = vld [vmem:[%s7753_s3 + $0x178] sm:$0xff] }
 0x174   :  { %919 = vmatpush.msra.mxu0 %v4572_v50  ;;  %936 = vmatpush.msra.mxu1 %v4578_v62  ;;  %8892 = vst [vmem:[#allocation19_spill] sm:$0xff] %v4686_v63 }
 0x175   :  { %959 = vmatpush.msra.mxu2 %v4584_v46  ;;  %976 = vmatpush.msra.mxu3 %v4590_v48 }
 0x176   :  { %920 = vmatpush.msra.mxu0 %v4596_v40  ;;  %937 = vmatpush.msra.mxu1 %v4602_v38 }
 0x177   :  { %960 = vmatpush.msra.mxu2 %v4608_v0  ;;  %977 = vmatpush.msra.mxu3 %v4614_v2 }
 0x178   :  { %921 = vmatpush.msra.mxu0 %v4620_v4  ;;  %938 = vmatpush.msra.mxu1 %v4626_v5 }
 0x179   :  { %961 = vmatpush.msra.mxu2 %v4632_v6  ;;  %978 = vmatpush.msra.mxu3 %v4638_v7 }
 0x17a   :  { %922 = vmatpush.msra.mxu0 %v4644_v8  ;;  %939 = vmatpush.msra.mxu1 %v4650_v9 }
 0x17b   :  { %962 = vmatpush.msra.mxu2 %v4656_v10  ;;  %979 = vmatpush.msra.mxu3 %v4662_v12  ;;  %v4829_v12 = vld [vmem:[%s7755_s4 + $0xf8] sm:$0xff] }
 0x17c   :  { %923 = vmatpush.msra.mxu0 %v4668_v14  ;;  %940 = vmatpush.msra.mxu1 %v4674_v21  ;;  %v4692_v14 = vld [vmem:[%s7753_s3 + $0x30] sm:$0xff]  ;;  %v4698_v21 = vld [vmem:[%s7753_s3 + $0x160] sm:$0xff]  ;;  %8914 = vst [vmem:[#allocation34_spill] sm:$0xff] %v4829_v12 }
 0x17d   :  { %963 = vmatpush.msra.mxu2 %v4680_v37  ;;  %980 = vmatpush.msra.mxu3 %v4686_v63  ;;  %8893 = vst [vmem:[#allocation8_spill] sm:$0xff] %v4692_v14  ;;  %v4704_v37 = vld [vmem:[%s7753_s3 + $0x38] sm:$0xff]  ;;  %v4710_v63 = vld [vmem:[%s7753_s3 + $0x168] sm:$0xff] }
 0x17e   :  { %924 = vmatpush.msra.mxu0 %v4692_v14  ;;  %8894 = vst [vmem:[#allocation21_spill] sm:$0xff] %v4698_v21  ;;  %941 = vmatpush.msra.mxu1 %v4698_v21  ;;  %v4716_v14 = vld [vmem:[%s7753_s3 + $0x20] sm:$0xff]  ;;  %v4722_v21 = vld [vmem:[%s7753_s3 + $0x150] sm:$0xff] }
 0x17f   :  { %8895 = vst [vmem:[#allocation10_spill] sm:$0xff] %v4704_v37  ;;  %964 = vmatpush.msra.mxu2 %v4704_v37  ;;  %981 = vmatpush.msra.mxu3 %v4710_v63  ;;  %v4728_v37 = vld [vmem:[%s7753_s3 + $0x28] sm:$0xff] }
 0x180   :  { %8896 = vst [vmem:[#allocation23_spill] sm:$0xff] %v4710_v63  ;;  %925 = vmatpush.msra.mxu0 %v4716_v14  ;;  %942 = vmatpush.msra.mxu1 %v4722_v21  ;;  %v4734_v63 = vld [vmem:[%s7753_s3 + $0x158] sm:$0xff] }
 0x181   :  { %8897 = vst [vmem:[#allocation12_spill] sm:$0xff] %v4716_v14  ;;  %965 = vmatpush.msra.mxu2 %v4728_v37  ;;  %982 = vmatpush.msra.mxu3 %v4734_v63  ;;  %v4740_v14 = vld [vmem:[%s7753_s3 + $0x10] sm:$0xff] }
 0x182   :  { %8898 = vst [vmem:[#allocation14_spill] sm:$0xff] %v4722_v21  ;;  %926 = vmatpush.msra.mxu0 %v4740_v14  ;;  %v4746_v21 = vld [vmem:[%s7753_s3 + $0x140] sm:$0xff] }
 0x183   :  { %8899 = vst [vmem:[#allocation16_spill] sm:$0xff] %v4728_v37  ;;  %943 = vmatpush.msra.mxu1 %v4746_v21  ;;  %v4752_v37 = vld [vmem:[%s7753_s3 + $0x18] sm:$0xff] }
 0x184   :  { %8900 = vst [vmem:[#allocation25_spill] sm:$0xff] %v4734_v63  ;;  %966 = vmatpush.msra.mxu2 %v4752_v37  ;;  %v4758_v63 = vld [vmem:[%s7753_s3 + $0x148] sm:$0xff] }
 0x185   :  { %8901 = vst [vmem:[#allocation18_spill] sm:$0xff] %v4740_v14  ;;  %983 = vmatpush.msra.mxu3 %v4758_v63  ;;  %v4764_v14 = vld [vmem:[%s7753_s3] sm:$0xff] }
 0x186   :  { %8902 = vst [vmem:[#allocation20_spill] sm:$0xff] %v4746_v21  ;;  %927 = vmatpush.msra.mxu0 %v4764_v14  ;;  %v4770_v21 = vld [vmem:[%s7753_s3 + $0x130] sm:$0xff] }
 0x187   :  { %8903 = vst [vmem:[#allocation26_spill] sm:$0xff] %v4752_v37  ;;  %944 = vmatpush.msra.mxu1 %v4770_v21  ;;  %v4776_v37 = vld [vmem:[%s7753_s3 + $0x8] sm:$0xff]  ;;  %928 = vmatmul.f32.vlgmr.msra.gmra.mxu0 %v4426_v11 }
 0x188   :  { %8904 = vst [vmem:[#allocation22_spill] sm:$0xff] %v4758_v63  ;;  %967 = vmatpush.msra.mxu2 %v4776_v37  ;;  %v4782_v63 = vld [vmem:[%s7753_s3 + $0x138] sm:$0xff] }
 0x189   :  { %8905 = vst [vmem:[#allocation24_spill] sm:$0xff] %v4764_v14  ;;  %984 = vmatpush.msra.mxu3 %v4782_v63  ;;  %v4788_v14 = vld [vmem:[%s7754_s0 + $0x18] sm:$0xff]  ;;  %968 = vmatmul.f32.vlgmr.msra.gmra.mxu2 %v4426_v11  ;;  %v4811_v11 = vld [vmem:[%s7753_s3 + $0x110] sm:$0xff] }
 0x18a   :  { %8906 = vst [vmem:[#allocation28_spill] sm:$0xff] %v4770_v21  ;;  %v34_v21 = vld [vmem:[%s7754_s0 + $0x10] sm:$0xff]  ;;  %58 = vperm.xlu1 %2500, %v4788_v14   ;;  %1036 = vmatpush.msrb.mxu2 %v4829_v12  ;;  %v4849_v12 = vld [vmem:[%s7755_s4 + $0xe0] sm:$0xff] }
 0x18b   :  { %8907 = vst [vmem:[#allocation29_spill] sm:$0xff] %v4776_v37  ;;  %v4798_v37 = vld [vmem:[%s7753_s3 + $0x120] sm:$0xff]  ;;  %53 = vperm.xlu2 %2498, %v34_v21  }
 0x18c   :  { %8908 = vst [vmem:[#allocation27_spill] sm:$0xff] %v4782_v63  ;;  %945 = vmatpush.msra.mxu1 %v4798_v37  ;;  %v4804_v63 = vld [vmem:[%s7753_s3 + $0x128] sm:$0xff] }
 0x18d   :  { %8909 = vst [vmem:[#allocation31_spill] sm:$0xff] %v4798_v37  ;;  %985 = vmatpush.msra.mxu3 %v4804_v63  ;;  %v4817_v37 = vld [vmem:[%s7753_s3 + $0x118] sm:$0xff] }
 0x18e   :  { %8910 = vst [vmem:[#allocation30_spill] sm:$0xff] %v4804_v63  ;;  %946 = vmatpush.msra.mxu1 %v4811_v11  ;;  %v4823_v63 = vld [vmem:[%s7755_s4 + $0xf0] sm:$0xff] }
 0x18f   :  { %8911 = vst [vmem:[#allocation32_spill] sm:$0xff] %v4811_v11  ;;  %986 = vmatpush.msra.mxu3 %v4817_v37  ;;  %996 = vmatpush.msrb.mxu0 %v4823_v63  ;;  %v4835_v11 = vld [vmem:[%s7753_s3 + $0x100] sm:$0xff] }
 0x190   :  { %8912 = vst [vmem:[#allocation33_spill] sm:$0xff] %v4817_v37  ;;  %947 = vmatpush.msra.mxu1 %v4835_v11  ;;  %v4841_v37 = vld [vmem:[%s7753_s3 + $0x108] sm:$0xff] }
 0x191   :  { %8913 = vst [vmem:[#allocation35_spill] sm:$0xff] %v4823_v63  ;;  %987 = vmatpush.msra.mxu3 %v4841_v37  ;;  %948 = vmatmul.f32.vlgmr.msra.gmra.mxu1 %v4456_v19 }
 0x192   :  { %8915 = vst [vmem:[#allocation36_spill] sm:$0xff] %v4835_v11  ;;  %988 = vmatmul.f32.vlgmr.msra.gmra.mxu3 %v4456_v19  ;;  %997 = vmatpush.msrb.mxu0 %v4849_v12  ;;  %v4855_v11 = vld [vmem:[%s7755_s4 + $0xe8] sm:$0xff]  ;;  %v4867_v19 = vld [vmem:[%s7755_s4 + $0x1f8] sm:$0xff] }
 0x193   :  { %8916 = vst [vmem:[#allocation37_spill] sm:$0xff] %v4841_v37  ;;  %1037 = vmatpush.msrb.mxu2 %v4855_v11  ;;  %v4861_v37 = vld [vmem:[%s7755_s4 + $0x1f0] sm:$0xff]  ;;  %1056 = vmatpush.msrb.mxu3 %v4867_v19 }
 0x194   :  { %8917 = vst [vmem:[#allocation39_spill] sm:$0xff] %v4849_v12  ;;  %1016 = vmatpush.msrb.mxu1 %v4861_v37  ;;  %v4873_v12 = vld [vmem:[%s7755_s4 + $0xd0] sm:$0xff]  ;;  %2499 = vset.pattern.permute.xlu2 %v8746_v20 }
 0x195   :  { %8918 = vst [vmem:[#allocation38_spill] sm:$0xff] %v4855_v11  ;;  %998 = vmatpush.msrb.mxu0 %v4873_v12  ;;  %v4879_v11 = vld [vmem:[%s7755_s4 + $0xd8] sm:$0xff]  ;;  %113 = vperm.xlu2 %2499, %v34_v21   ;;  %v4910_v21 = vld [vmem:[%s7755_s4 + $0xb0] sm:$0xff] }
 0x196   :  { %8919 = vst [vmem:[#allocation40_spill] sm:$0xff] %v4861_v37  ;;  %1038 = vmatpush.msrb.mxu2 %v4879_v11  ;;  %v4892_v37 = vld [vmem:[%s7755_s4 + $0xc0] sm:$0xff]  ;;  %2502 = vset.pattern.permute.xlu1 %v8746_v20 }
 0x197   :  { %8920 = vst [vmem:[#allocation41_spill] sm:$0xff] %v4867_v19  ;;  %v4886_v19 = vld [vmem:[%s7755_s4 + $0x1e0] sm:$0xff]  ;;  %999 = vmatpush.msrb.mxu0 %v4892_v37 }
 0x198   :  { %8921 = vst [vmem:[#allocation43_spill] sm:$0xff] %v4873_v12  ;;  %1017 = vmatpush.msrb.mxu1 %v4886_v19  ;;  %v4904_v12 = vld [vmem:[%s7755_s4 + $0x1e8] sm:$0xff] }
 0x199   :  { %8922 = vst [vmem:[#allocation42_spill] sm:$0xff] %v4879_v11  ;;  %v4898_v11 = vld [vmem:[%s7755_s4 + $0xc8] sm:$0xff]  ;;  %1057 = vmatpush.msrb.mxu3 %v4904_v12  ;;  %1000 = vmatpush.msrb.mxu0 %v4910_v21 }
 0x19a   :  { %8923 = vst [vmem:[#allocation44_spill] sm:$0xff] %v4886_v19  ;;  %1039 = vmatpush.msrb.mxu2 %v4898_v11  ;;  %v4916_v19 = vld [vmem:[%s7755_s4 + $0x1d0] sm:$0xff] }
 0x19b   :  { %8924 = vst [vmem:[#allocation45_spill] sm:$0xff] %v4892_v37  ;;  %1018 = vmatpush.msrb.mxu1 %v4916_v19 }
 0x19c   :  { %8925 = vst [vmem:[#allocation47_spill] sm:$0xff] %v4898_v11  ;;  %v4922_v11 = vld [vmem:[%s7755_s4 + $0xb8] sm:$0xff] }
 0x19d   :  { %8926 = vst [vmem:[#allocation46_spill] sm:$0xff] %v4904_v12  ;;  %1040 = vmatpush.msrb.mxu2 %v4922_v11  ;;  %v4928_v12 = vld [vmem:[%s7755_s4 + $0x1d8] sm:$0xff]  ;;  %117 = vperm.xlu2 %2499, %v4788_v14   ;;  %v5001_v14 = vld [vmem:[%s7755_s4 + $0x70] sm:$0xff] }
 0x19e   :  { %8927 = vst [vmem:[#allocation48_spill] sm:$0xff] %v4910_v21  ;;  %1058 = vmatpush.msrb.mxu3 %v4928_v12  ;;  %v4934_v21 = vld [vmem:[%s7755_s4 + $0xa0] sm:$0xff] }
 0x19f   :  { %8928 = vst [vmem:[#allocation49_spill] sm:$0xff] %v4916_v19  ;;  %1001 = vmatpush.msrb.mxu0 %v4934_v21  ;;  %v4940_v19 = vld [vmem:[%s7755_s4 + $0x1c0] sm:$0xff] }
 0x1a0   :  { %8929 = vst [vmem:[#allocation51_spill] sm:$0xff] %v4922_v11  ;;  %1019 = vmatpush.msrb.mxu1 %v4940_v19  ;;  %v4946_v11 = vld [vmem:[%s7755_s4 + $0xa8] sm:$0xff] }
 0x1a1   :  { %8930 = vst [vmem:[#allocation50_spill] sm:$0xff] %v4928_v12  ;;  %1041 = vmatpush.msrb.mxu2 %v4946_v11  ;;  %v4952_v12 = vld [vmem:[%s7755_s4 + $0x1c8] sm:$0xff] }
 0x1a2   :  { %8931 = vst [vmem:[#allocation52_spill] sm:$0xff] %v4934_v21  ;;  %1059 = vmatpush.msrb.mxu3 %v4952_v12  ;;  %v4958_v21 = vld [vmem:[%s7755_s4 + $0x90] sm:$0xff] }
 0x1a3   :  { %8932 = vst [vmem:[#allocation53_spill] sm:$0xff] %v4940_v19  ;;  %1002 = vmatpush.msrb.mxu0 %v4958_v21  ;;  %v4964_v19 = vld [vmem:[%s7755_s4 + $0x1b0] sm:$0xff] }
 0x1a4   :  { %8933 = vst [vmem:[#allocation55_spill] sm:$0xff] %v4946_v11  ;;  %1020 = vmatpush.msrb.mxu1 %v4964_v19  ;;  %v4970_v11 = vld [vmem:[%s7755_s4 + $0x98] sm:$0xff] }
 0x1a5   :  { %8934 = vst [vmem:[#allocation54_spill] sm:$0xff] %v4952_v12  ;;  %1042 = vmatpush.msrb.mxu2 %v4970_v11  ;;  %v4976_v12 = vld [vmem:[%s7755_s4 + $0x1b8] sm:$0xff]  ;;  %2503 = vset.pattern.permute.xlu2 %v8875_v31 }
 0x1a6   :  { %8935 = vst [vmem:[#allocation56_spill] sm:$0xff] %v4958_v21  ;;  %1060 = vmatpush.msrb.mxu3 %v4976_v12 }
 0x1a7   :  { %8936 = vst [vmem:[#allocation57_spill] sm:$0xff] %v4964_v19  ;;  %v4983_v19 = vld [vmem:[%s7755_s4 + $0x80] sm:$0xff] }
 0x1a8   :  { %8937 = vst [vmem:[#allocation59_spill] sm:$0xff] %v4970_v11  ;;  %1003 = vmatpush.msrb.mxu0 %v4983_v19  ;;  %v4989_v11 = vld [vmem:[%s7755_s4 + $0x88] sm:$0xff] }
 0x1a9   :  { %8938 = vst [vmem:[#allocation58_spill] sm:$0xff] %v4976_v12  ;;  %1043 = vmatpush.msrb.mxu2 %v4989_v11  ;;  %v4995_v12 = vld [vmem:[%s7755_s4 + $0x1a0] sm:$0xff] }
 0x1aa   :  { %8939 = vst [vmem:[#allocation60_spill] sm:$0xff] %v4983_v19  ;;  %1021 = vmatpush.msrb.mxu1 %v4995_v12  ;;  %1004 = vmatpush.msrb.mxu0 %v5001_v14  ;;  %v5007_v19 = vld [vmem:[%s7755_s4 + $0x1a8] sm:$0xff] }
 0x1ab   :  { %8940 = vst [vmem:[#allocation61_spill] sm:$0xff] %v4989_v11  ;;  %1061 = vmatpush.msrb.mxu3 %v5007_v19  ;;  %v5013_v11 = vld [vmem:[%s7755_s4 + $0x78] sm:$0xff] }
 0x1ac   :  { %8941 = vst [vmem:[#allocation63_spill] sm:$0xff] %v4995_v12  ;;  %1044 = vmatpush.msrb.mxu2 %v5013_v11  ;;  %v5019_v12 = vld [vmem:[%s7755_s4 + $0x190] sm:$0xff] }
 0x1ad   :  { %8942 = vst [vmem:[#allocation62_spill] sm:$0xff] %v5001_v14  ;;  %1022 = vmatpush.msrb.mxu1 %v5019_v12  ;;  %v5025_v14 = vld [vmem:[%s7755_s4 + $0x60] sm:$0xff] }
 0x1ae   :  { %8943 = vst [vmem:[#allocation64_spill] sm:$0xff] %v5007_v19  ;;  %1005 = vmatpush.msrb.mxu0 %v5025_v14  ;;  %v5031_v19 = vld [vmem:[%s7755_s4 + $0x198] sm:$0xff] }
 0x1af   :  { %8944 = vst [vmem:[#allocation65_spill] sm:$0xff] %v5013_v11  ;;  %1062 = vmatpush.msrb.mxu3 %v5031_v19  ;;  %v5037_v11 = vld [vmem:[%s7755_s4 + $0x68] sm:$0xff] }
 0x1b0   :  { %8945 = vst [vmem:[#allocation67_spill] sm:$0xff] %v5019_v12  ;;  %1045 = vmatpush.msrb.mxu2 %v5037_v11  ;;  %v5043_v12 = vld [vmem:[%s7755_s4 + $0x180] sm:$0xff] }
 0x1b1   :  { %8946 = vst [vmem:[#allocation66_spill] sm:$0xff] %v5025_v14  ;;  %1023 = vmatpush.msrb.mxu1 %v5043_v12  ;;  %v5049_v14 = vld [vmem:[%s7755_s4 + $0x50] sm:$0xff] }
 0x1b2   :  { %8947 = vst [vmem:[#allocation68_spill] sm:$0xff] %v5031_v19  ;;  %1006 = vmatpush.msrb.mxu0 %v5049_v14  ;;  %v5055_v19 = vld [vmem:[%s7755_s4 + $0x188] sm:$0xff] }
 0x1b3   :  { %8948 = vst [vmem:[#allocation69_spill] sm:$0xff] %v5037_v11  ;;  %1063 = vmatpush.msrb.mxu3 %v5055_v19  ;;  %v5061_v11 = vld [vmem:[%s7755_s4 + $0x58] sm:$0xff] }
 0x1b4   :  { %8949 = vst [vmem:[#allocation71_spill] sm:$0xff] %v5043_v12  ;;  %1046 = vmatpush.msrb.mxu2 %v5061_v11  ;;  %v5067_v12 = vld [vmem:[%s7755_s4 + $0x170] sm:$0xff] }
 0x1b5   :  { %8950 = vst [vmem:[#allocation70_spill] sm:$0xff] %v5049_v14  ;;  %1024 = vmatpush.msrb.mxu1 %v5067_v12  ;;  %v5073_v14 = vld [vmem:[%s7755_s4 + $0x40] sm:$0xff] }
 0x1b6   :  { %8951 = vst [vmem:[#allocation72_spill] sm:$0xff] %v5055_v19  ;;  %1007 = vmatpush.msrb.mxu0 %v5073_v14  ;;  %v5079_v19 = vld [vmem:[%s7755_s4 + $0x178] sm:$0xff] }
 0x1b7   :  { %8952 = vst [vmem:[#allocation73_spill] sm:$0xff] %v5061_v11  ;;  %1064 = vmatpush.msrb.mxu3 %v5079_v19  ;;  %v5085_v11 = vld [vmem:[%s7755_s4 + $0x48] sm:$0xff] }
 0x1b8   :  { %8953 = vst [vmem:[#allocation75_spill] sm:$0xff] %v5067_v12  ;;  %1047 = vmatpush.msrb.mxu2 %v5085_v11  ;;  %v5091_v12 = vld [vmem:[%s7755_s4 + $0x160] sm:$0xff] }
 0x1b9   :  { %8954 = vst [vmem:[#allocation74_spill] sm:$0xff] %v5073_v14  ;;  %1025 = vmatpush.msrb.mxu1 %v5091_v12  ;;  %v5097_v14 = vld [vmem:[%s7755_s4 + $0x30] sm:$0xff] }
 0x1ba   :  { %8955 = vst [vmem:[#allocation76_spill] sm:$0xff] %v5079_v19  ;;  %1008 = vmatpush.msrb.mxu0 %v5097_v14  ;;  %v5103_v19 = vld [vmem:[%s7755_s4 + $0x168] sm:$0xff] }
 0x1bb   :  { %8956 = vst [vmem:[#allocation77_spill] sm:$0xff] %v5085_v11  ;;  %1065 = vmatpush.msrb.mxu3 %v5103_v19  ;;  %v5109_v11 = vld [vmem:[%s7755_s4 + $0x38] sm:$0xff] }
 0x1bc   :  { %8957 = vst [vmem:[#allocation79_spill] sm:$0xff] %v5091_v12  ;;  %1048 = vmatpush.msrb.mxu2 %v5109_v11  ;;  %v5115_v12 = vld [vmem:[%s7755_s4 + $0x150] sm:$0xff] }
 0x1bd   :  { %8958 = vst [vmem:[#allocation78_spill] sm:$0xff] %v5097_v14  ;;  %1026 = vmatpush.msrb.mxu1 %v5115_v12  ;;  %v5121_v14 = vld [vmem:[%s7755_s4 + $0x20] sm:$0xff] }
 0x1be   :  { %8959 = vst [vmem:[#allocation80_spill] sm:$0xff] %v5103_v19  ;;  %1009 = vmatpush.msrb.mxu0 %v5121_v14  ;;  %v5127_v19 = vld [vmem:[%s7755_s4 + $0x158] sm:$0xff] }
 0x1bf   :  { %8960 = vst [vmem:[#allocation81_spill] sm:$0xff] %v5109_v11  ;;  %1066 = vmatpush.msrb.mxu3 %v5127_v19  ;;  %v5133_v11 = vld [vmem:[%s7755_s4 + $0x28] sm:$0xff] }
 0x1c0   :  { %8961 = vst [vmem:[#allocation83_spill] sm:$0xff] %v5115_v12  ;;  %1049 = vmatpush.msrb.mxu2 %v5133_v11  ;;  %v5139_v12 = vld [vmem:[%s7755_s4 + $0x140] sm:$0xff] }
 0x1c1   :  { %8962 = vst [vmem:[#allocation82_spill] sm:$0xff] %v5121_v14  ;;  %1027 = vmatpush.msrb.mxu1 %v5139_v12  ;;  %v5145_v14 = vld [vmem:[%s7755_s4 + $0x10] sm:$0xff] }
 0x1c2   :  { %8963 = vst [vmem:[#allocation84_spill] sm:$0xff] %v5127_v19  ;;  %1010 = vmatpush.msrb.mxu0 %v5145_v14  ;;  %v5151_v19 = vld [vmem:[%s7755_s4 + $0x148] sm:$0xff] }
 0x1c3   :  { %8964 = vst [vmem:[#allocation85_spill] sm:$0xff] %v5133_v11  ;;  %1067 = vmatpush.msrb.mxu3 %v5151_v19  ;;  %v5157_v11 = vld [vmem:[%s7755_s4 + $0x18] sm:$0xff] }
 0x1c4   :  { %8965 = vst [vmem:[#allocation86_spill] sm:$0xff] %v5139_v12  ;;  %1050 = vmatpush.msrb.mxu2 %v5157_v11  ;;  %v5163_v12 = vld [vmem:[%s7755_s4 + $0x130] sm:$0xff] }
 0x1c5   :  { %8966 = vst [vmem:[#allocation87_spill] sm:$0xff] %v5145_v14  ;;  %1028 = vmatpush.msrb.mxu1 %v5163_v12  ;;  %v5169_v14 = vld [vmem:[%s7755_s4] sm:$0xff] }
 0x1c6   :  { %8967 = vst [vmem:[#allocation89_spill] sm:$0xff] %v5151_v19  ;;  %1011 = vmatpush.msrb.mxu0 %v5169_v14  ;;  %v5175_v19 = vld [vmem:[%s7755_s4 + $0x138] sm:$0xff] }
 0x1c7   :  { %8968 = vst [vmem:[#allocation88_spill] sm:$0xff] %v5157_v11  ;;  %1068 = vmatpush.msrb.mxu3 %v5175_v19  ;;  %v5181_v11 = vld [vmem:[%s7755_s4 + $0x8] sm:$0xff] }
 0x1c8   :  { %8969 = vst [vmem:[#allocation90_spill] sm:$0xff] %v5163_v12  ;;  %1051 = vmatpush.msrb.mxu2 %v5181_v11  ;;  %v5187_v12 = vld [vmem:[%s7756_s5 + $0xf0] sm:$0xff] }
 0x1c9   :  { %8970 = vst [vmem:[#allocation93_spill] sm:$0xff] %v5169_v14  ;;  %1076 = vmatpush.msra.mxu0 %v5187_v12  ;;  %v5193_v14 = vld [vmem:[%s7756_s5 + $0xf8] sm:$0xff] }
 0x1ca   :  { %8971 = vst [vmem:[#allocation94_spill] sm:$0xff] %v5175_v19  ;;  %1116 = vmatpush.msra.mxu2 %v5193_v14  ;;  %v5199_v19 = vld [vmem:[%s7755_s4 + $0x120] sm:$0xff] }
 0x1cb   :  { %8972 = vst [vmem:[#allocation91_spill] sm:$0xff] %v5181_v11  ;;  %1029 = vmatpush.msrb.mxu1 %v5199_v19  ;;  %v5205_v11 = vld [vmem:[%s7755_s4 + $0x128] sm:$0xff] }
 0x1cc   :  { %8973 = vst [vmem:[#allocation92_spill] sm:$0xff] %v5187_v12  ;;  %1069 = vmatpush.msrb.mxu3 %v5205_v11  ;;  %v5211_v12 = vld [vmem:[%s7756_s5 + $0xe0] sm:$0xff] }
 0x1cd   :  { %8974 = vst [vmem:[#allocation96_spill] sm:$0xff] %v5193_v14  ;;  %1077 = vmatpush.msra.mxu0 %v5211_v12  ;;  %v5217_v14 = vld [vmem:[%s7756_s5 + $0xe8] sm:$0xff] }
 0x1ce   :  { %8975 = vst [vmem:[#allocation98_spill] sm:$0xff] %v5199_v19  ;;  %1117 = vmatpush.msra.mxu2 %v5217_v14  ;;  %v5223_v19 = vld [vmem:[%s7755_s4 + $0x110] sm:$0xff] }
 0x1cf   :  { %8976 = vst [vmem:[#allocation95_spill] sm:$0xff] %v5205_v11  ;;  %1030 = vmatpush.msrb.mxu1 %v5223_v19  ;;  %v5229_v11 = vld [vmem:[%s7755_s4 + $0x118] sm:$0xff] }
 0x1d0   :  { %8977 = vst [vmem:[#allocation97_spill] sm:$0xff] %v5211_v12  ;;  %1070 = vmatpush.msrb.mxu3 %v5229_v11  ;;  %v5235_v12 = vld [vmem:[%s7756_s5 + $0xd0] sm:$0xff] }
 0x1d1   :  { %8978 = vst [vmem:[#allocation100_spill] sm:$0xff] %v5217_v14  ;;  %1078 = vmatpush.msra.mxu0 %v5235_v12  ;;  %v5241_v14 = vld [vmem:[%s7756_s5 + $0xd8] sm:$0xff] }
 0x1d2   :  { %8979 = vst [vmem:[#allocation102_spill] sm:$0xff] %v5223_v19  ;;  %1118 = vmatpush.msra.mxu2 %v5241_v14  ;;  %v5247_v19 = vld [vmem:[%s7755_s4 + $0x100] sm:$0xff] }
 0x1d3   :  { %8980 = vst [vmem:[#allocation99_spill] sm:$0xff] %v5229_v11  ;;  %1031 = vmatpush.msrb.mxu1 %v5247_v19  ;;  %v5253_v11 = vld [vmem:[%s7755_s4 + $0x108] sm:$0xff] }
 0x1d4   :  { %8981 = vst [vmem:[#allocation101_spill] sm:$0xff] %v5235_v12  ;;  %1071 = vmatpush.msrb.mxu3 %v5253_v11  ;;  %v5259_v12 = vld [vmem:[%s7756_s5 + $0xc0] sm:$0xff] }
 0x1d5   :  { %8982 = vst [vmem:[#allocation104_spill] sm:$0xff] %v5241_v14  ;;  %1079 = vmatpush.msra.mxu0 %v5259_v12  ;;  %v5265_v14 = vld [vmem:[%s7756_s5 + $0x1f0] sm:$0xff] }
 0x1d6   :  { %8983 = vst [vmem:[#allocation106_spill] sm:$0xff] %v5247_v19  ;;  %1096 = vmatpush.msra.mxu1 %v5265_v14  ;;  %v5271_v19 = vld [vmem:[%s7756_s5 + $0xc8] sm:$0xff] }
 0x1d7   :  { %8984 = vst [vmem:[#allocation103_spill] sm:$0xff] %v5253_v11  ;;  %1119 = vmatpush.msra.mxu2 %v5271_v19  ;;  %v5277_v11 = vld [vmem:[%s7756_s5 + $0x1f8] sm:$0xff] }
 0x1d8   :  { %8985 = vst [vmem:[#allocation105_spill] sm:$0xff] %v5259_v12  ;;  %1136 = vmatpush.msra.mxu3 %v5277_v11  ;;  %v5283_v12 = vld [vmem:[%s7756_s5 + $0xb0] sm:$0xff] }
 0x1d9   :  { %8986 = vst [vmem:[#allocation108_spill] sm:$0xff] %v5265_v14  ;;  %1080 = vmatpush.msra.mxu0 %v5283_v12  ;;  %v5289_v14 = vld [vmem:[%s7756_s5 + $0x1e0] sm:$0xff] }
 0x1da   :  { %8987 = vst [vmem:[#allocation110_spill] sm:$0xff] %v5271_v19  ;;  %1097 = vmatpush.msra.mxu1 %v5289_v14  ;;  %v5295_v19 = vld [vmem:[%s7756_s5 + $0xb8] sm:$0xff] }
 0x1db   :  { %8988 = vst [vmem:[#allocation107_spill] sm:$0xff] %v5277_v11  ;;  %1120 = vmatpush.msra.mxu2 %v5295_v19  ;;  %v5301_v11 = vld [vmem:[%s7756_s5 + $0x1e8] sm:$0xff] }
 0x1dc   :  { %8989 = vst [vmem:[#allocation109_spill] sm:$0xff] %v5283_v12  ;;  %1137 = vmatpush.msra.mxu3 %v5301_v11  ;;  %v5307_v12 = vld [vmem:[%s7756_s5 + $0xa0] sm:$0xff] }
 0x1dd   :  { %8990 = vst [vmem:[#allocation112_spill] sm:$0xff] %v5289_v14  ;;  %1081 = vmatpush.msra.mxu0 %v5307_v12  ;;  %v5313_v14 = vld [vmem:[%s7756_s5 + $0x1d0] sm:$0xff] }
 0x1de   :  { %8991 = vst [vmem:[#allocation114_spill] sm:$0xff] %v5295_v19  ;;  %1098 = vmatpush.msra.mxu1 %v5313_v14  ;;  %v5319_v19 = vld [vmem:[%s7756_s5 + $0xa8] sm:$0xff] }
 0x1df   :  { %8992 = vst [vmem:[#allocation111_spill] sm:$0xff] %v5301_v11  ;;  %1121 = vmatpush.msra.mxu2 %v5319_v19  ;;  %v5325_v11 = vld [vmem:[%s7756_s5 + $0x1d8] sm:$0xff] }
 0x1e0   :  { %8993 = vst [vmem:[#allocation113_spill] sm:$0xff] %v5307_v12  ;;  %1138 = vmatpush.msra.mxu3 %v5325_v11  ;;  %v5331_v12 = vld [vmem:[%s7756_s5 + $0x90] sm:$0xff] }
 0x1e1   :  { %8994 = vst [vmem:[#allocation116_spill] sm:$0xff] %v5313_v14  ;;  %1082 = vmatpush.msra.mxu0 %v5331_v12  ;;  %v5337_v14 = vld [vmem:[%s7756_s5 + $0x1c0] sm:$0xff] }
 0x1e2   :  { %8995 = vst [vmem:[#allocation118_spill] sm:$0xff] %v5319_v19  ;;  %1099 = vmatpush.msra.mxu1 %v5337_v14  ;;  %v5343_v19 = vld [vmem:[%s7756_s5 + $0x98] sm:$0xff] }
 0x1e3   :  { %8996 = vst [vmem:[#allocation115_spill] sm:$0xff] %v5325_v11  ;;  %1122 = vmatpush.msra.mxu2 %v5343_v19  ;;  %v5349_v11 = vld [vmem:[%s7756_s5 + $0x1c8] sm:$0xff] }
 0x1e4   :  { %8997 = vst [vmem:[#allocation117_spill] sm:$0xff] %v5331_v12  ;;  %1139 = vmatpush.msra.mxu3 %v5349_v11  ;;  %v5355_v12 = vld [vmem:[%s7756_s5 + $0x80] sm:$0xff] }
 0x1e5   :  { %8998 = vst [vmem:[#allocation120_spill] sm:$0xff] %v5337_v14  ;;  %1083 = vmatpush.msra.mxu0 %v5355_v12  ;;  %v5361_v14 = vld [vmem:[%s7756_s5 + $0x1b0] sm:$0xff] }
 0x1e6   :  { %8999 = vst [vmem:[#allocation122_spill] sm:$0xff] %v5343_v19  ;;  %1100 = vmatpush.msra.mxu1 %v5361_v14  ;;  %v5367_v19 = vld [vmem:[%s7756_s5 + $0x88] sm:$0xff] }
 0x1e7   :  { %9000 = vst [vmem:[#allocation119_spill] sm:$0xff] %v5349_v11  ;;  %1123 = vmatpush.msra.mxu2 %v5367_v19  ;;  %v5373_v11 = vld [vmem:[%s7756_s5 + $0x1b8] sm:$0xff] }
 0x1e8   :  { %9001 = vst [vmem:[#allocation121_spill] sm:$0xff] %v5355_v12  ;;  %1140 = vmatpush.msra.mxu3 %v5373_v11  ;;  %v5379_v12 = vld [vmem:[%s7756_s5 + $0x70] sm:$0xff] }
 0x1e9   :  { %9002 = vst [vmem:[#allocation124_spill] sm:$0xff] %v5361_v14  ;;  %1084 = vmatpush.msra.mxu0 %v5379_v12  ;;  %v5385_v14 = vld [vmem:[%s7756_s5 + $0x1a0] sm:$0xff] }
 0x1ea   :  { %9003 = vst [vmem:[#allocation126_spill] sm:$0xff] %v5367_v19  ;;  %1101 = vmatpush.msra.mxu1 %v5385_v14  ;;  %v5391_v19 = vld [vmem:[%s7756_s5 + $0x78] sm:$0xff] }
 0x1eb   :  { %9004 = vst [vmem:[#allocation123_spill] sm:$0xff] %v5373_v11  ;;  %1124 = vmatpush.msra.mxu2 %v5391_v19  ;;  %v5397_v11 = vld [vmem:[%s7756_s5 + $0x1a8] sm:$0xff] }
 0x1ec   :  { %9005 = vst [vmem:[#allocation125_spill] sm:$0xff] %v5379_v12  ;;  %1141 = vmatpush.msra.mxu3 %v5397_v11  ;;  %v5403_v12 = vld [vmem:[%s7756_s5 + $0x60] sm:$0xff] }
 0x1ed   :  { %9006 = vst [vmem:[#allocation128_spill] sm:$0xff] %v5385_v14  ;;  %1085 = vmatpush.msra.mxu0 %v5403_v12  ;;  %v5409_v14 = vld [vmem:[%s7756_s5 + $0x190] sm:$0xff] }
 0x1ee   :  { %9007 = vst [vmem:[#allocation130_spill] sm:$0xff] %v5391_v19  ;;  %1102 = vmatpush.msra.mxu1 %v5409_v14  ;;  %v5415_v19 = vld [vmem:[%s7756_s5 + $0x68] sm:$0xff] }
 0x1ef   :  { %9008 = vst [vmem:[#allocation127_spill] sm:$0xff] %v5397_v11  ;;  %1125 = vmatpush.msra.mxu2 %v5415_v19  ;;  %v5421_v11 = vld [vmem:[%s7756_s5 + $0x198] sm:$0xff] }
 0x1f0   :  { %9009 = vst [vmem:[#allocation129_spill] sm:$0xff] %v5403_v12  ;;  %1142 = vmatpush.msra.mxu3 %v5421_v11  ;;  %v5427_v12 = vld [vmem:[%s7756_s5 + $0x50] sm:$0xff] }
 0x1f1   :  { %9010 = vst [vmem:[#allocation132_spill] sm:$0xff] %v5409_v14  ;;  %1086 = vmatpush.msra.mxu0 %v5427_v12  ;;  %v5433_v14 = vld [vmem:[%s7756_s5 + $0x180] sm:$0xff] }
 0x1f2   :  { %9011 = vst [vmem:[#allocation134_spill] sm:$0xff] %v5415_v19  ;;  %1103 = vmatpush.msra.mxu1 %v5433_v14  ;;  %v5439_v19 = vld [vmem:[%s7756_s5 + $0x58] sm:$0xff] }
 0x1f3   :  { %9012 = vst [vmem:[#allocation131_spill] sm:$0xff] %v5421_v11  ;;  %1126 = vmatpush.msra.mxu2 %v5439_v19  ;;  %v5445_v11 = vld [vmem:[%s7756_s5 + $0x188] sm:$0xff] }
 0x1f4   :  { %9013 = vst [vmem:[#allocation133_spill] sm:$0xff] %v5427_v12  ;;  %1143 = vmatpush.msra.mxu3 %v5445_v11  ;;  %v5451_v12 = vld [vmem:[%s7756_s5 + $0x40] sm:$0xff] }
 0x1f5   :  { %9014 = vst [vmem:[#allocation136_spill] sm:$0xff] %v5433_v14  ;;  %1087 = vmatpush.msra.mxu0 %v5451_v12  ;;  %v5457_v14 = vld [vmem:[%s7756_s5 + $0x170] sm:$0xff] }
 0x1f6   :  { %9015 = vst [vmem:[#allocation138_spill] sm:$0xff] %v5439_v19  ;;  %1104 = vmatpush.msra.mxu1 %v5457_v14  ;;  %v5463_v19 = vld [vmem:[%s7756_s5 + $0x48] sm:$0xff] }
 0x1f7   :  { %9016 = vst [vmem:[#allocation135_spill] sm:$0xff] %v5445_v11  ;;  %1127 = vmatpush.msra.mxu2 %v5463_v19  ;;  %v5469_v11 = vld [vmem:[%s7756_s5 + $0x178] sm:$0xff] }
 0x1f8   :  { %9017 = vst [vmem:[#allocation137_spill] sm:$0xff] %v5451_v12  ;;  %1144 = vmatpush.msra.mxu3 %v5469_v11  ;;  %v5475_v12 = vld [vmem:[%s7756_s5 + $0x30] sm:$0xff] }
 0x1f9   :  { %9018 = vst [vmem:[#allocation140_spill] sm:$0xff] %v5457_v14  ;;  %1088 = vmatpush.msra.mxu0 %v5475_v12  ;;  %v5481_v14 = vld [vmem:[%s7756_s5 + $0x160] sm:$0xff] }
 0x1fa   :  { %9019 = vst [vmem:[#allocation142_spill] sm:$0xff] %v5463_v19  ;;  %1105 = vmatpush.msra.mxu1 %v5481_v14  ;;  %v5487_v19 = vld [vmem:[%s7756_s5 + $0x38] sm:$0xff] }
 0x1fb   :  { %9020 = vst [vmem:[#allocation139_spill] sm:$0xff] %v5469_v11  ;;  %1128 = vmatpush.msra.mxu2 %v5487_v19  ;;  %v5493_v11 = vld [vmem:[%s7756_s5 + $0x168] sm:$0xff] }
 0x1fc   :  { %9021 = vst [vmem:[#allocation141_spill] sm:$0xff] %v5475_v12  ;;  %1145 = vmatpush.msra.mxu3 %v5493_v11  ;;  %v5499_v12 = vld [vmem:[%s7756_s5 + $0x20] sm:$0xff] }
 0x1fd   :  { %9022 = vst [vmem:[#allocation144_spill] sm:$0xff] %v5481_v14  ;;  %1089 = vmatpush.msra.mxu0 %v5499_v12  ;;  %v5505_v14 = vld [vmem:[%s7756_s5 + $0x150] sm:$0xff] }
 0x1fe   :  { %9023 = vst [vmem:[#allocation146_spill] sm:$0xff] %v5487_v19  ;;  %1106 = vmatpush.msra.mxu1 %v5505_v14  ;;  %v5511_v19 = vld [vmem:[%s7756_s5 + $0x28] sm:$0xff] }
 0x1ff   :  { %9024 = vst [vmem:[#allocation143_spill] sm:$0xff] %v5493_v11  ;;  %1129 = vmatpush.msra.mxu2 %v5511_v19  ;;  %v5517_v11 = vld [vmem:[%s7756_s5 + $0x158] sm:$0xff] }
 0x200   :  { %9025 = vst [vmem:[#allocation145_spill] sm:$0xff] %v5499_v12  ;;  %1146 = vmatpush.msra.mxu3 %v5517_v11  ;;  %v5523_v12 = vld [vmem:[%s7756_s5 + $0x10] sm:$0xff] }
 0x201   :  { %9026 = vst [vmem:[#allocation147_spill] sm:$0xff] %v5505_v14  ;;  %1090 = vmatpush.msra.mxu0 %v5523_v12  ;;  %v5529_v14 = vld [vmem:[%s7756_s5 + $0x140] sm:$0xff] }
 0x202   :  { %9027 = vst [vmem:[#allocation148_spill] sm:$0xff] %v5511_v19  ;;  %1107 = vmatpush.msra.mxu1 %v5529_v14  ;;  %v5535_v19 = vld [vmem:[%s7756_s5 + $0x18] sm:$0xff] }
 0x203   :  { %9028 = vst [vmem:[#allocation149_spill] sm:$0xff] %v5517_v11  ;;  %1130 = vmatpush.msra.mxu2 %v5535_v19  ;;  %v5541_v11 = vld [vmem:[%s7756_s5 + $0x148] sm:$0xff]  ;;  %1091 = vmatpush.msra.mxu0 %v8871_v27  ;;  %v763_v27 = vpop.f32.mrf.mxu0 }
 0x204   :  { %9029 = vst [vmem:[#allocation150_spill] sm:$0xff] %v5523_v12  ;;  %1147 = vmatpush.msra.mxu3 %v5541_v11  ;;  %1108 = vmatpush.msra.mxu1 %v8869_v25  ;;  %v54_v25 = vpop.permute.xlu2 %53 }
 0x205   :  { %9030 = vst [vmem:[#allocation151_spill] sm:$0xff] %v5529_v14  ;;  %1131 = vmatpush.msra.mxu2 %v8872_v28  ;;  %v783_v28 = vpop.f32.mrf.mxu1  ;;  %v92_v31 = vmul.f32 %v8880_v49, %v54_v25 }
 0x206   :  { %9031 = vst [vmem:[#allocation152_spill] sm:$0xff] %v5535_v19  ;;  %1148 = vmatpush.msra.mxu3 %v8870_v26  ;;  %1109 = vmatpush.msra.mxu1 %v8873_v29  ;;  %v803_v26 = vpop.f32.mrf.mxu2 }
 0x207   :  { %9032 = vst [vmem:[#allocation155_spill] sm:$0xff] %v5541_v11  ;;  %v823_v11 = vpop.f32.mrf.mxu3 }
 0x208   :  { %1149 = vmatpush.msra.mxu3 %v8874_v30  ;;  %1110 = vmatpush.msra.mxu1 %v8876_v32 }
 0x20a   :  { %1150 = vmatpush.msra.mxu3 %v8877_v33  ;;  %1111 = vmatpush.msra.mxu1 %v8878_v34  ;;  %v93_v33 = vmul.f32 %v4185_v44, %v54_v25 }
 0x20b   :  { %v843_v19 = vpop.f32.mrf.mxu0 }
 0x20c   :  { %1151 = vmatpush.msra.mxu3 %v8879_v35  ;;  %v114_v20 = vpop.permute.xlu2 %113  ;;  %v784_v35 = vadd.f32 %v783_v28, %v763_v27 }
 0x20d   :  { %v863_v29 = vpop.f32.mrf.mxu1  ;;  %v146_v30 = vmul.f32 %v8881_v53, %v114_v20  ;;  %v147_v34 = vmul.f32 %v4187_v57, %v114_v20 }
 0x20e   :  { %v883_v32 = vpop.f32.mrf.mxu2  ;;  %v844_v7 = vadd.f32 %v843_v19, %v784_v35  ;;  %v9040_v19 = vld [vmem:[#allocation6_spill] sm:$0xff]  ;;  %v9048_v35 = vld [vmem:[#allocation12_spill] sm:$0xff] }
 0x20f   :  { %v162_v14 = vadd.f32 %v146_v30, %v92_v31  ;;  %v903_v12 = vpop.f32.mrf.mxu3  ;;  %v163_v9 = vadd.f32 %v147_v34, %v93_v33  ;;  %v824_v31 = vadd.f32 %v823_v11, %v803_v26  ;;  %v9039_v11 = vld [vmem:[#allocation15_spill] sm:$0xff]  ;;  %v9046_v33 = vld [vmem:[#allocation10_spill] sm:$0xff] }
 0x210   :  { %v864_v49 = vadd.f32 %v863_v29, %v844_v7  ;;  %v9033_v7 = vld [vmem:[#allocation9_spill] sm:$0xff]  ;;  %v9043_v26 = vld [vmem:[#allocation19_spill] sm:$0xff]  ;;  %v9044_v29 = vld [vmem:[#allocation8_spill] sm:$0xff] }
 0x211   :  { %v184_v63 = vadd.f32 %v4189_v3, %v162_v14  ;;  %v185_v30 = vadd.f32 %v4194_v51, %v163_v9  ;;  %v884_v28 = vadd.f32 %v883_v32, %v824_v31  ;;  %v9035_v9 = vld [vmem:[#allocation11_spill] sm:$0xff]  ;;  %v9045_v32 = vld [vmem:[#allocation21_spill] sm:$0xff]  ;;  %v9049_v31 = vld [vmem:[#allocation14_spill] sm:$0xff] }
 0x212   :  { %v906_v20 = vadd.f32 %v864_v49, %v4422_v1  ;;  %v9042_v14 = vld [vmem:[#allocation7_spill] sm:$0xff] }
 0x213   :  { %v929_v21 = vpop.f32.mrf.mxu0  ;;  %v9047_v34 = vld [vmem:[#allocation23_spill] sm:$0xff] }
 0x215   :  { %v949_v37 = vpop.f32.mrf.mxu1 }
 0x216   :  { %v950_v10 = vadd.f32 %v949_v37, %v929_v21  ;;  %v969_v6 = vpop.f32.mrf.mxu2  ;;  %v9037_v37 = vld [vmem:[#allocation13_spill] sm:$0xff] }
 0x217   :  { %v989_v53 = vpop.f32.mrf.mxu3  ;;  %v9041_v21 = vld [vmem:[#allocation17_spill] sm:$0xff] }
 0x218   :  { %v992_v8 = vadd.f32 %v950_v10, %v184_v63  ;;  %v990_v5 = vadd.f32 %v989_v53, %v969_v6  ;;  %v904_v10 = vadd.f32 %v903_v12, %v884_v28  ;;  %v9036_v12 = vld [vmem:[#allocation4_spill] sm:$0xff]  ;;  %v9038_v63 = vld [vmem:[#allocation5_spill] sm:$0xff] }
 0x219   :  { %v9053_v28 = vld [vmem:[#allocation20_spill] sm:$0xff] }
 0x21a   :  { %2520 = vtanh.f32 %v992_v8  ;;  %v993_v25 = vadd.f32 %v990_v5, %v185_v30  ;;  %v907_v49 = vadd.f32 %v904_v10, %v4430_v13  ;;  %v9034_v8 = vld [vmem:[#allocation3_spill] sm:$0xff]  ;;  %v9050_v30 = vld [vmem:[#allocation16_spill] sm:$0xff]  ;;  %v9054_v10 = vld [vmem:[#allocation26_spill] sm:$0xff] }
 0x21c   :  { %2522 = vtanh.f32 %v993_v25  ;;  %v9051_v25 = vld [vmem:[#allocation25_spill] sm:$0xff] }
 0x21d   :  { %2524 = vtanh.f32 %v906_v20  ;;  %v9052_v20 = vld [vmem:[#allocation18_spill] sm:$0xff] }
 0x21e   :  { %2526 = vtanh.f32 %v907_v49  ;;  %v9055_v49 = vld [vmem:[#allocation22_spill] sm:$0xff] }
 0x220   :  { %v5563_v27 = vpop.eup %2520 }
 0x221   :  { %1012 = vmatmul.f32.vlgmr.msrb.gmra.mxu0 %v5563_v27  ;;  %1052 = vmatmul.f32.vlgmr.msrb.gmra.mxu2 %v5563_v27 }
 0x222   :  { %1162 = vmatpush.msrb.mxu0 %v4435_v15  ;;  %1202 = vmatpush.msrb.mxu2 %v4441_v16  ;;  %v5571_v53 = vpop.eup %2522 }
 0x223   :  { %1032 = vmatmul.f32.vlgmr.msrb.gmra.mxu1 %v5571_v53  ;;  %1072 = vmatmul.f32.vlgmr.msrb.gmra.mxu3 %v5571_v53  ;;  %v2525_v5 = vpop.eup %2524 }
 0x224   :  { %1163 = vmatpush.msrb.mxu0 %v4447_v17  ;;  %1203 = vmatpush.msrb.mxu2 %v4453_v18  ;;  %v2527_v6 = vpop.eup %2526 }
 0x225   :  { %1182 = vmatpush.msrb.mxu1 %v4482_v36  ;;  %1222 = vmatpush.msrb.mxu3 %v4494_v41 }
 0x226   :  { %1164 = vmatpush.msrb.mxu0 %v4462_v22  ;;  %1204 = vmatpush.msrb.mxu2 %v4468_v23 }
 0x227   :  { %1183 = vmatpush.msrb.mxu1 %v4506_v43  ;;  %1223 = vmatpush.msrb.mxu3 %v4518_v47 }
 0x228   :  { %1165 = vmatpush.msrb.mxu0 %v4476_v24  ;;  %1205 = vmatpush.msrb.mxu2 %v4488_v39 }
 0x229   :  { %1092 = vmatmul.f32.vlgmr.msra.gmra.mxu0 %v2525_v5  ;;  %1132 = vmatmul.f32.vlgmr.msra.gmra.mxu2 %v2525_v5  ;;  %v9056_v5 = vld [vmem:[#allocation24_spill] sm:$0xff] }
 0x22a   :  { %1166 = vmatpush.msrb.mxu0 %v4500_v42  ;;  %1206 = vmatpush.msrb.mxu2 %v4512_v45 }
 0x22b   :  { %1184 = vmatpush.msrb.mxu1 %v4530_v55  ;;  %1224 = vmatpush.msrb.mxu3 %v4542_v58 }
 0x22c   :  { %1167 = vmatpush.msrb.mxu0 %v4524_v52  ;;  %1207 = vmatpush.msrb.mxu2 %v4536_v56 }
 0x22d   :  { %1185 = vmatpush.msrb.mxu1 %v4554_v60  ;;  %1225 = vmatpush.msrb.mxu3 %v4566_v54 }
 0x22e   :  { %1168 = vmatpush.msrb.mxu0 %v4548_v59  ;;  %1208 = vmatpush.msrb.mxu2 %v4560_v61 }
 0x22f   :  { %1112 = vmatmul.f32.vlgmr.msra.gmra.mxu1 %v2527_v6  ;;  %1152 = vmatmul.f32.vlgmr.msra.gmra.mxu3 %v2527_v6  ;;  %v9057_v6 = vld [vmem:[#allocation28_spill] sm:$0xff] }
 0x230   :  { %1169 = vmatpush.msrb.mxu0 %v4572_v50  ;;  %1186 = vmatpush.msrb.mxu1 %v4578_v62 }
 0x231   :  { %1209 = vmatpush.msrb.mxu2 %v4584_v46  ;;  %1226 = vmatpush.msrb.mxu3 %v4590_v48 }
 0x232   :  { %1170 = vmatpush.msrb.mxu0 %v4596_v40  ;;  %1187 = vmatpush.msrb.mxu1 %v4602_v38 }
 0x233   :  { %1210 = vmatpush.msrb.mxu2 %v4608_v0  ;;  %1227 = vmatpush.msrb.mxu3 %v4614_v2 }
 0x234   :  { %1171 = vmatpush.msrb.mxu0 %v4620_v4  ;;  %1188 = vmatpush.msrb.mxu1 %v9033_v7 }
 0x235   :  { %1211 = vmatpush.msrb.mxu2 %v9034_v8  ;;  %1228 = vmatpush.msrb.mxu3 %v9035_v9 }
 0x236   :  { %1172 = vmatpush.msrb.mxu0 %v9036_v12  ;;  %1189 = vmatpush.msrb.mxu1 %v9037_v37 }
 0x237   :  { %1212 = vmatpush.msrb.mxu2 %v9038_v63  ;;  %1229 = vmatpush.msrb.mxu3 %v9039_v11 }
 0x238   :  { %1173 = vmatpush.msrb.mxu0 %v9040_v19  ;;  %1190 = vmatpush.msrb.mxu1 %v9041_v21 }
 0x239   :  { %1213 = vmatpush.msrb.mxu2 %v9042_v14  ;;  %1230 = vmatpush.msrb.mxu3 %v9043_v26 }
 0x23a   :  { %1174 = vmatpush.msrb.mxu0 %v9044_v29  ;;  %1191 = vmatpush.msrb.mxu1 %v9045_v32 }
 0x23b   :  { %1214 = vmatpush.msrb.mxu2 %v9046_v33  ;;  %1231 = vmatpush.msrb.mxu3 %v9047_v34  ;;  %v9058_v34 = vld [vmem:[#allocation29_spill] sm:$0xff] }
 0x23c   :  { %1175 = vmatpush.msrb.mxu0 %v9048_v35  ;;  %1192 = vmatpush.msrb.mxu1 %v9049_v31  ;;  %v9059_v35 = vld [vmem:[#allocation27_spill] sm:$0xff]  ;;  %v9195_v31 = vld [vmem:[#allocation153_spill] sm:$0xff] }
 0x23d   :  { %1215 = vmatpush.msrb.mxu2 %v9050_v30  ;;  %1232 = vmatpush.msrb.mxu3 %v9051_v25  ;;  %v9060_v25 = vld [vmem:[#allocation31_spill] sm:$0xff]  ;;  %v9069_v30 = vld [vmem:[#allocation37_spill] sm:$0xff] }
 0x23e   :  { %1176 = vmatpush.msrb.mxu0 %v9052_v20  ;;  %1193 = vmatpush.msrb.mxu1 %v9053_v28  ;;  %v9061_v20 = vld [vmem:[#allocation30_spill] sm:$0xff]  ;;  %v9062_v28 = vld [vmem:[#allocation35_spill] sm:$0xff] }
 0x23f   :  { %1216 = vmatpush.msrb.mxu2 %v9054_v10  ;;  %1233 = vmatpush.msrb.mxu3 %v9055_v49  ;;  %v9063_v10 = vld [vmem:[#allocation34_spill] sm:$0xff]  ;;  %v9064_v49 = vld [vmem:[#allocation32_spill] sm:$0xff] }
 0x240   :  { %1177 = vmatpush.msrb.mxu0 %v9056_v5  ;;  %1194 = vmatpush.msrb.mxu1 %v9057_v6  ;;  %v9065_v5 = vld [vmem:[#allocation33_spill] sm:$0xff]  ;;  %v9066_v6 = vld [vmem:[#allocation39_spill] sm:$0xff] }
 0x241   :  { %1217 = vmatpush.msrb.mxu2 %v9058_v34  ;;  %1234 = vmatpush.msrb.mxu3 %v9059_v35  ;;  %v9067_v34 = vld [vmem:[#allocation38_spill] sm:$0xff]  ;;  %v9068_v35 = vld [vmem:[#allocation36_spill] sm:$0xff] }
 0x242   :  { %1178 = vmatmul.f32.vlgmr.msrb.gmra.mxu0 %v5563_v27  ;;  %1218 = vmatmul.f32.vlgmr.msrb.gmra.mxu2 %v5563_v27  ;;  %v9070_v27 = vld [vmem:[#allocation43_spill] sm:$0xff] }
 0x243   :  { %1195 = vmatpush.msrb.mxu1 %v9060_v25  ;;  %1235 = vmatpush.msrb.mxu3 %v9061_v20  ;;  %v9079_v20 = vld [vmem:[#allocation51_spill] sm:$0xff] }
 0x244   :  { %1246 = vmatpush.msra.mxu0 %v9062_v28  ;;  %1286 = vmatpush.msra.mxu2 %v9063_v10  ;;  %v9071_v28 = vld [vmem:[#allocation42_spill] sm:$0xff]  ;;  %v9072_v10 = vld [vmem:[#allocation40_spill] sm:$0xff] }
 0x245   :  { %1196 = vmatpush.msrb.mxu1 %v9064_v49  ;;  %1236 = vmatpush.msrb.mxu3 %v9065_v5  ;;  %v9073_v49 = vld [vmem:[#allocation41_spill] sm:$0xff] }
 0x246   :  { %1247 = vmatpush.msra.mxu0 %v9066_v6  ;;  %1287 = vmatpush.msra.mxu2 %v9067_v34  ;;  %v9074_v5 = vld [vmem:[#allocation45_spill] sm:$0xff]  ;;  %v9075_v6 = vld [vmem:[#allocation47_spill] sm:$0xff]  ;;  %v9076_v34 = vld [vmem:[#allocation44_spill] sm:$0xff] }
 0x247   :  { %1197 = vmatpush.msrb.mxu1 %v9068_v35  ;;  %1237 = vmatpush.msrb.mxu3 %v9069_v30  ;;  %v9077_v35 = vld [vmem:[#allocation46_spill] sm:$0xff]  ;;  %v9078_v30 = vld [vmem:[#allocation48_spill] sm:$0xff] }
 0x248   :  { %1198 = vmatmul.f32.vlgmr.msrb.gmra.mxu1 %v5571_v53  ;;  %1238 = vmatmul.f32.vlgmr.msrb.gmra.mxu3 %v5571_v53  ;;  %v9080_v53 = vld [vmem:[#allocation49_spill] sm:$0xff] }
 0x249   :  { %1248 = vmatpush.msra.mxu0 %v9070_v27  ;;  %1288 = vmatpush.msra.mxu2 %v9071_v28  ;;  %v9081_v27 = vld [vmem:[#allocation50_spill] sm:$0xff]  ;;  %v9082_v28 = vld [vmem:[#allocation52_spill] sm:$0xff] }
 0x24a   :  { %1266 = vmatpush.msra.mxu1 %v9072_v10  ;;  %1306 = vmatpush.msra.mxu3 %v9073_v49  ;;  %v9083_v10 = vld [vmem:[#allocation55_spill] sm:$0xff]  ;;  %v9084_v49 = vld [vmem:[#allocation53_spill] sm:$0xff] }
 0x24b   :  { %1249 = vmatpush.msra.mxu0 %v9074_v5  ;;  %1289 = vmatpush.msra.mxu2 %v9075_v6  ;;  %v9085_v5 = vld [vmem:[#allocation54_spill] sm:$0xff]  ;;  %v9086_v6 = vld [vmem:[#allocation56_spill] sm:$0xff] }
 0x24c   :  { %1267 = vmatpush.msra.mxu1 %v9076_v34  ;;  %1307 = vmatpush.msra.mxu3 %v9077_v35  ;;  %v9087_v34 = vld [vmem:[#allocation59_spill] sm:$0xff]  ;;  %v9088_v35 = vld [vmem:[#allocation57_spill] sm:$0xff] }
 0x24d   :  { %1250 = vmatpush.msra.mxu0 %v9078_v30  ;;  %1290 = vmatpush.msra.mxu2 %v9079_v20  ;;  %v9089_v30 = vld [vmem:[#allocation58_spill] sm:$0xff]  ;;  %v9090_v20 = vld [vmem:[#allocation60_spill] sm:$0xff] }
 0x24e   :  { %1268 = vmatpush.msra.mxu1 %v9080_v53  ;;  %1308 = vmatpush.msra.mxu3 %v9081_v27  ;;  %v9091_v53 = vld [vmem:[#allocation61_spill] sm:$0xff]  ;;  %v9092_v27 = vld [vmem:[#allocation63_spill] sm:$0xff] }
 0x24f   :  { %1251 = vmatpush.msra.mxu0 %v9082_v28  ;;  %1291 = vmatpush.msra.mxu2 %v9083_v10  ;;  %v9093_v28 = vld [vmem:[#allocation64_spill] sm:$0xff]  ;;  %v9094_v10 = vld [vmem:[#allocation62_spill] sm:$0xff] }
 0x250   :  { %1269 = vmatpush.msra.mxu1 %v9084_v49  ;;  %1309 = vmatpush.msra.mxu3 %v9085_v5  ;;  %v9095_v49 = vld [vmem:[#allocation65_spill] sm:$0xff]  ;;  %v9096_v5 = vld [vmem:[#allocation67_spill] sm:$0xff] }
 0x251   :  { %1252 = vmatpush.msra.mxu0 %v9086_v6  ;;  %1292 = vmatpush.msra.mxu2 %v9087_v34  ;;  %v9097_v6 = vld [vmem:[#allocation68_spill] sm:$0xff]  ;;  %v9098_v34 = vld [vmem:[#allocation66_spill] sm:$0xff] }
 0x252   :  { %1270 = vmatpush.msra.mxu1 %v9088_v35  ;;  %1310 = vmatpush.msra.mxu3 %v9089_v30  ;;  %v9099_v35 = vld [vmem:[#allocation69_spill] sm:$0xff]  ;;  %v9100_v30 = vld [vmem:[#allocation71_spill] sm:$0xff] }
 0x253   :  { %1253 = vmatpush.msra.mxu0 %v9090_v20  ;;  %1293 = vmatpush.msra.mxu2 %v9091_v53  ;;  %v9101_v20 = vld [vmem:[#allocation72_spill] sm:$0xff]  ;;  %v9102_v53 = vld [vmem:[#allocation70_spill] sm:$0xff] }
 0x254   :  { %1271 = vmatpush.msra.mxu1 %v9092_v27  ;;  %1311 = vmatpush.msra.mxu3 %v9093_v28  ;;  %v9103_v27 = vld [vmem:[#allocation73_spill] sm:$0xff]  ;;  %v9104_v28 = vld [vmem:[#allocation75_spill] sm:$0xff] }
 0x255   :  { %1254 = vmatpush.msra.mxu0 %v9094_v10  ;;  %1294 = vmatpush.msra.mxu2 %v9095_v49  ;;  %v9105_v10 = vld [vmem:[#allocation76_spill] sm:$0xff]  ;;  %v9106_v49 = vld [vmem:[#allocation74_spill] sm:$0xff] }
 0x256   :  { %1272 = vmatpush.msra.mxu1 %v9096_v5  ;;  %1312 = vmatpush.msra.mxu3 %v9097_v6  ;;  %v9107_v5 = vld [vmem:[#allocation77_spill] sm:$0xff]  ;;  %v9108_v6 = vld [vmem:[#allocation79_spill] sm:$0xff] }
 0x257   :  { %1255 = vmatpush.msra.mxu0 %v9098_v34  ;;  %1295 = vmatpush.msra.mxu2 %v9099_v35  ;;  %v9109_v34 = vld [vmem:[#allocation80_spill] sm:$0xff]  ;;  %v9110_v35 = vld [vmem:[#allocation78_spill] sm:$0xff] }
 0x258   :  { %1273 = vmatpush.msra.mxu1 %v9100_v30  ;;  %1313 = vmatpush.msra.mxu3 %v9101_v20  ;;  %v9111_v30 = vld [vmem:[#allocation81_spill] sm:$0xff]  ;;  %v9112_v20 = vld [vmem:[#allocation83_spill] sm:$0xff] }
 0x259   :  { %1256 = vmatpush.msra.mxu0 %v9102_v53  ;;  %1296 = vmatpush.msra.mxu2 %v9103_v27  ;;  %v9113_v53 = vld [vmem:[#allocation84_spill] sm:$0xff]  ;;  %v9114_v27 = vld [vmem:[#allocation82_spill] sm:$0xff] }
 0x25a   :  { %1274 = vmatpush.msra.mxu1 %v9104_v28  ;;  %1314 = vmatpush.msra.mxu3 %v9105_v10  ;;  %v9115_v28 = vld [vmem:[#allocation85_spill] sm:$0xff]  ;;  %v9116_v10 = vld [vmem:[#allocation86_spill] sm:$0xff] }
 0x25b   :  { %1257 = vmatpush.msra.mxu0 %v9106_v49  ;;  %1297 = vmatpush.msra.mxu2 %v9107_v5  ;;  %v9117_v49 = vld [vmem:[#allocation89_spill] sm:$0xff]  ;;  %v9118_v5 = vld [vmem:[#allocation87_spill] sm:$0xff] }
 0x25c   :  { %1275 = vmatpush.msra.mxu1 %v9108_v6  ;;  %1315 = vmatpush.msra.mxu3 %v9109_v34  ;;  %v9119_v6 = vld [vmem:[#allocation88_spill] sm:$0xff]  ;;  %v9120_v34 = vld [vmem:[#allocation90_spill] sm:$0xff] }
 0x25d   :  { %1258 = vmatpush.msra.mxu0 %v9110_v35  ;;  %1298 = vmatpush.msra.mxu2 %v9111_v30  ;;  %v9121_v35 = vld [vmem:[#allocation94_spill] sm:$0xff]  ;;  %v9122_v30 = vld [vmem:[#allocation93_spill] sm:$0xff] }
 0x25e   :  { %1276 = vmatpush.msra.mxu1 %v9112_v20  ;;  %1316 = vmatpush.msra.mxu3 %v9113_v53  ;;  %v9123_v20 = vld [vmem:[#allocation91_spill] sm:$0xff]  ;;  %v9124_v53 = vld [vmem:[#allocation92_spill] sm:$0xff] }
 0x25f   :  { %1259 = vmatpush.msra.mxu0 %v9114_v27  ;;  %1299 = vmatpush.msra.mxu2 %v9115_v28  ;;  %v9125_v27 = vld [vmem:[#allocation96_spill] sm:$0xff]  ;;  %v9126_v28 = vld [vmem:[#allocation98_spill] sm:$0xff] }
 0x260   :  { %1277 = vmatpush.msra.mxu1 %v9116_v10  ;;  %1317 = vmatpush.msra.mxu3 %v9117_v49  ;;  %v9127_v10 = vld [vmem:[#allocation95_spill] sm:$0xff]  ;;  %v9128_v49 = vld [vmem:[#allocation97_spill] sm:$0xff] }
 0x261   :  { %1260 = vmatpush.msra.mxu0 %v9118_v5  ;;  %1300 = vmatpush.msra.mxu2 %v9119_v6  ;;  %v9129_v5 = vld [vmem:[#allocation100_spill] sm:$0xff]  ;;  %v9130_v6 = vld [vmem:[#allocation102_spill] sm:$0xff] }
 0x262   :  { %1278 = vmatpush.msra.mxu1 %v9120_v34  ;;  %1318 = vmatpush.msra.mxu3 %v9121_v35  ;;  %v9131_v34 = vld [vmem:[#allocation99_spill] sm:$0xff]  ;;  %v9132_v35 = vld [vmem:[#allocation101_spill] sm:$0xff] }
 0x263   :  { %1261 = vmatpush.msra.mxu0 %v9122_v30  ;;  %1301 = vmatpush.msra.mxu2 %v9123_v20  ;;  %v9133_v30 = vld [vmem:[#allocation104_spill] sm:$0xff]  ;;  %v9134_v20 = vld [vmem:[#allocation106_spill] sm:$0xff] }
 0x264   :  { %1279 = vmatpush.msra.mxu1 %v9126_v28  ;;  %1319 = vmatpush.msra.mxu3 %v9127_v10  ;;  %v9137_v28 = vld [vmem:[#allocation108_spill] sm:$0xff]  ;;  %v9138_v10 = vld [vmem:[#allocation110_spill] sm:$0xff] }
 0x265   :  { %1326 = vmatpush.msrb.mxu0 %v9124_v53  ;;  %1366 = vmatpush.msrb.mxu2 %v9125_v27  ;;  %v9135_v53 = vld [vmem:[#allocation103_spill] sm:$0xff]  ;;  %v9136_v27 = vld [vmem:[#allocation105_spill] sm:$0xff] }
 0x266   :  { %1280 = vmatpush.msra.mxu1 %v9130_v6  ;;  %1320 = vmatpush.msra.mxu3 %v9131_v34  ;;  %v9141_v6 = vld [vmem:[#allocation112_spill] sm:$0xff]  ;;  %v9142_v34 = vld [vmem:[#allocation114_spill] sm:$0xff] }
 0x267   :  { %1327 = vmatpush.msrb.mxu0 %v9128_v49  ;;  %1367 = vmatpush.msrb.mxu2 %v9129_v5  ;;  %v9139_v49 = vld [vmem:[#allocation107_spill] sm:$0xff]  ;;  %v9140_v5 = vld [vmem:[#allocation109_spill] sm:$0xff] }
 0x268   :  { %1281 = vmatpush.msra.mxu1 %v9134_v20  ;;  %1321 = vmatpush.msra.mxu3 %v9135_v53  ;;  %v9145_v20 = vld [vmem:[#allocation116_spill] sm:$0xff]  ;;  %v9146_v53 = vld [vmem:[#allocation118_spill] sm:$0xff] }
 0x269   :  { %1328 = vmatpush.msrb.mxu0 %v9132_v35  ;;  %1368 = vmatpush.msrb.mxu2 %v9133_v30  ;;  %v9143_v35 = vld [vmem:[#allocation111_spill] sm:$0xff]  ;;  %v9144_v30 = vld [vmem:[#allocation113_spill] sm:$0xff] }
 0x26a   :  { %1346 = vmatpush.msrb.mxu1 %v9137_v28  ;;  %1386 = vmatpush.msrb.mxu3 %v9139_v49  ;;  %v9148_v28 = vld [vmem:[#allocation117_spill] sm:$0xff]  ;;  %v9150_v49 = vld [vmem:[#allocation122_spill] sm:$0xff] }
 0x26b   :  { %1329 = vmatpush.msrb.mxu0 %v9136_v27  ;;  %1369 = vmatpush.msrb.mxu2 %v9138_v10  ;;  %v9147_v27 = vld [vmem:[#allocation115_spill] sm:$0xff]  ;;  %v9149_v10 = vld [vmem:[#allocation120_spill] sm:$0xff] }
 0x26c   :  { %1347 = vmatpush.msrb.mxu1 %v9141_v6  ;;  %1387 = vmatpush.msrb.mxu3 %v9143_v35  ;;  %v9152_v6 = vld [vmem:[#allocation121_spill] sm:$0xff]  ;;  %v9154_v35 = vld [vmem:[#allocation126_spill] sm:$0xff] }
 0x26d   :  { %1330 = vmatpush.msrb.mxu0 %v9140_v5  ;;  %1370 = vmatpush.msrb.mxu2 %v9142_v34  ;;  %v9151_v5 = vld [vmem:[#allocation119_spill] sm:$0xff]  ;;  %v9153_v34 = vld [vmem:[#allocation124_spill] sm:$0xff] }
 0x26e   :  { %1348 = vmatpush.msrb.mxu1 %v9145_v20  ;;  %1388 = vmatpush.msrb.mxu3 %v9147_v27  ;;  %v9156_v20 = vld [vmem:[#allocation125_spill] sm:$0xff]  ;;  %v9158_v27 = vld [vmem:[#allocation130_spill] sm:$0xff] }
 0x26f   :  { %1331 = vmatpush.msrb.mxu0 %v9144_v30  ;;  %1371 = vmatpush.msrb.mxu2 %v9146_v53  ;;  %v9155_v30 = vld [vmem:[#allocation123_spill] sm:$0xff]  ;;  %v9157_v53 = vld [vmem:[#allocation128_spill] sm:$0xff] }
 0x270   :  { %1349 = vmatpush.msrb.mxu1 %v9149_v10  ;;  %1389 = vmatpush.msrb.mxu3 %v9151_v5  ;;  %v9160_v10 = vld [vmem:[#allocation129_spill] sm:$0xff]  ;;  %v9162_v5 = vld [vmem:[#allocation134_spill] sm:$0xff] }
 0x271   :  { %1332 = vmatpush.msrb.mxu0 %v9148_v28  ;;  %1372 = vmatpush.msrb.mxu2 %v9150_v49  ;;  %v9159_v28 = vld [vmem:[#allocation127_spill] sm:$0xff]  ;;  %v9161_v49 = vld [vmem:[#allocation132_spill] sm:$0xff] }
 0x272   :  { %1350 = vmatpush.msrb.mxu1 %v9153_v34  ;;  %1390 = vmatpush.msrb.mxu3 %v9155_v30  ;;  %v9164_v34 = vld [vmem:[#allocation133_spill] sm:$0xff]  ;;  %v9166_v30 = vld [vmem:[#allocation138_spill] sm:$0xff] }
 0x273   :  { %1333 = vmatpush.msrb.mxu0 %v9152_v6  ;;  %1373 = vmatpush.msrb.mxu2 %v9154_v35  ;;  %v9163_v6 = vld [vmem:[#allocation131_spill] sm:$0xff]  ;;  %v9165_v35 = vld [vmem:[#allocation136_spill] sm:$0xff] }
 0x274   :  { %1351 = vmatpush.msrb.mxu1 %v9157_v53  ;;  %1391 = vmatpush.msrb.mxu3 %v9159_v28  ;;  %v9168_v53 = vld [vmem:[#allocation137_spill] sm:$0xff]  ;;  %v9170_v28 = vld [vmem:[#allocation142_spill] sm:$0xff] }
 0x275   :  { %1334 = vmatpush.msrb.mxu0 %v9156_v20  ;;  %1374 = vmatpush.msrb.mxu2 %v9158_v27  ;;  %v9167_v20 = vld [vmem:[#allocation135_spill] sm:$0xff]  ;;  %v9169_v27 = vld [vmem:[#allocation140_spill] sm:$0xff] }
 0x276   :  { %1352 = vmatpush.msrb.mxu1 %v9161_v49  ;;  %1392 = vmatpush.msrb.mxu3 %v9163_v6  ;;  %v9172_v49 = vld [vmem:[#allocation141_spill] sm:$0xff]  ;;  %v9174_v6 = vld [vmem:[#allocation146_spill] sm:$0xff] }
 0x277   :  { %1335 = vmatpush.msrb.mxu0 %v9160_v10  ;;  %1375 = vmatpush.msrb.mxu2 %v9162_v5  ;;  %v9171_v10 = vld [vmem:[#allocation139_spill] sm:$0xff]  ;;  %v9173_v5 = vld [vmem:[#allocation144_spill] sm:$0xff] }
 0x278   :  { %1353 = vmatpush.msrb.mxu1 %v9165_v35  ;;  %1393 = vmatpush.msrb.mxu3 %v9167_v20  ;;  %v9176_v35 = vld [vmem:[#allocation145_spill] sm:$0xff]  ;;  %v9178_v20 = vld [vmem:[#allocation148_spill] sm:$0xff] }
 0x279   :  { %1336 = vmatpush.msrb.mxu0 %v9164_v34  ;;  %1376 = vmatpush.msrb.mxu2 %v9166_v30  ;;  %v9175_v34 = vld [vmem:[#allocation143_spill] sm:$0xff] }
 0x27a   :  { %1354 = vmatpush.msrb.mxu1 %v9169_v27  ;;  %1394 = vmatpush.msrb.mxu3 %v9171_v10  ;;  %v9177_v30 = vld [vmem:[#allocation147_spill] sm:$0xff]  ;;  %v9180_v27 = vld [vmem:[#allocation150_spill] sm:$0xff]  ;;  %v9182_v10 = vld [vmem:[#allocation152_spill] sm:$0xff] }
 0x27b   :  { %1337 = vmatpush.msrb.mxu0 %v9168_v53  ;;  %1377 = vmatpush.msrb.mxu2 %v9170_v28  ;;  %v9179_v53 = vld [vmem:[#allocation149_spill] sm:$0xff]  ;;  %v9181_v28 = vld [vmem:[#allocation151_spill] sm:$0xff] }
 0x27c   :  { %1355 = vmatpush.msrb.mxu1 %v9173_v5  ;;  %1395 = vmatpush.msrb.mxu3 %v9175_v34  ;;  %v9194_v5 = vld [vmem:[#allocation154_spill] sm:$0xff] }
 0x27d   :  { %1338 = vmatpush.msrb.mxu0 %v9172_v49  ;;  %1378 = vmatpush.msrb.mxu2 %v9174_v6  ;;  %v9183_v49 = vld [vmem:[#allocation155_spill] sm:$0xff] }
 0x27e   :  { %1356 = vmatpush.msrb.mxu1 %v9177_v30  ;;  %1396 = vmatpush.msrb.mxu3 %v9179_v53  ;;  %v5761_v6 = vld [vmem:[%s7756_s5] sm:$0xff] }
 0x27f   :  { %1339 = vmatpush.msrb.mxu0 %v9176_v35  ;;  %1379 = vmatpush.msrb.mxu2 %v9178_v20  ;;  %9184 = vst [vmem:[#allocation156_spill] sm:$0xff] %v5761_v6  ;;  %v5767_v20 = vld [vmem:[%s7756_s5 + $0x130] sm:$0xff]  ;;  %v118_v35 = vpop.permute.xlu2 %117 }
 0x280   :  { %1357 = vmatpush.msrb.mxu1 %v9181_v28  ;;  %1397 = vmatpush.msrb.mxu3 %v9183_v49  ;;  %9185 = vst [vmem:[#allocation157_spill] sm:$0xff] %v5767_v20  ;;  %v5779_v49 = vld [vmem:[%s7756_s5 + $0x138] sm:$0xff]  ;;  %v148_v25 = vmul.f32 %v9194_v5, %v118_v35  ;;  %v149_v26 = vmul.f32 %v4187_v57, %v118_v35 }
 0x281   :  { %1340 = vmatpush.msrb.mxu0 %v9180_v27  ;;  %1380 = vmatpush.msrb.mxu2 %v9182_v10  ;;  %v5773_v10 = vld [vmem:[%s7756_s5 + $0x8] sm:$0xff]  ;;  %9187 = vst [vmem:[#allocation159_spill] sm:$0xff] %v5779_v49 }
 0x282   :  { %1358 = vmatpush.msrb.mxu1 %v5767_v20  ;;  %9186 = vst [vmem:[#allocation158_spill] sm:$0xff] %v5773_v10  ;;  %1398 = vmatpush.msrb.mxu3 %v5779_v49  ;;  %v5791_v20 = vld [vmem:[%s7756_s5 + $0x128] sm:$0xff]  ;;  %v5803_v49 = vld [vmem:[%s7756_s5 + $0x118] sm:$0xff] }
 0x283   :  { %1341 = vmatpush.msrb.mxu0 %v5761_v6  ;;  %1381 = vmatpush.msrb.mxu2 %v5773_v10  ;;  %v5785_v6 = vld [vmem:[%s7756_s5 + $0x120] sm:$0xff]  ;;  %9189 = vst [vmem:[#allocation161_spill] sm:$0xff] %v5791_v20  ;;  %v5797_v10 = vld [vmem:[%s7756_s5 + $0x110] sm:$0xff] }
 0x284   :  { %9188 = vst [vmem:[#allocation160_spill] sm:$0xff] %v5785_v6  ;;  %1359 = vmatpush.msrb.mxu1 %v5785_v6  ;;  %1399 = vmatpush.msrb.mxu3 %v5791_v20  ;;  %v5809_v6 = vld [vmem:[%s7756_s5 + $0x100] sm:$0xff]  ;;  %v5815_v20 = vld [vmem:[%s7756_s5 + $0x108] sm:$0xff] }
 0x285   :  { %9190 = vst [vmem:[#allocation162_spill] sm:$0xff] %v5797_v10 }
 0x286   :  { %1360 = vmatpush.msrb.mxu1 %v5797_v10  ;;  %9191 = vst [vmem:[#allocation163_spill] sm:$0xff] %v5803_v49  ;;  %1400 = vmatpush.msrb.mxu3 %v5803_v49  ;;  %v59_v49 = vpop.permute.xlu1 %58 }
 0x287   :  { %9192 = vst [vmem:[#allocation164_spill] sm:$0xff] %v5809_v6  ;;  %v94_v33 = vmul.f32 %v9195_v31, %v59_v49  ;;  %v95_v14 = vmul.f32 %v4185_v44, %v59_v49 }
 0x288   :  { %1361 = vmatpush.msrb.mxu1 %v5809_v6  ;;  %9193 = vst [vmem:[#allocation165_spill] sm:$0xff] %v5815_v20  ;;  %1401 = vmatpush.msrb.mxu3 %v5815_v20 }
 0x289   :  { %v164_v6 = vadd.f32 %v148_v25, %v94_v33  ;;  %v165_v37 = vadd.f32 %v149_v26, %v95_v14  ;;  %v9229_v14 = vld [vmem:[#allocation37_spill] sm:$0xff]  ;;  %v9230_v26 = vld [vmem:[#allocation34_spill] sm:$0xff] }
 0x28b   :  { %v186_v11 = vadd.f32 %v4189_v3, %v164_v6  ;;  %v187_v25 = vadd.f32 %v4194_v51, %v165_v37  ;;  %v9226_v37 = vld [vmem:[#allocation33_spill] sm:$0xff]  ;;  %v9239_v6 = vld [vmem:[#allocation46_spill] sm:$0xff] }
 0x29e   :  { %v1013_v10 = vpop.f32.mrf.mxu0 }
 0x2a0   :  { %v1033_v27 = vpop.f32.mrf.mxu1 }
 0x2a1   :  { %v1034_v20 = vadd.f32 %v1033_v27, %v1013_v10 }
 0x2a4   :  { %v1053_v28 = vpop.f32.mrf.mxu2 }
 0x2a6   :  { %v1073_v53 = vpop.f32.mrf.mxu3  ;;  %v1093_v30 = vpop.f32.mrf.mxu0 }
 0x2a7   :  { %v1094_v9 = vadd.f32 %v1093_v30, %v1034_v20  ;;  %v1074_v33 = vadd.f32 %v1073_v53, %v1053_v28  ;;  %v9235_v30 = vld [vmem:[#allocation43_spill] sm:$0xff]  ;;  %v9236_v20 = vld [vmem:[#allocation44_spill] sm:$0xff]  ;;  %v9237_v28 = vld [vmem:[#allocation42_spill] sm:$0xff] }
 0x2a8   :  { %v9240_v53 = vld [vmem:[#allocation49_spill] sm:$0xff] }
 0x2ac   :  { %v1113_v34 = vpop.f32.mrf.mxu1  ;;  %v1133_v32 = vpop.f32.mrf.mxu2 }
 0x2ad   :  { %v1114_v5 = vadd.f32 %v1113_v34, %v1094_v9  ;;  %v1134_v27 = vadd.f32 %v1133_v32, %v1074_v33  ;;  %v9224_v9 = vld [vmem:[#allocation30_spill] sm:$0xff]  ;;  %v9232_v32 = vld [vmem:[#allocation40_spill] sm:$0xff]  ;;  %v9233_v34 = vld [vmem:[#allocation41_spill] sm:$0xff] }
 0x2ae   :  { %v9241_v33 = vld [vmem:[#allocation47_spill] sm:$0xff] }
 0x2af   :  { %v1156_v49 = vadd.f32 %v1114_v5, %v4422_v1  ;;  %v9238_v5 = vld [vmem:[#allocation45_spill] sm:$0xff] }
 0x2b2   :  { %v1153_v29 = vpop.f32.mrf.mxu3 }
 0x2bf   :  { %v1179_v21 = vpop.f32.mrf.mxu0 }
 0x2c5   :  { %v1199_v19 = vpop.f32.mrf.mxu1  ;;  %v1219_v8 = vpop.f32.mrf.mxu2 }
 0x2c6   :  { %v1200_v63 = vadd.f32 %v1199_v19, %v1179_v21  ;;  %v9227_v19 = vld [vmem:[#allocation35_spill] sm:$0xff]  ;;  %v9228_v21 = vld [vmem:[#allocation36_spill] sm:$0xff] }
 0x2c8   :  { %v1242_v12 = vadd.f32 %v1200_v63, %v186_v11  ;;  %v1154_v63 = vadd.f32 %v1153_v29, %v1134_v27  ;;  %v37_v11 = vld [vmem:[%s7754_s0 + $0x28] sm:$0xff]  ;;  %v9231_v29 = vld [vmem:[#allocation39_spill] sm:$0xff] }
 0x2c9   :  { %68 = vperm.xlu2 %2503, %v37_v11   ;;  %v9246_v27 = vld [vmem:[#allocation52_spill] sm:$0xff] }
 0x2ca   :  { %2528 = vtanh.f32 %v1242_v12  ;;  %v9225_v12 = vld [vmem:[#allocation32_spill] sm:$0xff] }
 0x2cb   :  { %v1239_v31 = vpop.f32.mrf.mxu3 }
 0x2cc   :  { %v1240_v7 = vadd.f32 %v1239_v31, %v1219_v8  ;;  %v1157_v8 = vadd.f32 %v1154_v63, %v4430_v13  ;;  %v9234_v31 = vld [vmem:[#allocation38_spill] sm:$0xff] }
 0x2cd   :  { %v9247_v63 = vld [vmem:[#allocation54_spill] sm:$0xff] }
 0x2ce   :  { %v1243_v35 = vadd.f32 %v1240_v7, %v187_v25  ;;  %v9242_v25 = vld [vmem:[#allocation48_spill] sm:$0xff] }
 0x2d0   :  { %v5825_v10 = vpop.eup %2528  ;;  %2530 = vtanh.f32 %v1243_v35  ;;  %v9243_v35 = vld [vmem:[#allocation50_spill] sm:$0xff] }
 0x2d1   :  { %1262 = vmatmul.f32.vlgmr.msra.gmra.mxu0 %v5825_v10  ;;  %1302 = vmatmul.f32.vlgmr.msra.gmra.mxu2 %v5825_v10  ;;  %2532 = vtanh.f32 %v1156_v49  ;;  %v9244_v49 = vld [vmem:[#allocation53_spill] sm:$0xff] }
 0x2d2   :  { %1412 = vmatpush.msra.mxu0 %v4435_v15  ;;  %1452 = vmatpush.msra.mxu2 %v4441_v16  ;;  %2534 = vtanh.f32 %v1157_v8  ;;  %v9249_v8 = vld [vmem:[#allocation55_spill] sm:$0xff] }
 0x2d4   :  { %1413 = vmatpush.msra.mxu0 %v4447_v17  ;;  %1453 = vmatpush.msra.mxu2 %v4453_v18  ;;  %v9196_v17 = vld [vmem:[#allocation9_spill] sm:$0xff]  ;;  %v9197_v18 = vld [vmem:[#allocation3_spill] sm:$0xff] }
 0x2d6   :  { %v5833_v7 = vpop.eup %2530  ;;  %1414 = vmatpush.msra.mxu0 %v4462_v22  ;;  %1454 = vmatpush.msra.mxu2 %v4468_v23  ;;  %v9198_v22 = vld [vmem:[#allocation11_spill] sm:$0xff]  ;;  %v9199_v23 = vld [vmem:[#allocation4_spill] sm:$0xff] }
 0x2d7   :  { %1282 = vmatmul.f32.vlgmr.msra.gmra.mxu1 %v5833_v7  ;;  %1322 = vmatmul.f32.vlgmr.msra.gmra.mxu3 %v5833_v7  ;;  %v2533_v15 = vpop.eup %2532 }
 0x2d8   :  { %1415 = vmatpush.msra.mxu0 %v4476_v24  ;;  %1432 = vmatpush.msra.mxu1 %v4482_v36  ;;  %v2535_v16 = vpop.eup %2534  ;;  %v9200_v24 = vld [vmem:[#allocation13_spill] sm:$0xff] }
 0x2d9   :  { %1455 = vmatpush.msra.mxu2 %v4488_v39  ;;  %1472 = vmatpush.msra.mxu3 %v4494_v41  ;;  %v9201_v36 = vld [vmem:[#allocation5_spill] sm:$0xff]  ;;  %v9202_v39 = vld [vmem:[#allocation15_spill] sm:$0xff]  ;;  %v9203_v41 = vld [vmem:[#allocation6_spill] sm:$0xff] }
 0x2da   :  { %1342 = vmatmul.f32.vlgmr.msrb.gmra.mxu0 %v2533_v15  ;;  %1382 = vmatmul.f32.vlgmr.msrb.gmra.mxu2 %v2533_v15  ;;  %v9250_v15 = vld [vmem:[#allocation56_spill] sm:$0xff] }
 0x2db   :  { %1416 = vmatpush.msra.mxu0 %v4500_v42  ;;  %1433 = vmatpush.msra.mxu1 %v4506_v43  ;;  %v9204_v42 = vld [vmem:[#allocation17_spill] sm:$0xff]  ;;  %v9205_v43 = vld [vmem:[#allocation7_spill] sm:$0xff] }
 0x2dc   :  { %1456 = vmatpush.msra.mxu2 %v4512_v45  ;;  %1473 = vmatpush.msra.mxu3 %v4518_v47  ;;  %v9206_v45 = vld [vmem:[#allocation19_spill] sm:$0xff]  ;;  %v9207_v47 = vld [vmem:[#allocation8_spill] sm:$0xff] }
 0x2dd   :  { %1417 = vmatpush.msra.mxu0 %v4524_v52  ;;  %1434 = vmatpush.msra.mxu1 %v4530_v55  ;;  %v9208_v52 = vld [vmem:[#allocation21_spill] sm:$0xff]  ;;  %v9209_v55 = vld [vmem:[#allocation10_spill] sm:$0xff] }
 0x2de   :  { %1457 = vmatpush.msra.mxu2 %v4536_v56  ;;  %1474 = vmatpush.msra.mxu3 %v4542_v58  ;;  %v9210_v56 = vld [vmem:[#allocation23_spill] sm:$0xff]  ;;  %v9211_v58 = vld [vmem:[#allocation12_spill] sm:$0xff] }
 0x2df   :  { %1418 = vmatpush.msra.mxu0 %v4548_v59  ;;  %1435 = vmatpush.msra.mxu1 %v4554_v60  ;;  %v9212_v59 = vld [vmem:[#allocation14_spill] sm:$0xff]  ;;  %v9213_v60 = vld [vmem:[#allocation16_spill] sm:$0xff] }
 0x2e0   :  { %1458 = vmatpush.msra.mxu2 %v4560_v61  ;;  %1475 = vmatpush.msra.mxu3 %v4566_v54  ;;  %v9214_v61 = vld [vmem:[#allocation25_spill] sm:$0xff]  ;;  %v9215_v54 = vld [vmem:[#allocation18_spill] sm:$0xff] }
 0x2e1   :  { %1362 = vmatmul.f32.vlgmr.msrb.gmra.mxu1 %v2535_v16  ;;  %1402 = vmatmul.f32.vlgmr.msrb.gmra.mxu3 %v2535_v16  ;;  %v9251_v16 = vld [vmem:[#allocation58_spill] sm:$0xff] }
 0x2e2   :  { %1419 = vmatpush.msra.mxu0 %v4572_v50  ;;  %1436 = vmatpush.msra.mxu1 %v4578_v62  ;;  %v9216_v50 = vld [vmem:[#allocation20_spill] sm:$0xff]  ;;  %v9217_v62 = vld [vmem:[#allocation26_spill] sm:$0xff] }
 0x2e3   :  { %1459 = vmatpush.msra.mxu2 %v4584_v46  ;;  %1476 = vmatpush.msra.mxu3 %v4590_v48  ;;  %v9218_v46 = vld [vmem:[#allocation22_spill] sm:$0xff]  ;;  %v9219_v48 = vld [vmem:[#allocation24_spill] sm:$0xff] }
 0x2e4   :  { %1420 = vmatpush.msra.mxu0 %v4596_v40  ;;  %1437 = vmatpush.msra.mxu1 %v4602_v38  ;;  %v9220_v40 = vld [vmem:[#allocation28_spill] sm:$0xff]  ;;  %v9221_v38 = vld [vmem:[#allocation29_spill] sm:$0xff] }
 0x2e5   :  { %1460 = vmatpush.msra.mxu2 %v4608_v0  ;;  %1477 = vmatpush.msra.mxu3 %v4614_v2  ;;  %v9222_v0 = vld [vmem:[#allocation27_spill] sm:$0xff] }
 0x2e6   :  { %1421 = vmatpush.msra.mxu0 %v4620_v4  ;;  %1438 = vmatpush.msra.mxu1 %v9196_v17  ;;  %v36_v2 = vld [vmem:[%s7754_s0 + $0x20] sm:$0xff] }
 0x2e7   :  { %1461 = vmatpush.msra.mxu2 %v9197_v18  ;;  %1478 = vmatpush.msra.mxu3 %v9198_v22  ;;  %v9223_v4 = vld [vmem:[#allocation31_spill] sm:$0xff]  ;;  %v9254_v22 = vld [vmem:[#allocation60_spill] sm:$0xff] }
 0x2e8   :  { %1422 = vmatpush.msra.mxu0 %v9199_v23  ;;  %1439 = vmatpush.msra.mxu1 %v9200_v24  ;;  %v9252_v17 = vld [vmem:[#allocation63_spill] sm:$0xff]  ;;  %v9255_v23 = vld [vmem:[#allocation64_spill] sm:$0xff] }
 0x2e9   :  { %1462 = vmatpush.msra.mxu2 %v9201_v36  ;;  %1479 = vmatpush.msra.mxu3 %v9202_v39  ;;  %v9253_v18 = vld [vmem:[#allocation59_spill] sm:$0xff]  ;;  %v9257_v36 = vld [vmem:[#allocation61_spill] sm:$0xff]  ;;  %v9258_v39 = vld [vmem:[#allocation62_spill] sm:$0xff] }
 0x2ea   :  { %1423 = vmatpush.msra.mxu0 %v9203_v41  ;;  %1440 = vmatpush.msra.mxu1 %v9204_v42  ;;  %v9256_v24 = vld [vmem:[#allocation67_spill] sm:$0xff]  ;;  %v9259_v41 = vld [vmem:[#allocation68_spill] sm:$0xff] }
 0x2eb   :  { %1463 = vmatpush.msra.mxu2 %v9205_v43  ;;  %1480 = vmatpush.msra.mxu3 %v9206_v45  ;;  %v9260_v42 = vld [vmem:[#allocation71_spill] sm:$0xff]  ;;  %v9261_v43 = vld [vmem:[#allocation65_spill] sm:$0xff]  ;;  %v9262_v45 = vld [vmem:[#allocation66_spill] sm:$0xff] }
 0x2ec   :  { %1424 = vmatpush.msra.mxu0 %v9207_v47  ;;  %1441 = vmatpush.msra.mxu1 %v9208_v52  ;;  %v9263_v47 = vld [vmem:[#allocation72_spill] sm:$0xff]  ;;  %v9264_v52 = vld [vmem:[#allocation75_spill] sm:$0xff] }
 0x2ed   :  { %1464 = vmatpush.msra.mxu2 %v9209_v55  ;;  %1481 = vmatpush.msra.mxu3 %v9210_v56  ;;  %v9265_v55 = vld [vmem:[#allocation69_spill] sm:$0xff]  ;;  %v9266_v56 = vld [vmem:[#allocation70_spill] sm:$0xff] }
 0x2ee   :  { %1425 = vmatpush.msra.mxu0 %v9211_v58  ;;  %1442 = vmatpush.msra.mxu1 %v9212_v59  ;;  %v9267_v58 = vld [vmem:[#allocation76_spill] sm:$0xff]  ;;  %v9268_v59 = vld [vmem:[#allocation79_spill] sm:$0xff] }
 0x2ef   :  { %1465 = vmatpush.msra.mxu2 %v9213_v60  ;;  %1482 = vmatpush.msra.mxu3 %v9214_v61  ;;  %v9269_v60 = vld [vmem:[#allocation73_spill] sm:$0xff]  ;;  %v9270_v61 = vld [vmem:[#allocation74_spill] sm:$0xff] }
 0x2f0   :  { %1426 = vmatpush.msra.mxu0 %v9215_v54  ;;  %1443 = vmatpush.msra.mxu1 %v9216_v50  ;;  %v9271_v54 = vld [vmem:[#allocation80_spill] sm:$0xff]  ;;  %v9272_v50 = vld [vmem:[#allocation83_spill] sm:$0xff] }
 0x2f1   :  { %1466 = vmatpush.msra.mxu2 %v9217_v62  ;;  %1483 = vmatpush.msra.mxu3 %v9218_v46  ;;  %v9273_v62 = vld [vmem:[#allocation77_spill] sm:$0xff]  ;;  %v9274_v46 = vld [vmem:[#allocation78_spill] sm:$0xff] }
 0x2f2   :  { %1427 = vmatpush.msra.mxu0 %v9219_v48  ;;  %1444 = vmatpush.msra.mxu1 %v9220_v40  ;;  %v9275_v48 = vld [vmem:[#allocation84_spill] sm:$0xff]  ;;  %v9276_v40 = vld [vmem:[#allocation86_spill] sm:$0xff] }
 0x2f3   :  { %1467 = vmatpush.msra.mxu2 %v9221_v38  ;;  %1484 = vmatpush.msra.mxu3 %v9222_v0  ;;  %v9277_v38 = vld [vmem:[#allocation81_spill] sm:$0xff]  ;;  %v9278_v0 = vld [vmem:[#allocation82_spill] sm:$0xff] }
 0x2f4   :  { %1428 = vmatmul.f32.vlgmr.msra.gmra.mxu0 %v5825_v10  ;;  %1468 = vmatmul.f32.vlgmr.msra.gmra.mxu2 %v5825_v10  ;;  %v9245_v10 = vld [vmem:[#allocation51_spill] sm:$0xff] }
 0x2f5   :  { %1445 = vmatpush.msra.mxu1 %v9223_v4  ;;  %1485 = vmatpush.msra.mxu3 %v9224_v9  ;;  %v9280_v4 = vld [vmem:[#allocation90_spill] sm:$0xff]  ;;  %v9281_v9 = vld [vmem:[#allocation85_spill] sm:$0xff] }
 0x2f6   :  { %121 = vperm.xlu1 %2502, %v36_v2   ;;  %63 = vperm.xlu0 %2501, %v36_v2   ;;  %v9279_v2 = vld [vmem:[#allocation89_spill] sm:$0xff] }
 0x2f7   :  { %1446 = vmatpush.msra.mxu1 %v9225_v12  ;;  %1486 = vmatpush.msra.mxu3 %v9226_v37  ;;  %v9282_v12 = vld [vmem:[#allocation87_spill] sm:$0xff]  ;;  %v9283_v37 = vld [vmem:[#allocation94_spill] sm:$0xff] }
 0x2f8   :  { %1496 = vmatpush.msrb.mxu0 %v9227_v19  ;;  %1536 = vmatpush.msrb.mxu2 %v9230_v26  ;;  %v9285_v19 = vld [vmem:[#allocation88_spill] sm:$0xff]  ;;  %v9288_v26 = vld [vmem:[#allocation95_spill] sm:$0xff] }
 0x2f9   :  { %1447 = vmatpush.msra.mxu1 %v9228_v21  ;;  %1487 = vmatpush.msra.mxu3 %v9229_v14  ;;  %v9286_v21 = vld [vmem:[#allocation93_spill] sm:$0xff]  ;;  %v9287_v14 = vld [vmem:[#allocation92_spill] sm:$0xff] }
 0x2fa   :  { %1448 = vmatmul.f32.vlgmr.msra.gmra.mxu1 %v5833_v7  ;;  %1488 = vmatmul.f32.vlgmr.msra.gmra.mxu3 %v5833_v7  ;;  %v9248_v7 = vld [vmem:[#allocation57_spill] sm:$0xff] }
 0x2fb   :  { %1497 = vmatpush.msrb.mxu0 %v9231_v29  ;;  %1516 = vmatpush.msrb.mxu1 %v9232_v32  ;;  %v9289_v29 = vld [vmem:[#allocation91_spill] sm:$0xff]  ;;  %v9290_v32 = vld [vmem:[#allocation102_spill] sm:$0xff] }
 0x2fc   :  { %1556 = vmatpush.msrb.mxu3 %v9233_v34  ;;  %1537 = vmatpush.msrb.mxu2 %v9234_v31  ;;  %v9291_v34 = vld [vmem:[#allocation96_spill] sm:$0xff]  ;;  %v9292_v31 = vld [vmem:[#allocation97_spill] sm:$0xff] }
 0x2fd   :  { %1498 = vmatpush.msrb.mxu0 %v9235_v30  ;;  %1517 = vmatpush.msrb.mxu1 %v9236_v20  ;;  %v9293_v30 = vld [vmem:[#allocation99_spill] sm:$0xff]  ;;  %v9294_v20 = vld [vmem:[#allocation106_spill] sm:$0xff] }
 0x2fe   :  { %125 = vperm.xlu1 %2502, %v37_v11   ;;  %1538 = vmatpush.msrb.mxu2 %v9237_v28  ;;  %v9284_v11 = vld [vmem:[#allocation98_spill] sm:$0xff]  ;;  %v9295_v28 = vld [vmem:[#allocation100_spill] sm:$0xff] }
 0x2ff   :  { %1499 = vmatpush.msrb.mxu0 %v9238_v5  ;;  %1557 = vmatpush.msrb.mxu3 %v9239_v6  ;;  %v9296_v5 = vld [vmem:[#allocation101_spill] sm:$0xff]  ;;  %v9297_v6 = vld [vmem:[#allocation103_spill] sm:$0xff] }
 0x300   :  { %1518 = vmatpush.msrb.mxu1 %v9240_v53  ;;  %1539 = vmatpush.msrb.mxu2 %v9241_v33  ;;  %v9298_v53 = vld [vmem:[#allocation108_spill] sm:$0xff] }
 0x301   :  { %1500 = vmatpush.msrb.mxu0 %v9242_v25  ;;  %1558 = vmatpush.msrb.mxu3 %v9243_v35  ;;  %v9299_v33 = vld [vmem:[#allocation104_spill] sm:$0xff]  ;;  %v9300_v25 = vld [vmem:[#allocation105_spill] sm:$0xff]  ;;  %v9301_v35 = vld [vmem:[#allocation107_spill] sm:$0xff] }
 0x302   :  { %1519 = vmatpush.msrb.mxu1 %v9244_v49  ;;  %1540 = vmatpush.msrb.mxu2 %v9245_v10  ;;  %v9302_v49 = vld [vmem:[#allocation112_spill] sm:$0xff]  ;;  %v9303_v10 = vld [vmem:[#allocation110_spill] sm:$0xff] }
 0x303   :  { %1501 = vmatpush.msrb.mxu0 %v9246_v27  ;;  %1559 = vmatpush.msrb.mxu3 %v9247_v63  ;;  %v9304_v27 = vld [vmem:[#allocation109_spill] sm:$0xff]  ;;  %v9305_v63 = vld [vmem:[#allocation111_spill] sm:$0xff] }
 0x304   :  { %1520 = vmatpush.msrb.mxu1 %v9248_v7  ;;  %1541 = vmatpush.msrb.mxu2 %v9249_v8  ;;  %v9306_v7 = vld [vmem:[#allocation116_spill] sm:$0xff]  ;;  %v9307_v8 = vld [vmem:[#allocation114_spill] sm:$0xff] }
 0x305   :  { %1502 = vmatpush.msrb.mxu0 %v9250_v15  ;;  %1560 = vmatpush.msrb.mxu3 %v9251_v16  ;;  %v9308_v15 = vld [vmem:[#allocation113_spill] sm:$0xff]  ;;  %v9309_v16 = vld [vmem:[#allocation115_spill] sm:$0xff] }
 0x306   :  { %1521 = vmatpush.msrb.mxu1 %v9252_v17  ;;  %1542 = vmatpush.msrb.mxu2 %v9253_v18  ;;  %v9310_v17 = vld [vmem:[#allocation120_spill] sm:$0xff]  ;;  %v9311_v18 = vld [vmem:[#allocation118_spill] sm:$0xff] }
 0x307   :  { %1503 = vmatpush.msrb.mxu0 %v9254_v22  ;;  %1561 = vmatpush.msrb.mxu3 %v9255_v23  ;;  %v9312_v22 = vld [vmem:[#allocation117_spill] sm:$0xff]  ;;  %v9313_v23 = vld [vmem:[#allocation119_spill] sm:$0xff] }
 0x308   :  { %1522 = vmatpush.msrb.mxu1 %v9256_v24  ;;  %1543 = vmatpush.msrb.mxu2 %v9257_v36  ;;  %v9314_v24 = vld [vmem:[#allocation124_spill] sm:$0xff]  ;;  %v9315_v36 = vld [vmem:[#allocation122_spill] sm:$0xff] }
 0x309   :  { %1504 = vmatpush.msrb.mxu0 %v9258_v39  ;;  %1562 = vmatpush.msrb.mxu3 %v9259_v41  ;;  %v9316_v39 = vld [vmem:[#allocation121_spill] sm:$0xff]  ;;  %v9317_v41 = vld [vmem:[#allocation123_spill] sm:$0xff] }
 0x30a   :  { %1523 = vmatpush.msrb.mxu1 %v9260_v42  ;;  %1544 = vmatpush.msrb.mxu2 %v9261_v43  ;;  %v9318_v42 = vld [vmem:[#allocation128_spill] sm:$0xff]  ;;  %v9319_v43 = vld [vmem:[#allocation126_spill] sm:$0xff] }
 0x30b   :  { %1505 = vmatpush.msrb.mxu0 %v9262_v45  ;;  %1563 = vmatpush.msrb.mxu3 %v9263_v47  ;;  %v9320_v45 = vld [vmem:[#allocation125_spill] sm:$0xff]  ;;  %v9321_v47 = vld [vmem:[#allocation127_spill] sm:$0xff] }
 0x30c   :  { %1524 = vmatpush.msrb.mxu1 %v9264_v52  ;;  %1545 = vmatpush.msrb.mxu2 %v9265_v55  ;;  %v9322_v52 = vld [vmem:[#allocation132_spill] sm:$0xff]  ;;  %v9323_v55 = vld [vmem:[#allocation130_spill] sm:$0xff] }
 0x30d   :  { %1506 = vmatpush.msrb.mxu0 %v9266_v56  ;;  %1564 = vmatpush.msrb.mxu3 %v9267_v58  ;;  %v9324_v56 = vld [vmem:[#allocation129_spill] sm:$0xff]  ;;  %v9325_v58 = vld [vmem:[#allocation131_spill] sm:$0xff] }
 0x30e   :  { %1525 = vmatpush.msrb.mxu1 %v9268_v59  ;;  %1546 = vmatpush.msrb.mxu2 %v9269_v60  ;;  %v9326_v59 = vld [vmem:[#allocation136_spill] sm:$0xff]  ;;  %v9327_v60 = vld [vmem:[#allocation134_spill] sm:$0xff] }
 0x30f   :  { %1507 = vmatpush.msrb.mxu0 %v9270_v61  ;;  %1565 = vmatpush.msrb.mxu3 %v9271_v54  ;;  %v9328_v61 = vld [vmem:[#allocation133_spill] sm:$0xff]  ;;  %v9329_v54 = vld [vmem:[#allocation135_spill] sm:$0xff] }
 0x310   :  { %1526 = vmatpush.msrb.mxu1 %v9272_v50  ;;  %1547 = vmatpush.msrb.mxu2 %v9273_v62  ;;  %v9330_v50 = vld [vmem:[#allocation140_spill] sm:$0xff]  ;;  %v9331_v62 = vld [vmem:[#allocation138_spill] sm:$0xff] }
 0x311   :  { %1508 = vmatpush.msrb.mxu0 %v9274_v46  ;;  %1566 = vmatpush.msrb.mxu3 %v9275_v48  ;;  %v9332_v46 = vld [vmem:[#allocation137_spill] sm:$0xff]  ;;  %v9333_v48 = vld [vmem:[#allocation139_spill] sm:$0xff] }
 0x312   :  { %1527 = vmatpush.msrb.mxu1 %v9276_v40  ;;  %1548 = vmatpush.msrb.mxu2 %v9277_v38  ;;  %v9334_v40 = vld [vmem:[#allocation144_spill] sm:$0xff]  ;;  %v9335_v38 = vld [vmem:[#allocation142_spill] sm:$0xff] }
 0x313   :  { %1509 = vmatpush.msrb.mxu0 %v9278_v0  ;;  %1567 = vmatpush.msrb.mxu3 %v9279_v2  ;;  %v9336_v0 = vld [vmem:[#allocation141_spill] sm:$0xff]  ;;  %v9337_v2 = vld [vmem:[#allocation143_spill] sm:$0xff] }
 0x314   :  { %1528 = vmatpush.msrb.mxu1 %v9280_v4  ;;  %1549 = vmatpush.msrb.mxu2 %v9281_v9  ;;  %v9338_v4 = vld [vmem:[#allocation147_spill] sm:$0xff]  ;;  %v9339_v9 = vld [vmem:[#allocation146_spill] sm:$0xff] }
 0x315   :  { %1510 = vmatpush.msrb.mxu0 %v9282_v12  ;;  %1568 = vmatpush.msrb.mxu3 %v9283_v37  ;;  %v9340_v12 = vld [vmem:[#allocation145_spill] sm:$0xff] }
 0x316   :  { %1529 = vmatpush.msrb.mxu1 %v9284_v11  ;;  %1550 = vmatpush.msrb.mxu2 %v9285_v19  ;;  %v9341_v37 = vld [vmem:[#allocation149_spill] sm:$0xff]  ;;  %v9342_v11 = vld [vmem:[#allocation151_spill] sm:$0xff]  ;;  %v9343_v19 = vld [vmem:[#allocation148_spill] sm:$0xff] }
 0x317   :  { %1511 = vmatpush.msrb.mxu0 %v9286_v21  ;;  %1569 = vmatpush.msrb.mxu3 %v9288_v26  ;;  %v9344_v21 = vld [vmem:[#allocation150_spill] sm:$0xff]  ;;  %v9346_v26 = vld [vmem:[#allocation157_spill] sm:$0xff] }
 0x318   :  { %1551 = vmatpush.msrb.mxu2 %v9289_v29  ;;  %1530 = vmatpush.msrb.mxu1 %v9290_v32  ;;  %v9347_v29 = vld [vmem:[#allocation152_spill] sm:$0xff] }
 0x319   :  { %1576 = vmatpush.msra.mxu0 %v9287_v14  ;;  %1570 = vmatpush.msrb.mxu3 %v9293_v30  ;;  %v9345_v14 = vld [vmem:[#allocation155_spill] sm:$0xff]  ;;  %v9348_v32 = vld [vmem:[#allocation156_spill] sm:$0xff]  ;;  %v9351_v30 = vld [vmem:[#allocation158_spill] sm:$0xff] }
 0x31a   :  { %1616 = vmatpush.msra.mxu2 %v9291_v34  ;;  %1531 = vmatpush.msrb.mxu1 %v9294_v20  ;;  %v9349_v34 = vld [vmem:[#allocation159_spill] sm:$0xff]  ;;  %v9352_v20 = vmov 1  }
 0x31b   :  { %1577 = vmatpush.msra.mxu0 %v9292_v31  ;;  %1571 = vmatpush.msrb.mxu3 %v9297_v6  ;;  %v9350_v31 = vld [vmem:[#allocation160_spill] sm:$0xff]  ;;  %v9355_v6 = vmov 0  }
 0x31c   :  { %1617 = vmatpush.msra.mxu2 %v9295_v28  ;;  %1596 = vmatpush.msra.mxu1 %v9298_v53  ;;  %v9353_v28 = vld [vmem:[#allocation161_spill] sm:$0xff]  ;;  %v9356_v53 = vld [vmem:[#allocation163_spill] sm:$0xff] }
 0x31d   :  { %1578 = vmatpush.msra.mxu0 %v9296_v5  ;;  %1636 = vmatpush.msra.mxu3 %v9301_v35  ;;  %v9354_v5 = vld [vmem:[#allocation162_spill] sm:$0xff] }
 0x31e   :  { %1618 = vmatpush.msra.mxu2 %v9299_v33  ;;  %1597 = vmatpush.msra.mxu1 %v9302_v49  ;;  %v9357_v33 = vld [vmem:[#allocation164_spill] sm:$0xff] }
 0x31f   :  { %1579 = vmatpush.msra.mxu0 %v9300_v25  ;;  %1637 = vmatpush.msra.mxu3 %v9305_v63  ;;  %v9358_v25 = vld [vmem:[#allocation165_spill] sm:$0xff] }
 0x320   :  { %1619 = vmatpush.msra.mxu2 %v9303_v10  ;;  %1598 = vmatpush.msra.mxu1 %v9306_v7 }
 0x321   :  { %1580 = vmatpush.msra.mxu0 %v9304_v27  ;;  %1638 = vmatpush.msra.mxu3 %v9309_v16  ;;  %v9360_v16 = vld [vmem:[#allocation153_spill] sm:$0xff] }
 0x322   :  { %1620 = vmatpush.msra.mxu2 %v9307_v8  ;;  %1599 = vmatpush.msra.mxu1 %v9310_v17  ;;  %v9359_v8 = vld [vmem:[#allocation154_spill] sm:$0xff] }
 0x323   :  { %1581 = vmatpush.msra.mxu0 %v9308_v15  ;;  %1639 = vmatpush.msra.mxu3 %v9313_v23 }
 0x324   :  { %1621 = vmatpush.msra.mxu2 %v9311_v18  ;;  %1600 = vmatpush.msra.mxu1 %v9314_v24 }
 0x325   :  { %1582 = vmatpush.msra.mxu0 %v9312_v22  ;;  %1640 = vmatpush.msra.mxu3 %v9317_v41 }
 0x326   :  { %1622 = vmatpush.msra.mxu2 %v9315_v36  ;;  %1601 = vmatpush.msra.mxu1 %v9318_v42 }
 0x327   :  { %1583 = vmatpush.msra.mxu0 %v9316_v39  ;;  %1641 = vmatpush.msra.mxu3 %v9321_v47 }
 0x328   :  { %1623 = vmatpush.msra.mxu2 %v9319_v43  ;;  %1602 = vmatpush.msra.mxu1 %v9322_v52 }
 0x329   :  { %1584 = vmatpush.msra.mxu0 %v9320_v45  ;;  %1642 = vmatpush.msra.mxu3 %v9325_v58 }
 0x32a   :  { %1624 = vmatpush.msra.mxu2 %v9323_v55  ;;  %1603 = vmatpush.msra.mxu1 %v9326_v59 }
 0x32b   :  { %1585 = vmatpush.msra.mxu0 %v9324_v56  ;;  %1643 = vmatpush.msra.mxu3 %v9329_v54 }
 0x32c   :  { %1625 = vmatpush.msra.mxu2 %v9327_v60  ;;  %1604 = vmatpush.msra.mxu1 %v9330_v50 }
 0x32d   :  { %1586 = vmatpush.msra.mxu0 %v9328_v61  ;;  %1644 = vmatpush.msra.mxu3 %v9333_v48 }
 0x32e   :  { %1626 = vmatpush.msra.mxu2 %v9331_v62  ;;  %1605 = vmatpush.msra.mxu1 %v9334_v40 }
 0x32f   :  { %1587 = vmatpush.msra.mxu0 %v9332_v46  ;;  %1645 = vmatpush.msra.mxu3 %v9337_v2  ;;  %v6052_v2 = vld [vmem:[%s7753_s3 + $0xf0] sm:$0xff] }
 0x330   :  { %1627 = vmatpush.msra.mxu2 %v9335_v38  ;;  %1606 = vmatpush.msra.mxu1 %v9338_v4  ;;  %v6058_v4 = vld [vmem:[%s7753_s3 + $0xf8] sm:$0xff] }
 0x331   :  { %1588 = vmatpush.msra.mxu0 %v9336_v0  ;;  %1646 = vmatpush.msra.mxu3 %v9341_v37 }
 0x332   :  { %1628 = vmatpush.msra.mxu2 %v9339_v9  ;;  %1607 = vmatpush.msra.mxu1 %v9342_v11  ;;  %v6064_v9 = vld [vmem:[%s7753_s3 + $0xe0] sm:$0xff] }
 0x333   :  { %1589 = vmatpush.msra.mxu0 %v9340_v12  ;;  %1647 = vmatpush.msra.mxu3 %v9345_v14  ;;  %v6070_v12 = vld [vmem:[%s7753_s3 + $0xe8] sm:$0xff]  ;;  %v6093_v14 = vld [vmem:[%s7753_s3 + $0xc0] sm:$0xff] }
 0x334   :  { %1629 = vmatpush.msra.mxu2 %v9343_v19  ;;  %1608 = vmatpush.msra.mxu1 %v9346_v26  ;;  %v6079_v19 = vld [vmem:[%s7753_s3 + $0xd0] sm:$0xff] }
 0x335   :  { %1590 = vmatpush.msra.mxu0 %v9344_v21  ;;  %1648 = vmatpush.msra.mxu3 %v9349_v34  ;;  %v6085_v21 = vld [vmem:[%s7753_s3 + $0xd8] sm:$0xff] }
 0x336   :  { %1630 = vmatpush.msra.mxu2 %v9347_v29  ;;  %1609 = vmatpush.msra.mxu1 %v9350_v31  ;;  %v6099_v29 = vld [vmem:[%s7753_s3 + $0x1f0] sm:$0xff] }
 0x337   :  { %1591 = vmatpush.msra.mxu0 %v9348_v32  ;;  %2504 = vset.pattern.permute.xlu0 %v9352_v20 }
 0x338   :  { %1631 = vmatpush.msra.mxu2 %v9351_v30  ;;  %1649 = vmatpush.msra.mxu3 %v9353_v28 }
 0x339   :  { %1610 = vmatpush.msra.mxu1 %v9354_v5  ;;  %2505 = vset.pattern.permute.xlu1 %v9355_v6 }
 0x33a   :  { %1650 = vmatpush.msra.mxu3 %v9356_v53 }
 0x33b   :  { %1611 = vmatpush.msra.mxu1 %v9357_v33 }
 0x33c   :  { %1651 = vmatpush.msra.mxu3 %v9358_v25 }
 0x34e   :  { %v1263_v35 = vpop.f32.mrf.mxu0 }
 0x354   :  { %v1283_v49 = vpop.f32.mrf.mxu1  ;;  %v1303_v10 = vpop.f32.mrf.mxu2 }
 0x355   :  { %v1284_v43 = vadd.f32 %v1283_v49, %v1263_v35  ;;  %v6105_v35 = vld [vmem:[%s7753_s3 + $0xc8] sm:$0xff]  ;;  %v6111_v49 = vld [vmem:[%s7753_s3 + $0x1f8] sm:$0xff] }
 0x357   :  { %v1343_v18 = vpop.f32.mrf.mxu0 }
 0x358   :  { %v1344_v58 = vadd.f32 %v1343_v18, %v1284_v43  ;;  %v6153_v18 = vld [vmem:[%s7753_s3 + $0xa8] sm:$0xff]  ;;  %v6195_v43 = vld [vmem:[%s7753_s3 + $0x1b0] sm:$0xff] }
 0x35a   :  { %v1323_v27 = vpop.f32.mrf.mxu3 }
 0x35b   :  { %v1324_v50 = vadd.f32 %v1323_v27, %v1303_v10  ;;  %v6117_v10 = vld [vmem:[%s7753_s3 + $0xb0] sm:$0xff]  ;;  %v6123_v27 = vld [vmem:[%s7753_s3 + $0x1e0] sm:$0xff] }
 0x35d   :  { %v1383_v39 = vpop.f32.mrf.mxu2 }
 0x35e   :  { %v1363_v22 = vpop.f32.mrf.mxu1  ;;  %v1384_v38 = vadd.f32 %v1383_v39, %v1324_v50  ;;  %v6177_v39 = vld [vmem:[%s7753_s3 + $0x98] sm:$0xff]  ;;  %v6261_v50 = vld [vmem:[%s7753_s3 + $0x50] sm:$0xff] }
 0x35f   :  { %v1364_v60 = vadd.f32 %v1363_v22, %v1344_v58  ;;  %v6159_v22 = vld [vmem:[%s7753_s3 + $0x1d8] sm:$0xff]  ;;  %v6231_v58 = vld [vmem:[%s7753_s3 + $0x1a8] sm:$0xff]  ;;  %9364 = vst [vmem:[#allocation4_spill] sm:$0xff] %v6261_v50 }
 0x361   :  { %v1406_v48 = vadd.f32 %v1364_v60, %v4422_v1  ;;  %v6243_v60 = vld [vmem:[%s7753_s3 + $0x190] sm:$0xff] }
 0x362   :  { %9361 = vst [vmem:[#allocation9_spill] sm:$0xff] %v6243_v60 }
 0x364   :  { %v1403_v41 = vpop.f32.mrf.mxu3 }
 0x365   :  { %v1404_v0 = vadd.f32 %v1403_v41, %v1384_v38  ;;  %v6183_v41 = vld [vmem:[%s7753_s3 + $0x1c8] sm:$0xff]  ;;  %v6285_v38 = vld [vmem:[%s7753_s3 + $0x40] sm:$0xff] }
 0x366   :  { %9368 = vst [vmem:[#allocation6_spill] sm:$0xff] %v6285_v38 }
 0x367   :  { %v1407_v11 = vadd.f32 %v1404_v0, %v4430_v13  ;;  %v6291_v0 = vld [vmem:[%s7753_s3 + $0x170] sm:$0xff] }
 0x368   :  { %v64_v63 = vpop.permute.xlu0 %63  ;;  %v122_v7 = vpop.permute.xlu1 %121  ;;  %9369 = vst [vmem:[#allocation17_spill] sm:$0xff] %v6291_v0 }
 0x369   :  { %v150_v15 = vmul.f32 %v9359_v8, %v122_v7  ;;  %v96_v17 = vmul.f32 %v9360_v16, %v64_v63  ;;  %v151_v24 = vmul.f32 %v4187_v57, %v122_v7  ;;  %v97_v36 = vmul.f32 %v4185_v44, %v64_v63  ;;  %v6129_v63 = vld [vmem:[%s7753_s3 + $0xb8] sm:$0xff]  ;;  %v6135_v7 = vld [vmem:[%s7753_s3 + $0x1e8] sm:$0xff] }
 0x36b   :  { %v166_v23 = vadd.f32 %v150_v15, %v96_v17  ;;  %v167_v52 = vadd.f32 %v151_v24, %v97_v36  ;;  %v6141_v15 = vld [vmem:[%s7753_s3 + $0xa0] sm:$0xff]  ;;  %v6147_v17 = vld [vmem:[%s7753_s3 + $0x1d0] sm:$0xff] }
 0x36c   :  { %v6171_v24 = vld [vmem:[%s7753_s3 + $0x1c0] sm:$0xff] }
 0x36d   :  { %v188_v42 = vadd.f32 %v4189_v3, %v166_v23  ;;  %v189_v59 = vadd.f32 %v4194_v51, %v167_v52  ;;  %v6165_v23 = vld [vmem:[%s7753_s3 + $0x90] sm:$0xff] }
 0x36e   :  { %v6213_v52 = vld [vmem:[%s7753_s3 + $0x70] sm:$0xff] }
 0x371   :  { %v1429_v45 = vpop.f32.mrf.mxu0 }
 0x377   :  { %v1449_v47 = vpop.f32.mrf.mxu1  ;;  %v1469_v61 = vpop.f32.mrf.mxu2 }
 0x378   :  { %v1450_v55 = vadd.f32 %v1449_v47, %v1429_v45  ;;  %v6201_v45 = vld [vmem:[%s7753_s3 + $0x88] sm:$0xff]  ;;  %v6207_v47 = vld [vmem:[%s7753_s3 + $0x1b8] sm:$0xff] }
 0x37a   :  { %v1492_v56 = vadd.f32 %v1450_v55, %v188_v42  ;;  %v6189_v42 = vld [vmem:[%s7753_s3 + $0x80] sm:$0xff] }
 0x37b   :  { %v6219_v55 = vld [vmem:[%s7753_s3 + $0x1a0] sm:$0xff] }
 0x37c   :  { %2536 = vtanh.f32 %v1492_v56  ;;  %v6225_v56 = vld [vmem:[%s7753_s3 + $0x78] sm:$0xff] }
 0x37d   :  { %v1489_v54 = vpop.f32.mrf.mxu3 }
 0x37e   :  { %v1490_v62 = vadd.f32 %v1489_v54, %v1469_v61  ;;  %v6249_v61 = vld [vmem:[%s7753_s3 + $0x68] sm:$0xff]  ;;  %v6255_v54 = vld [vmem:[%s7753_s3 + $0x198] sm:$0xff] }
 0x37f   :  { %9362 = vst [vmem:[#allocation3_spill] sm:$0xff] %v6249_v61 }
 0x380   :  { %v1493_v46 = vadd.f32 %v1490_v62, %v189_v59  ;;  %v6237_v59 = vld [vmem:[%s7753_s3 + $0x60] sm:$0xff]  ;;  %9363 = vst [vmem:[#allocation11_spill] sm:$0xff] %v6255_v54 }
 0x381   :  { %v6267_v62 = vld [vmem:[%s7753_s3 + $0x180] sm:$0xff] }
 0x382   :  { %v6045_v40 = vpop.eup %2536  ;;  %2538 = vtanh.f32 %v1493_v46  ;;  %9365 = vst [vmem:[#allocation13_spill] sm:$0xff] %v6267_v62  ;;  %v6273_v46 = vld [vmem:[%s7753_s3 + $0x58] sm:$0xff] }
 0x383   :  { %1512 = vmatmul.f32.vlgmr.msrb.gmra.mxu0 %v6045_v40  ;;  %1552 = vmatmul.f32.vlgmr.msrb.gmra.mxu2 %v6045_v40  ;;  %2540 = vtanh.f32 %v1406_v48  ;;  %9366 = vst [vmem:[#allocation5_spill] sm:$0xff] %v6273_v46  ;;  %v6279_v48 = vld [vmem:[%s7753_s3 + $0x188] sm:$0xff] }
 0x384   :  { %1662 = vmatpush.msrb.mxu0 %v6052_v2  ;;  %1702 = vmatpush.msrb.mxu2 %v6058_v4  ;;  %2542 = vtanh.f32 %v1407_v11  ;;  %9367 = vst [vmem:[#allocation15_spill] sm:$0xff] %v6279_v48  ;;  %v6297_v11 = vld [vmem:[%s7753_s3 + $0x48] sm:$0xff] }
 0x385   :  { %9370 = vst [vmem:[#allocation7_spill] sm:$0xff] %v6297_v11 }
 0x386   :  { %1663 = vmatpush.msrb.mxu0 %v6064_v9  ;;  %1703 = vmatpush.msrb.mxu2 %v6070_v12 }
 0x388   :  { %v6073_v37 = vpop.eup %2538  ;;  %1664 = vmatpush.msrb.mxu0 %v6079_v19  ;;  %1704 = vmatpush.msrb.mxu2 %v6085_v21 }
 0x389   :  { %1532 = vmatmul.f32.vlgmr.msrb.gmra.mxu1 %v6073_v37  ;;  %1572 = vmatmul.f32.vlgmr.msrb.gmra.mxu3 %v6073_v37  ;;  %v2541_v6 = vpop.eup %2540 }
 0x38a   :  { %1665 = vmatpush.msrb.mxu0 %v6093_v14  ;;  %1682 = vmatpush.msrb.mxu1 %v6099_v29  ;;  %v2543_v36 = vpop.eup %2542 }
 0x38b   :  { %1705 = vmatpush.msrb.mxu2 %v6105_v35  ;;  %1722 = vmatpush.msrb.mxu3 %v6111_v49 }
 0x38c   :  { %1592 = vmatmul.f32.vlgmr.msra.gmra.mxu0 %v2541_v6  ;;  %1632 = vmatmul.f32.vlgmr.msra.gmra.mxu2 %v2541_v6  ;;  %v6303_v6 = vld [vmem:[%s7753_s3 + $0x178] sm:$0xff] }
 0x38d   :  { %1666 = vmatpush.msrb.mxu0 %v6117_v10  ;;  %1683 = vmatpush.msrb.mxu1 %v6123_v27  ;;  %9371 = vst [vmem:[#allocation19_spill] sm:$0xff] %v6303_v6 }
 0x38e   :  { %1706 = vmatpush.msrb.mxu2 %v6129_v63  ;;  %1723 = vmatpush.msrb.mxu3 %v6135_v7 }
 0x38f   :  { %1667 = vmatpush.msrb.mxu0 %v6141_v15  ;;  %1684 = vmatpush.msrb.mxu1 %v6147_v17 }
 0x390   :  { %1707 = vmatpush.msrb.mxu2 %v6153_v18  ;;  %1724 = vmatpush.msrb.mxu3 %v6159_v22 }
 0x391   :  { %1668 = vmatpush.msrb.mxu0 %v6165_v23  ;;  %1685 = vmatpush.msrb.mxu1 %v6171_v24 }
 0x392   :  { %1708 = vmatpush.msrb.mxu2 %v6177_v39  ;;  %1725 = vmatpush.msrb.mxu3 %v6183_v41 }
 0x393   :  { %1612 = vmatmul.f32.vlgmr.msra.gmra.mxu1 %v2543_v36  ;;  %1652 = vmatmul.f32.vlgmr.msra.gmra.mxu3 %v2543_v36  ;;  %v6309_v36 = vld [vmem:[%s7753_s3 + $0x30] sm:$0xff] }
 0x394   :  { %1669 = vmatpush.msrb.mxu0 %v6189_v42  ;;  %1686 = vmatpush.msrb.mxu1 %v6195_v43  ;;  %9372 = vst [vmem:[#allocation8_spill] sm:$0xff] %v6309_v36 }
 0x395   :  { %1709 = vmatpush.msrb.mxu2 %v6201_v45  ;;  %1726 = vmatpush.msrb.mxu3 %v6207_v47 }
 0x396   :  { %1670 = vmatpush.msrb.mxu0 %v6213_v52  ;;  %1687 = vmatpush.msrb.mxu1 %v6219_v55 }
 0x397   :  { %1710 = vmatpush.msrb.mxu2 %v6225_v56  ;;  %1727 = vmatpush.msrb.mxu3 %v6231_v58 }
 0x398   :  { %1671 = vmatpush.msrb.mxu0 %v6237_v59  ;;  %1688 = vmatpush.msrb.mxu1 %v6243_v60 }
 0x399   :  { %1711 = vmatpush.msrb.mxu2 %v6249_v61  ;;  %1728 = vmatpush.msrb.mxu3 %v6255_v54 }
 0x39a   :  { %1672 = vmatpush.msrb.mxu0 %v6261_v50  ;;  %1689 = vmatpush.msrb.mxu1 %v6267_v62 }
 0x39b   :  { %1712 = vmatpush.msrb.mxu2 %v6273_v46  ;;  %1729 = vmatpush.msrb.mxu3 %v6279_v48 }
 0x39c   :  { %1673 = vmatpush.msrb.mxu0 %v6285_v38  ;;  %1690 = vmatpush.msrb.mxu1 %v6291_v0  ;;  %v6315_v0 = vld [vmem:[%s7753_s3 + $0x160] sm:$0xff] }
 0x39d   :  { %1713 = vmatpush.msrb.mxu2 %v6297_v11  ;;  %1730 = vmatpush.msrb.mxu3 %v6303_v6  ;;  %9373 = vst [vmem:[#allocation21_spill] sm:$0xff] %v6315_v0  ;;  %v6321_v11 = vld [vmem:[%s7753_s3 + $0x38] sm:$0xff]  ;;  %v6327_v6 = vld [vmem:[%s7753_s3 + $0x168] sm:$0xff] }
 0x39e   :  { %1674 = vmatpush.msrb.mxu0 %v6309_v36  ;;  %1691 = vmatpush.msrb.mxu1 %v6315_v0  ;;  %9374 = vst [vmem:[#allocation10_spill] sm:$0xff] %v6321_v11  ;;  %v6333_v36 = vld [vmem:[%s7753_s3 + $0x20] sm:$0xff]  ;;  %v6339_v0 = vld [vmem:[%s7753_s3 + $0x150] sm:$0xff] }
 0x39f   :  { %1714 = vmatpush.msrb.mxu2 %v6321_v11  ;;  %9375 = vst [vmem:[#allocation23_spill] sm:$0xff] %v6327_v6  ;;  %1731 = vmatpush.msrb.mxu3 %v6327_v6  ;;  %v6345_v11 = vld [vmem:[%s7753_s3 + $0x28] sm:$0xff]  ;;  %v6351_v6 = vld [vmem:[%s7753_s3 + $0x158] sm:$0xff] }
 0x3a0   :  { %9376 = vst [vmem:[#allocation12_spill] sm:$0xff] %v6333_v36  ;;  %1675 = vmatpush.msrb.mxu0 %v6333_v36  ;;  %1692 = vmatpush.msrb.mxu1 %v6339_v0  ;;  %v6357_v36 = vld [vmem:[%s7753_s3 + $0x10] sm:$0xff] }
 0x3a1   :  { %9377 = vst [vmem:[#allocation14_spill] sm:$0xff] %v6339_v0  ;;  %1715 = vmatpush.msrb.mxu2 %v6345_v11  ;;  %1732 = vmatpush.msrb.mxu3 %v6351_v6  ;;  %v6363_v0 = vld [vmem:[%s7753_s3 + $0x140] sm:$0xff] }
 0x3a2   :  { %9378 = vst [vmem:[#allocation16_spill] sm:$0xff] %v6345_v11  ;;  %1676 = vmatpush.msrb.mxu0 %v6357_v36  ;;  %1693 = vmatpush.msrb.mxu1 %v6363_v0  ;;  %v6369_v11 = vld [vmem:[%s7753_s3 + $0x18] sm:$0xff] }
 0x3a3   :  { %9379 = vst [vmem:[#allocation25_spill] sm:$0xff] %v6351_v6  ;;  %1716 = vmatpush.msrb.mxu2 %v6369_v11  ;;  %v6375_v6 = vld [vmem:[%s7753_s3 + $0x148] sm:$0xff] }
 0x3a4   :  { %9380 = vst [vmem:[#allocation18_spill] sm:$0xff] %v6357_v36  ;;  %1733 = vmatpush.msrb.mxu3 %v6375_v6  ;;  %v6381_v36 = vld [vmem:[%s7753_s3] sm:$0xff] }
 0x3a5   :  { %9381 = vst [vmem:[#allocation20_spill] sm:$0xff] %v6363_v0  ;;  %1677 = vmatpush.msrb.mxu0 %v6381_v36  ;;  %v6387_v0 = vld [vmem:[%s7753_s3 + $0x130] sm:$0xff] }
 0x3a6   :  { %9382 = vst [vmem:[#allocation26_spill] sm:$0xff] %v6369_v11  ;;  %1694 = vmatpush.msrb.mxu1 %v6387_v0  ;;  %v6393_v11 = vld [vmem:[%s7753_s3 + $0x8] sm:$0xff]  ;;  %1678 = vmatmul.f32.vlgmr.msrb.gmra.mxu0 %v6045_v40 }
 0x3a7   :  { %9383 = vst [vmem:[#allocation22_spill] sm:$0xff] %v6375_v6  ;;  %1717 = vmatpush.msrb.mxu2 %v6393_v11  ;;  %v6399_v6 = vld [vmem:[%s7753_s3 + $0x138] sm:$0xff] }
 0x3a8   :  { %9384 = vst [vmem:[#allocation24_spill] sm:$0xff] %v6381_v36  ;;  %1734 = vmatpush.msrb.mxu3 %v6399_v6  ;;  %v38_v36 = vld [vmem:[%s7754_s0 + $0x30] sm:$0xff]  ;;  %1718 = vmatmul.f32.vlgmr.msrb.gmra.mxu2 %v6045_v40 }
 0x3a9   :  { %9385 = vst [vmem:[#allocation28_spill] sm:$0xff] %v6387_v0  ;;  %v6410_v0 = vld [vmem:[%s7753_s3 + $0x120] sm:$0xff]  ;;  %129 = vperm.xlu0 %2504, %v38_v36   ;;  %73 = vperm.xlu2 %2503, %v38_v36   ;;  %v6422_v40 = vld [vmem:[%s7753_s3 + $0x110] sm:$0xff]  ;;  %v6440_v36 = vld [vmem:[%s7755_s4 + $0xf8] sm:$0xff] }
 0x3aa   :  { %9386 = vst [vmem:[#allocation29_spill] sm:$0xff] %v6393_v11  ;;  %1695 = vmatpush.msrb.mxu1 %v6410_v0  ;;  %v6416_v11 = vld [vmem:[%s7753_s3 + $0x128] sm:$0xff]  ;;  %1786 = vmatpush.msra.mxu2 %v6440_v36 }
 0x3ab   :  { %9387 = vst [vmem:[#allocation27_spill] sm:$0xff] %v6399_v6  ;;  %1735 = vmatpush.msrb.mxu3 %v6416_v11 }
 0x3ac   :  { %9388 = vst [vmem:[#allocation31_spill] sm:$0xff] %v6410_v0  ;;  %1696 = vmatpush.msrb.mxu1 %v6422_v40  ;;  %v6428_v0 = vld [vmem:[%s7753_s3 + $0x118] sm:$0xff] }
 0x3ad   :  { %9389 = vst [vmem:[#allocation30_spill] sm:$0xff] %v6416_v11  ;;  %1736 = vmatpush.msrb.mxu3 %v6428_v0  ;;  %v6434_v11 = vld [vmem:[%s7755_s4 + $0xf0] sm:$0xff] }
 0x3ae   :  { %9390 = vst [vmem:[#allocation32_spill] sm:$0xff] %v6422_v40  ;;  %1746 = vmatpush.msra.mxu0 %v6434_v11  ;;  %v6446_v40 = vld [vmem:[%s7753_s3 + $0x100] sm:$0xff] }
 0x3af   :  { %9391 = vst [vmem:[#allocation33_spill] sm:$0xff] %v6428_v0  ;;  %1697 = vmatpush.msrb.mxu1 %v6446_v40  ;;  %v6452_v0 = vld [vmem:[%s7753_s3 + $0x108] sm:$0xff] }
 0x3b0   :  { %9392 = vst [vmem:[#allocation35_spill] sm:$0xff] %v6434_v11  ;;  %1737 = vmatpush.msrb.mxu3 %v6452_v0  ;;  %1698 = vmatmul.f32.vlgmr.msrb.gmra.mxu1 %v6073_v37 }
 0x3b1   :  { %9393 = vst [vmem:[#allocation36_spill] sm:$0xff] %v6440_v36  ;;  %1738 = vmatmul.f32.vlgmr.msrb.gmra.mxu3 %v6073_v37  ;;  %v6460_v36 = vld [vmem:[%s7755_s4 + $0xe0] sm:$0xff]  ;;  %v6478_v37 = vld [vmem:[%s7755_s4 + $0x1f8] sm:$0xff]  ;;  %2506 = vset.pattern.permute.xlu2 %v9352_v20 }
 0x3b2   :  { %9394 = vst [vmem:[#allocation37_spill] sm:$0xff] %v6446_v40  ;;  %1747 = vmatpush.msra.mxu0 %v6460_v36  ;;  %v6466_v40 = vld [vmem:[%s7755_s4 + $0xe8] sm:$0xff]  ;;  %1806 = vmatpush.msra.mxu3 %v6478_v37 }
 0x3b3   :  { %9395 = vst [vmem:[#allocation34_spill] sm:$0xff] %v6452_v0  ;;  %1787 = vmatpush.msra.mxu2 %v6466_v40  ;;  %v6472_v0 = vld [vmem:[%s7755_s4 + $0x1f0] sm:$0xff] }
 0x3b4   :  { %9396 = vst [vmem:[#allocation39_spill] sm:$0xff] %v6460_v36  ;;  %1766 = vmatpush.msra.mxu1 %v6472_v0  ;;  %v6484_v36 = vld [vmem:[%s7755_s4 + $0xd0] sm:$0xff] }
 0x3b5   :  { %9397 = vst [vmem:[#allocation40_spill] sm:$0xff] %v6466_v40  ;;  %1748 = vmatpush.msra.mxu0 %v6484_v36  ;;  %v6490_v40 = vld [vmem:[%s7755_s4 + $0xd8] sm:$0xff] }
 0x3b6   :  { %9398 = vst [vmem:[#allocation41_spill] sm:$0xff] %v6472_v0  ;;  %1788 = vmatpush.msra.mxu2 %v6490_v40  ;;  %v6496_v0 = vld [vmem:[%s7755_s4 + $0x1e0] sm:$0xff] }
 0x3b7   :  { %9399 = vst [vmem:[#allocation38_spill] sm:$0xff] %v6478_v37  ;;  %1767 = vmatpush.msra.mxu1 %v6496_v0  ;;  %v6502_v37 = vld [vmem:[%s7755_s4 + $0x1e8] sm:$0xff] }
 0x3b8   :  { %9400 = vst [vmem:[#allocation43_spill] sm:$0xff] %v6484_v36  ;;  %1807 = vmatpush.msra.mxu3 %v6502_v37  ;;  %v6508_v36 = vld [vmem:[%s7755_s4 + $0xc0] sm:$0xff] }
 0x3b9   :  { %9401 = vst [vmem:[#allocation44_spill] sm:$0xff] %v6490_v40  ;;  %1749 = vmatpush.msra.mxu0 %v6508_v36  ;;  %v6514_v40 = vld [vmem:[%s7755_s4 + $0xc8] sm:$0xff] }
 0x3ba   :  { %9402 = vst [vmem:[#allocation42_spill] sm:$0xff] %v6496_v0  ;;  %1789 = vmatpush.msra.mxu2 %v6514_v40  ;;  %v6520_v0 = vld [vmem:[%s7755_s4 + $0x1d0] sm:$0xff] }
 0x3bb   :  { %9403 = vst [vmem:[#allocation45_spill] sm:$0xff] %v6502_v37  ;;  %1768 = vmatpush.msra.mxu1 %v6520_v0  ;;  %v6526_v37 = vld [vmem:[%s7755_s4 + $0x1d8] sm:$0xff] }
 0x3bc   :  { %9404 = vst [vmem:[#allocation46_spill] sm:$0xff] %v6508_v36  ;;  %1808 = vmatpush.msra.mxu3 %v6526_v37  ;;  %v6532_v36 = vld [vmem:[%s7755_s4 + $0xb0] sm:$0xff] }
 0x3bd   :  { %9405 = vst [vmem:[#allocation49_spill] sm:$0xff] %v6514_v40  ;;  %1750 = vmatpush.msra.mxu0 %v6532_v36  ;;  %v6538_v40 = vld [vmem:[%s7755_s4 + $0xb8] sm:$0xff] }
 0x3be   :  { %9406 = vst [vmem:[#allocation47_spill] sm:$0xff] %v6520_v0  ;;  %1790 = vmatpush.msra.mxu2 %v6538_v40  ;;  %v6544_v0 = vld [vmem:[%s7755_s4 + $0x1c0] sm:$0xff] }
 0x3bf   :  { %9407 = vst [vmem:[#allocation48_spill] sm:$0xff] %v6526_v37  ;;  %1769 = vmatpush.msra.mxu1 %v6544_v0  ;;  %v6550_v37 = vld [vmem:[%s7755_s4 + $0x1c8] sm:$0xff] }
 0x3c0   :  { %9408 = vst [vmem:[#allocation50_spill] sm:$0xff] %v6532_v36  ;;  %1809 = vmatpush.msra.mxu3 %v6550_v37  ;;  %v6556_v36 = vld [vmem:[%s7755_s4 + $0xa0] sm:$0xff] }
 0x3c1   :  { %9409 = vst [vmem:[#allocation53_spill] sm:$0xff] %v6538_v40  ;;  %1751 = vmatpush.msra.mxu0 %v6556_v36  ;;  %v6562_v40 = vld [vmem:[%s7755_s4 + $0xa8] sm:$0xff] }
 0x3c2   :  { %9410 = vst [vmem:[#allocation51_spill] sm:$0xff] %v6544_v0  ;;  %1791 = vmatpush.msra.mxu2 %v6562_v40  ;;  %v6568_v0 = vld [vmem:[%s7755_s4 + $0x1b0] sm:$0xff] }
 0x3c3   :  { %9411 = vst [vmem:[#allocation52_spill] sm:$0xff] %v6550_v37  ;;  %1770 = vmatpush.msra.mxu1 %v6568_v0  ;;  %v6574_v37 = vld [vmem:[%s7755_s4 + $0x1b8] sm:$0xff] }
 0x3c4   :  { %9412 = vst [vmem:[#allocation54_spill] sm:$0xff] %v6556_v36  ;;  %1810 = vmatpush.msra.mxu3 %v6574_v37  ;;  %v6580_v36 = vld [vmem:[%s7755_s4 + $0x90] sm:$0xff] }
 0x3c5   :  { %9413 = vst [vmem:[#allocation57_spill] sm:$0xff] %v6562_v40  ;;  %1752 = vmatpush.msra.mxu0 %v6580_v36  ;;  %v6586_v40 = vld [vmem:[%s7755_s4 + $0x98] sm:$0xff] }
 0x3c6   :  { %9414 = vst [vmem:[#allocation55_spill] sm:$0xff] %v6568_v0  ;;  %1792 = vmatpush.msra.mxu2 %v6586_v40  ;;  %v6592_v0 = vld [vmem:[%s7755_s4 + $0x1a0] sm:$0xff] }
 0x3c7   :  { %9415 = vst [vmem:[#allocation56_spill] sm:$0xff] %v6574_v37  ;;  %1771 = vmatpush.msra.mxu1 %v6592_v0  ;;  %v6598_v37 = vld [vmem:[%s7755_s4 + $0x1a8] sm:$0xff] }
 0x3c8   :  { %9416 = vst [vmem:[#allocation58_spill] sm:$0xff] %v6580_v36  ;;  %1811 = vmatpush.msra.mxu3 %v6598_v37  ;;  %v6604_v36 = vld [vmem:[%s7755_s4 + $0x80] sm:$0xff] }
 0x3c9   :  { %9417 = vst [vmem:[#allocation63_spill] sm:$0xff] %v6586_v40  ;;  %1753 = vmatpush.msra.mxu0 %v6604_v36  ;;  %v6610_v40 = vld [vmem:[%s7755_s4 + $0x88] sm:$0xff] }
 0x3ca   :  { %9418 = vst [vmem:[#allocation59_spill] sm:$0xff] %v6592_v0  ;;  %1793 = vmatpush.msra.mxu2 %v6610_v40  ;;  %v6616_v0 = vld [vmem:[%s7755_s4 + $0x190] sm:$0xff] }
 0x3cb   :  { %9419 = vst [vmem:[#allocation60_spill] sm:$0xff] %v6598_v37  ;;  %1772 = vmatpush.msra.mxu1 %v6616_v0  ;;  %v6622_v37 = vld [vmem:[%s7755_s4 + $0x198] sm:$0xff] }
 0x3cc   :  { %9420 = vst [vmem:[#allocation64_spill] sm:$0xff] %v6604_v36  ;;  %1812 = vmatpush.msra.mxu3 %v6622_v37  ;;  %v6628_v36 = vld [vmem:[%s7755_s4 + $0x70] sm:$0xff] }
 0x3cd   :  { %9421 = vst [vmem:[#allocation67_spill] sm:$0xff] %v6610_v40  ;;  %1754 = vmatpush.msra.mxu0 %v6628_v36  ;;  %v6634_v40 = vld [vmem:[%s7755_s4 + $0x78] sm:$0xff] }
 0x3ce   :  { %9422 = vst [vmem:[#allocation61_spill] sm:$0xff] %v6616_v0  ;;  %1794 = vmatpush.msra.mxu2 %v6634_v40  ;;  %v6640_v0 = vld [vmem:[%s7755_s4 + $0x180] sm:$0xff] }
 0x3cf   :  { %9423 = vst [vmem:[#allocation62_spill] sm:$0xff] %v6622_v37  ;;  %1773 = vmatpush.msra.mxu1 %v6640_v0  ;;  %v6646_v37 = vld [vmem:[%s7755_s4 + $0x188] sm:$0xff] }
 0x3d0   :  { %9424 = vst [vmem:[#allocation68_spill] sm:$0xff] %v6628_v36  ;;  %1813 = vmatpush.msra.mxu3 %v6646_v37  ;;  %v6652_v36 = vld [vmem:[%s7755_s4 + $0x60] sm:$0xff] }
 0x3d1   :  { %9425 = vst [vmem:[#allocation71_spill] sm:$0xff] %v6634_v40  ;;  %1755 = vmatpush.msra.mxu0 %v6652_v36  ;;  %v6658_v40 = vld [vmem:[%s7755_s4 + $0x68] sm:$0xff] }
 0x3d2   :  { %9426 = vst [vmem:[#allocation65_spill] sm:$0xff] %v6640_v0  ;;  %1795 = vmatpush.msra.mxu2 %v6658_v40  ;;  %v6664_v0 = vld [vmem:[%s7755_s4 + $0x170] sm:$0xff] }
 0x3d3   :  { %9427 = vst [vmem:[#allocation66_spill] sm:$0xff] %v6646_v37  ;;  %1774 = vmatpush.msra.mxu1 %v6664_v0  ;;  %v6670_v37 = vld [vmem:[%s7755_s4 + $0x178] sm:$0xff] }
 0x3d4   :  { %9428 = vst [vmem:[#allocation72_spill] sm:$0xff] %v6652_v36  ;;  %1814 = vmatpush.msra.mxu3 %v6670_v37  ;;  %v6676_v36 = vld [vmem:[%s7755_s4 + $0x50] sm:$0xff] }
 0x3d5   :  { %9429 = vst [vmem:[#allocation75_spill] sm:$0xff] %v6658_v40  ;;  %1756 = vmatpush.msra.mxu0 %v6676_v36  ;;  %v6682_v40 = vld [vmem:[%s7755_s4 + $0x58] sm:$0xff] }
 0x3d6   :  { %9430 = vst [vmem:[#allocation69_spill] sm:$0xff] %v6664_v0  ;;  %1796 = vmatpush.msra.mxu2 %v6682_v40  ;;  %v6688_v0 = vld [vmem:[%s7755_s4 + $0x160] sm:$0xff] }
 0x3d7   :  { %9431 = vst [vmem:[#allocation70_spill] sm:$0xff] %v6670_v37  ;;  %1775 = vmatpush.msra.mxu1 %v6688_v0  ;;  %v6694_v37 = vld [vmem:[%s7755_s4 + $0x168] sm:$0xff] }
 0x3d8   :  { %9432 = vst [vmem:[#allocation76_spill] sm:$0xff] %v6676_v36  ;;  %1815 = vmatpush.msra.mxu3 %v6694_v37  ;;  %v6700_v36 = vld [vmem:[%s7755_s4 + $0x40] sm:$0xff] }
 0x3d9   :  { %9433 = vst [vmem:[#allocation79_spill] sm:$0xff] %v6682_v40  ;;  %1757 = vmatpush.msra.mxu0 %v6700_v36  ;;  %v6706_v40 = vld [vmem:[%s7755_s4 + $0x48] sm:$0xff] }
 0x3da   :  { %9434 = vst [vmem:[#allocation73_spill] sm:$0xff] %v6688_v0  ;;  %1797 = vmatpush.msra.mxu2 %v6706_v40  ;;  %v6712_v0 = vld [vmem:[%s7755_s4 + $0x150] sm:$0xff] }
 0x3db   :  { %9435 = vst [vmem:[#allocation74_spill] sm:$0xff] %v6694_v37  ;;  %1776 = vmatpush.msra.mxu1 %v6712_v0  ;;  %v6718_v37 = vld [vmem:[%s7755_s4 + $0x158] sm:$0xff] }
 0x3dc   :  { %9436 = vst [vmem:[#allocation80_spill] sm:$0xff] %v6700_v36  ;;  %1816 = vmatpush.msra.mxu3 %v6718_v37  ;;  %v6724_v36 = vld [vmem:[%s7755_s4 + $0x30] sm:$0xff] }
 0x3dd   :  { %9437 = vst [vmem:[#allocation83_spill] sm:$0xff] %v6706_v40  ;;  %1758 = vmatpush.msra.mxu0 %v6724_v36  ;;  %v6730_v40 = vld [vmem:[%s7755_s4 + $0x38] sm:$0xff] }
 0x3de   :  { %9438 = vst [vmem:[#allocation77_spill] sm:$0xff] %v6712_v0  ;;  %1798 = vmatpush.msra.mxu2 %v6730_v40  ;;  %v6736_v0 = vld [vmem:[%s7755_s4 + $0x140] sm:$0xff] }
 0x3df   :  { %9439 = vst [vmem:[#allocation78_spill] sm:$0xff] %v6718_v37  ;;  %1777 = vmatpush.msra.mxu1 %v6736_v0  ;;  %v6742_v37 = vld [vmem:[%s7755_s4 + $0x148] sm:$0xff] }
 0x3e0   :  { %9440 = vst [vmem:[#allocation84_spill] sm:$0xff] %v6724_v36  ;;  %1817 = vmatpush.msra.mxu3 %v6742_v37  ;;  %v6748_v36 = vld [vmem:[%s7755_s4 + $0x20] sm:$0xff] }
 0x3e1   :  { %9441 = vst [vmem:[#allocation86_spill] sm:$0xff] %v6730_v40  ;;  %1759 = vmatpush.msra.mxu0 %v6748_v36  ;;  %v6754_v40 = vld [vmem:[%s7755_s4 + $0x28] sm:$0xff] }
 0x3e2   :  { %9442 = vst [vmem:[#allocation81_spill] sm:$0xff] %v6736_v0  ;;  %1799 = vmatpush.msra.mxu2 %v6754_v40  ;;  %v6760_v0 = vld [vmem:[%s7755_s4 + $0x130] sm:$0xff] }
 0x3e3   :  { %9443 = vst [vmem:[#allocation82_spill] sm:$0xff] %v6742_v37  ;;  %1778 = vmatpush.msra.mxu1 %v6760_v0  ;;  %v6766_v37 = vld [vmem:[%s7755_s4 + $0x138] sm:$0xff] }
 0x3e4   :  { %9444 = vst [vmem:[#allocation89_spill] sm:$0xff] %v6748_v36  ;;  %1818 = vmatpush.msra.mxu3 %v6766_v37  ;;  %v6772_v36 = vld [vmem:[%s7755_s4 + $0x10] sm:$0xff] }
 0x3e5   :  { %9445 = vst [vmem:[#allocation90_spill] sm:$0xff] %v6754_v40  ;;  %1760 = vmatpush.msra.mxu0 %v6772_v36  ;;  %v6778_v40 = vld [vmem:[%s7755_s4 + $0x18] sm:$0xff] }
 0x3e6   :  { %9446 = vst [vmem:[#allocation85_spill] sm:$0xff] %v6760_v0  ;;  %1800 = vmatpush.msra.mxu2 %v6778_v40  ;;  %v6784_v0 = vld [vmem:[%s7755_s4 + $0x120] sm:$0xff] }
 0x3e7   :  { %9447 = vst [vmem:[#allocation87_spill] sm:$0xff] %v6766_v37  ;;  %1779 = vmatpush.msra.mxu1 %v6784_v0  ;;  %v6790_v37 = vld [vmem:[%s7755_s4 + $0x128] sm:$0xff] }
 0x3e8   :  { %9448 = vst [vmem:[#allocation94_spill] sm:$0xff] %v6772_v36  ;;  %1819 = vmatpush.msra.mxu3 %v6790_v37  ;;  %v6796_v36 = vld [vmem:[%s7755_s4] sm:$0xff] }
 0x3e9   :  { %9449 = vst [vmem:[#allocation98_spill] sm:$0xff] %v6778_v40  ;;  %1761 = vmatpush.msra.mxu0 %v6796_v36  ;;  %v6802_v40 = vld [vmem:[%s7755_s4 + $0x8] sm:$0xff] }
 0x3ea   :  { %9450 = vst [vmem:[#allocation88_spill] sm:$0xff] %v6784_v0  ;;  %1801 = vmatpush.msra.mxu2 %v6802_v40  ;;  %v6808_v0 = vld [vmem:[%s7756_s5 + $0xf0] sm:$0xff] }
 0x3eb   :  { %9451 = vst [vmem:[#allocation93_spill] sm:$0xff] %v6790_v37  ;;  %1826 = vmatpush.msrb.mxu0 %v6808_v0  ;;  %v6814_v37 = vld [vmem:[%s7756_s5 + $0xf8] sm:$0xff] }
 0x3ec   :  { %9452 = vst [vmem:[#allocation92_spill] sm:$0xff] %v6796_v36  ;;  %1866 = vmatpush.msrb.mxu2 %v6814_v37  ;;  %v6820_v36 = vld [vmem:[%s7755_s4 + $0x110] sm:$0xff] }
 0x3ed   :  { %9453 = vst [vmem:[#allocation95_spill] sm:$0xff] %v6802_v40  ;;  %1780 = vmatpush.msra.mxu1 %v6820_v36  ;;  %v6826_v40 = vld [vmem:[%s7755_s4 + $0x118] sm:$0xff] }
 0x3ee   :  { %9454 = vst [vmem:[#allocation91_spill] sm:$0xff] %v6808_v0  ;;  %1820 = vmatpush.msra.mxu3 %v6826_v40  ;;  %v6832_v0 = vld [vmem:[%s7756_s5 + $0xe0] sm:$0xff] }
 0x3ef   :  { %9455 = vst [vmem:[#allocation102_spill] sm:$0xff] %v6814_v37  ;;  %1827 = vmatpush.msrb.mxu0 %v6832_v0  ;;  %v6838_v37 = vld [vmem:[%s7756_s5 + $0xe8] sm:$0xff] }
 0x3f0   :  { %9456 = vst [vmem:[#allocation96_spill] sm:$0xff] %v6820_v36  ;;  %1867 = vmatpush.msrb.mxu2 %v6838_v37  ;;  %v6844_v36 = vld [vmem:[%s7755_s4 + $0x100] sm:$0xff] }
 0x3f1   :  { %9457 = vst [vmem:[#allocation97_spill] sm:$0xff] %v6826_v40  ;;  %1781 = vmatpush.msra.mxu1 %v6844_v36  ;;  %v6850_v40 = vld [vmem:[%s7755_s4 + $0x108] sm:$0xff] }
 0x3f2   :  { %9458 = vst [vmem:[#allocation99_spill] sm:$0xff] %v6832_v0  ;;  %1821 = vmatpush.msra.mxu3 %v6850_v40  ;;  %v6856_v0 = vld [vmem:[%s7756_s5 + $0xd0] sm:$0xff] }
 0x3f3   :  { %9459 = vst [vmem:[#allocation106_spill] sm:$0xff] %v6838_v37  ;;  %1828 = vmatpush.msrb.mxu0 %v6856_v0  ;;  %v6862_v37 = vld [vmem:[%s7756_s5 + $0xd8] sm:$0xff] }
 0x3f4   :  { %9460 = vst [vmem:[#allocation100_spill] sm:$0xff] %v6844_v36  ;;  %1868 = vmatpush.msrb.mxu2 %v6862_v37  ;;  %v6868_v36 = vld [vmem:[%s7756_s5 + $0x1f0] sm:$0xff] }
 0x3f5   :  { %9461 = vst [vmem:[#allocation101_spill] sm:$0xff] %v6850_v40  ;;  %1846 = vmatpush.msrb.mxu1 %v6868_v36  ;;  %v6874_v40 = vld [vmem:[%s7756_s5 + $0x1f8] sm:$0xff] }
 0x3f6   :  { %9462 = vst [vmem:[#allocation103_spill] sm:$0xff] %v6856_v0  ;;  %1886 = vmatpush.msrb.mxu3 %v6874_v40  ;;  %v6880_v0 = vld [vmem:[%s7756_s5 + $0xc0] sm:$0xff] }
 0x3f7   :  { %9463 = vst [vmem:[#allocation108_spill] sm:$0xff] %v6862_v37  ;;  %1829 = vmatpush.msrb.mxu0 %v6880_v0  ;;  %v6886_v37 = vld [vmem:[%s7756_s5 + $0xc8] sm:$0xff] }
 0x3f8   :  { %9464 = vst [vmem:[#allocation104_spill] sm:$0xff] %v6868_v36  ;;  %1869 = vmatpush.msrb.mxu2 %v6886_v37  ;;  %v6892_v36 = vld [vmem:[%s7756_s5 + $0x1e0] sm:$0xff] }
 0x3f9   :  { %9465 = vst [vmem:[#allocation105_spill] sm:$0xff] %v6874_v40  ;;  %1847 = vmatpush.msrb.mxu1 %v6892_v36  ;;  %v6898_v40 = vld [vmem:[%s7756_s5 + $0x1e8] sm:$0xff] }
 0x3fa   :  { %9466 = vst [vmem:[#allocation107_spill] sm:$0xff] %v6880_v0  ;;  %1887 = vmatpush.msrb.mxu3 %v6898_v40  ;;  %v6904_v0 = vld [vmem:[%s7756_s5 + $0xb0] sm:$0xff] }
 0x3fb   :  { %9467 = vst [vmem:[#allocation112_spill] sm:$0xff] %v6886_v37  ;;  %1830 = vmatpush.msrb.mxu0 %v6904_v0  ;;  %v6910_v37 = vld [vmem:[%s7756_s5 + $0xb8] sm:$0xff] }
 0x3fc   :  { %9468 = vst [vmem:[#allocation110_spill] sm:$0xff] %v6892_v36  ;;  %1870 = vmatpush.msrb.mxu2 %v6910_v37  ;;  %v6916_v36 = vld [vmem:[%s7756_s5 + $0x1d0] sm:$0xff] }
 0x3fd   :  { %9469 = vst [vmem:[#allocation109_spill] sm:$0xff] %v6898_v40  ;;  %1848 = vmatpush.msrb.mxu1 %v6916_v36  ;;  %v6922_v40 = vld [vmem:[%s7756_s5 + $0x1d8] sm:$0xff] }
 0x3fe   :  { %9470 = vst [vmem:[#allocation111_spill] sm:$0xff] %v6904_v0  ;;  %1888 = vmatpush.msrb.mxu3 %v6922_v40  ;;  %v6928_v0 = vld [vmem:[%s7756_s5 + $0xa0] sm:$0xff] }
 0x3ff   :  { %9471 = vst [vmem:[#allocation116_spill] sm:$0xff] %v6910_v37  ;;  %1831 = vmatpush.msrb.mxu0 %v6928_v0  ;;  %v6934_v37 = vld [vmem:[%s7756_s5 + $0xa8] sm:$0xff] }
 0x400   :  { %9472 = vst [vmem:[#allocation114_spill] sm:$0xff] %v6916_v36  ;;  %1871 = vmatpush.msrb.mxu2 %v6934_v37  ;;  %v6940_v36 = vld [vmem:[%s7756_s5 + $0x1c0] sm:$0xff] }
 0x401   :  { %9473 = vst [vmem:[#allocation113_spill] sm:$0xff] %v6922_v40  ;;  %1849 = vmatpush.msrb.mxu1 %v6940_v36  ;;  %v6946_v40 = vld [vmem:[%s7756_s5 + $0x1c8] sm:$0xff] }
 0x402   :  { %9474 = vst [vmem:[#allocation115_spill] sm:$0xff] %v6928_v0  ;;  %1889 = vmatpush.msrb.mxu3 %v6946_v40  ;;  %v6952_v0 = vld [vmem:[%s7756_s5 + $0x90] sm:$0xff] }
 0x403   :  { %9475 = vst [vmem:[#allocation120_spill] sm:$0xff] %v6934_v37  ;;  %1832 = vmatpush.msrb.mxu0 %v6952_v0  ;;  %v6958_v37 = vld [vmem:[%s7756_s5 + $0x98] sm:$0xff] }
 0x404   :  { %9476 = vst [vmem:[#allocation118_spill] sm:$0xff] %v6940_v36  ;;  %1872 = vmatpush.msrb.mxu2 %v6958_v37  ;;  %v6964_v36 = vld [vmem:[%s7756_s5 + $0x1b0] sm:$0xff] }
 0x405   :  { %9477 = vst [vmem:[#allocation117_spill] sm:$0xff] %v6946_v40  ;;  %1850 = vmatpush.msrb.mxu1 %v6964_v36  ;;  %v6970_v40 = vld [vmem:[%s7756_s5 + $0x1b8] sm:$0xff] }
 0x406   :  { %9478 = vst [vmem:[#allocation119_spill] sm:$0xff] %v6952_v0  ;;  %1890 = vmatpush.msrb.mxu3 %v6970_v40  ;;  %v6976_v0 = vld [vmem:[%s7756_s5 + $0x80] sm:$0xff] }
 0x407   :  { %9479 = vst [vmem:[#allocation124_spill] sm:$0xff] %v6958_v37  ;;  %1833 = vmatpush.msrb.mxu0 %v6976_v0  ;;  %v6982_v37 = vld [vmem:[%s7756_s5 + $0x88] sm:$0xff] }
 0x408   :  { %9480 = vst [vmem:[#allocation122_spill] sm:$0xff] %v6964_v36  ;;  %1873 = vmatpush.msrb.mxu2 %v6982_v37  ;;  %v6988_v36 = vld [vmem:[%s7756_s5 + $0x1a0] sm:$0xff] }
 0x409   :  { %9481 = vst [vmem:[#allocation121_spill] sm:$0xff] %v6970_v40  ;;  %1851 = vmatpush.msrb.mxu1 %v6988_v36  ;;  %v6994_v40 = vld [vmem:[%s7756_s5 + $0x1a8] sm:$0xff] }
 0x40a   :  { %9482 = vst [vmem:[#allocation123_spill] sm:$0xff] %v6976_v0  ;;  %1891 = vmatpush.msrb.mxu3 %v6994_v40  ;;  %v7000_v0 = vld [vmem:[%s7756_s5 + $0x70] sm:$0xff] }
 0x40b   :  { %9483 = vst [vmem:[#allocation128_spill] sm:$0xff] %v6982_v37  ;;  %1834 = vmatpush.msrb.mxu0 %v7000_v0  ;;  %v7006_v37 = vld [vmem:[%s7756_s5 + $0x78] sm:$0xff] }
 0x40c   :  { %9484 = vst [vmem:[#allocation126_spill] sm:$0xff] %v6988_v36  ;;  %1874 = vmatpush.msrb.mxu2 %v7006_v37  ;;  %v7012_v36 = vld [vmem:[%s7756_s5 + $0x190] sm:$0xff] }
 0x40d   :  { %9485 = vst [vmem:[#allocation125_spill] sm:$0xff] %v6994_v40  ;;  %1852 = vmatpush.msrb.mxu1 %v7012_v36  ;;  %v7018_v40 = vld [vmem:[%s7756_s5 + $0x198] sm:$0xff] }
 0x40e   :  { %9486 = vst [vmem:[#allocation127_spill] sm:$0xff] %v7000_v0  ;;  %1892 = vmatpush.msrb.mxu3 %v7018_v40  ;;  %v7024_v0 = vld [vmem:[%s7756_s5 + $0x60] sm:$0xff] }
 0x40f   :  { %9487 = vst [vmem:[#allocation132_spill] sm:$0xff] %v7006_v37  ;;  %1835 = vmatpush.msrb.mxu0 %v7024_v0  ;;  %v7030_v37 = vld [vmem:[%s7756_s5 + $0x68] sm:$0xff] }
 0x410   :  { %9488 = vst [vmem:[#allocation130_spill] sm:$0xff] %v7012_v36  ;;  %1875 = vmatpush.msrb.mxu2 %v7030_v37  ;;  %v7036_v36 = vld [vmem:[%s7756_s5 + $0x180] sm:$0xff] }
 0x411   :  { %9489 = vst [vmem:[#allocation129_spill] sm:$0xff] %v7018_v40  ;;  %1853 = vmatpush.msrb.mxu1 %v7036_v36  ;;  %v7042_v40 = vld [vmem:[%s7756_s5 + $0x188] sm:$0xff] }
 0x412   :  { %9490 = vst [vmem:[#allocation131_spill] sm:$0xff] %v7024_v0  ;;  %1893 = vmatpush.msrb.mxu3 %v7042_v40  ;;  %v7048_v0 = vld [vmem:[%s7756_s5 + $0x50] sm:$0xff] }
 0x413   :  { %9491 = vst [vmem:[#allocation136_spill] sm:$0xff] %v7030_v37  ;;  %1836 = vmatpush.msrb.mxu0 %v7048_v0  ;;  %v7054_v37 = vld [vmem:[%s7756_s5 + $0x58] sm:$0xff] }
 0x414   :  { %9492 = vst [vmem:[#allocation134_spill] sm:$0xff] %v7036_v36  ;;  %1876 = vmatpush.msrb.mxu2 %v7054_v37  ;;  %v7060_v36 = vld [vmem:[%s7756_s5 + $0x170] sm:$0xff] }
 0x415   :  { %9493 = vst [vmem:[#allocation133_spill] sm:$0xff] %v7042_v40  ;;  %1854 = vmatpush.msrb.mxu1 %v7060_v36  ;;  %v7066_v40 = vld [vmem:[%s7756_s5 + $0x178] sm:$0xff] }
 0x416   :  { %9494 = vst [vmem:[#allocation135_spill] sm:$0xff] %v7048_v0  ;;  %1894 = vmatpush.msrb.mxu3 %v7066_v40  ;;  %v7072_v0 = vld [vmem:[%s7756_s5 + $0x40] sm:$0xff] }
 0x417   :  { %9495 = vst [vmem:[#allocation140_spill] sm:$0xff] %v7054_v37  ;;  %1837 = vmatpush.msrb.mxu0 %v7072_v0  ;;  %v7078_v37 = vld [vmem:[%s7756_s5 + $0x48] sm:$0xff] }
 0x418   :  { %9496 = vst [vmem:[#allocation138_spill] sm:$0xff] %v7060_v36  ;;  %1877 = vmatpush.msrb.mxu2 %v7078_v37  ;;  %v7084_v36 = vld [vmem:[%s7756_s5 + $0x160] sm:$0xff] }
 0x419   :  { %9497 = vst [vmem:[#allocation137_spill] sm:$0xff] %v7066_v40  ;;  %1855 = vmatpush.msrb.mxu1 %v7084_v36  ;;  %v7090_v40 = vld [vmem:[%s7756_s5 + $0x168] sm:$0xff] }
 0x41a   :  { %9498 = vst [vmem:[#allocation139_spill] sm:$0xff] %v7072_v0  ;;  %1895 = vmatpush.msrb.mxu3 %v7090_v40  ;;  %v7096_v0 = vld [vmem:[%s7756_s5 + $0x30] sm:$0xff] }
 0x41b   :  { %9499 = vst [vmem:[#allocation144_spill] sm:$0xff] %v7078_v37  ;;  %1838 = vmatpush.msrb.mxu0 %v7096_v0  ;;  %v7102_v37 = vld [vmem:[%s7756_s5 + $0x38] sm:$0xff] }
 0x41c   :  { %9500 = vst [vmem:[#allocation142_spill] sm:$0xff] %v7084_v36  ;;  %1878 = vmatpush.msrb.mxu2 %v7102_v37  ;;  %v7108_v36 = vld [vmem:[%s7756_s5 + $0x150] sm:$0xff] }
 0x41d   :  { %9501 = vst [vmem:[#allocation141_spill] sm:$0xff] %v7090_v40  ;;  %1856 = vmatpush.msrb.mxu1 %v7108_v36  ;;  %v7114_v40 = vld [vmem:[%s7756_s5 + $0x158] sm:$0xff] }
 0x41e   :  { %9502 = vst [vmem:[#allocation143_spill] sm:$0xff] %v7096_v0  ;;  %1896 = vmatpush.msrb.mxu3 %v7114_v40  ;;  %v7120_v0 = vld [vmem:[%s7756_s5 + $0x20] sm:$0xff] }
 0x41f   :  { %9503 = vst [vmem:[#allocation147_spill] sm:$0xff] %v7102_v37  ;;  %1839 = vmatpush.msrb.mxu0 %v7120_v0  ;;  %v7126_v37 = vld [vmem:[%s7756_s5 + $0x28] sm:$0xff] }
 0x420   :  { %9504 = vst [vmem:[#allocation146_spill] sm:$0xff] %v7108_v36  ;;  %1879 = vmatpush.msrb.mxu2 %v7126_v37  ;;  %v7132_v36 = vld [vmem:[%s7756_s5 + $0x140] sm:$0xff] }
 0x421   :  { %9505 = vst [vmem:[#allocation145_spill] sm:$0xff] %v7114_v40  ;;  %1857 = vmatpush.msrb.mxu1 %v7132_v36  ;;  %v7138_v40 = vld [vmem:[%s7756_s5 + $0x148] sm:$0xff] }
 0x422   :  { %9506 = vst [vmem:[#allocation149_spill] sm:$0xff] %v7120_v0  ;;  %1897 = vmatpush.msrb.mxu3 %v7138_v40  ;;  %v7144_v0 = vld [vmem:[%s7756_s5 + $0x10] sm:$0xff] }
 0x423   :  { %9507 = vst [vmem:[#allocation151_spill] sm:$0xff] %v7126_v37  ;;  %1840 = vmatpush.msrb.mxu0 %v7144_v0  ;;  %v7150_v37 = vld [vmem:[%s7756_s5 + $0x18] sm:$0xff]  ;;  %1858 = vmatpush.msrb.mxu1 %v9346_v26  ;;  %v1513_v26 = vpop.f32.mrf.mxu0 }
 0x424   :  { %9508 = vst [vmem:[#allocation148_spill] sm:$0xff] %v7132_v36  ;;  %1880 = vmatpush.msrb.mxu2 %v7150_v37  ;;  %1898 = vmatpush.msrb.mxu3 %v9349_v34  ;;  %v1533_v34 = vpop.f32.mrf.mxu1 }
 0x425   :  { %9509 = vst [vmem:[#allocation150_spill] sm:$0xff] %v7138_v40  ;;  %1841 = vmatpush.msrb.mxu0 %v9348_v32  ;;  %1859 = vmatpush.msrb.mxu1 %v9350_v31  ;;  %v1553_v40 = vpop.f32.mrf.mxu2  ;;  %v1573_v32 = vpop.f32.mrf.mxu3 }
 0x426   :  { %9510 = vst [vmem:[#allocation155_spill] sm:$0xff] %v7144_v0  ;;  %1881 = vmatpush.msrb.mxu2 %v9351_v30  ;;  %1899 = vmatpush.msrb.mxu3 %v9353_v28  ;;  %v126_v30 = vpop.permute.xlu1 %125 }
 0x427   :  { %9511 = vst [vmem:[#allocation157_spill] sm:$0xff] %v7150_v37  ;;  %1860 = vmatpush.msrb.mxu1 %v9354_v5  ;;  %v69_v37 = vpop.permute.xlu2 %68  ;;  %v152_v20 = vmul.f32 %v9359_v8, %v126_v30 }
 0x428   :  { %1900 = vmatpush.msrb.mxu3 %v9356_v53  ;;  %v98_v28 = vmul.f32 %v9360_v16, %v69_v37  ;;  %v99_v53 = vmul.f32 %v4185_v44, %v69_v37 }
 0x429   :  { %1861 = vmatpush.msrb.mxu1 %v9357_v33  ;;  %v153_v33 = vmul.f32 %v4187_v57, %v126_v30 }
 0x42a   :  { %1901 = vmatpush.msrb.mxu3 %v9358_v25  ;;  %v168_v0 = vadd.f32 %v152_v20, %v98_v28  ;;  %v1534_v25 = vadd.f32 %v1533_v34, %v1513_v26  ;;  %v1574_v28 = vadd.f32 %v1573_v32, %v1553_v40  ;;  %v9520_v40 = vld [vmem:[#allocation17_spill] sm:$0xff]  ;;  %v9522_v32 = vld [vmem:[#allocation19_spill] sm:$0xff] }
 0x42b   :  { %v1593_v36 = vpop.f32.mrf.mxu0  ;;  %v169_v62 = vadd.f32 %v153_v33, %v99_v53  ;;  %v9525_v53 = vld [vmem:[#allocation10_spill] sm:$0xff]  ;;  %v9526_v33 = vld [vmem:[#allocation23_spill] sm:$0xff] }
 0x42c   :  { %v1613_v31 = vpop.f32.mrf.mxu1  ;;  %v190_v48 = vadd.f32 %v4189_v3, %v168_v0  ;;  %v1594_v54 = vadd.f32 %v1593_v36, %v1534_v25  ;;  %v9517_v0 = vld [vmem:[#allocation5_spill] sm:$0xff]  ;;  %v9521_v36 = vld [vmem:[#allocation7_spill] sm:$0xff]  ;;  %v9527_v25 = vld [vmem:[#allocation12_spill] sm:$0xff] }
 0x42d   :  { %v1633_v5 = vpop.f32.mrf.mxu2  ;;  %v1653_v11 = vpop.f32.mrf.mxu3  ;;  %v191_v20 = vadd.f32 %v4194_v51, %v169_v62  ;;  %v9514_v62 = vld [vmem:[#allocation11_spill] sm:$0xff] }
 0x42e   :  { %v1614_v16 = vadd.f32 %v1613_v31, %v1594_v54  ;;  %v1634_v34 = vadd.f32 %v1633_v5, %v1574_v28  ;;  %v9512_v54 = vld [vmem:[#allocation9_spill] sm:$0xff]  ;;  %v9523_v31 = vld [vmem:[#allocation8_spill] sm:$0xff]  ;;  %v9528_v28 = vld [vmem:[#allocation14_spill] sm:$0xff] }
 0x42f   :  { %v9524_v5 = vld [vmem:[#allocation21_spill] sm:$0xff] }
 0x430   :  { %v1656_v30 = vadd.f32 %v1614_v16, %v4422_v1 }
 0x433   :  { %v1679_v6 = vpop.f32.mrf.mxu0 }
 0x434   :  { %v1699_v38 = vpop.f32.mrf.mxu1 }
 0x435   :  { %v1700_v46 = vadd.f32 %v1699_v38, %v1679_v6  ;;  %v1719_v61 = vpop.f32.mrf.mxu2  ;;  %v1739_v8 = vpop.f32.mrf.mxu3  ;;  %v9516_v38 = vld [vmem:[#allocation13_spill] sm:$0xff]  ;;  %v9519_v6 = vld [vmem:[#allocation6_spill] sm:$0xff] }
 0x436   :  { %v1740_v60 = vadd.f32 %v1739_v8, %v1719_v61 }
 0x437   :  { %v1742_v50 = vadd.f32 %v1700_v46, %v190_v48  ;;  %v1654_v46 = vadd.f32 %v1653_v11, %v1634_v34  ;;  %v9515_v48 = vld [vmem:[#allocation4_spill] sm:$0xff]  ;;  %v9518_v11 = vld [vmem:[#allocation15_spill] sm:$0xff] }
 0x438   :  { %v1743_v37 = vadd.f32 %v1740_v60, %v191_v20  ;;  %v9529_v20 = vld [vmem:[#allocation16_spill] sm:$0xff] }
 0x439   :  { %2544 = vtanh.f32 %v1742_v50  ;;  %v1657_v16 = vadd.f32 %v1654_v46, %v4430_v13  ;;  %v9513_v50 = vld [vmem:[#allocation3_spill] sm:$0xff]  ;;  %v9532_v34 = vld [vmem:[#allocation20_spill] sm:$0xff]  ;;  %v9533_v46 = vld [vmem:[#allocation26_spill] sm:$0xff] }
 0x43a   :  { %2546 = vtanh.f32 %v1743_v37  ;;  %v9530_v37 = vld [vmem:[#allocation25_spill] sm:$0xff] }
 0x43b   :  { %2548 = vtanh.f32 %v1656_v30  ;;  %v9531_v30 = vld [vmem:[#allocation18_spill] sm:$0xff] }
 0x43c   :  { %2550 = vtanh.f32 %v1657_v16  ;;  %v9534_v16 = vld [vmem:[#allocation22_spill] sm:$0xff] }
 0x43f   :  { %v7171_v26 = vpop.eup %2544 }
 0x440   :  { %1762 = vmatmul.f32.vlgmr.msra.gmra.mxu0 %v7171_v26  ;;  %1802 = vmatmul.f32.vlgmr.msra.gmra.mxu2 %v7171_v26  ;;  %v7179_v8 = vpop.eup %2546 }
 0x441   :  { %1912 = vmatpush.msra.mxu0 %v6052_v2  ;;  %1952 = vmatpush.msra.mxu2 %v6058_v4  ;;  %v2549_v60 = vpop.eup %2548 }
 0x442   :  { %1782 = vmatmul.f32.vlgmr.msra.gmra.mxu1 %v7179_v8  ;;  %1822 = vmatmul.f32.vlgmr.msra.gmra.mxu3 %v7179_v8  ;;  %v2551_v61 = vpop.eup %2550 }
 0x443   :  { %1913 = vmatpush.msra.mxu0 %v6064_v9  ;;  %1953 = vmatpush.msra.mxu2 %v6070_v12 }
 0x444   :  { %1932 = vmatpush.msra.mxu1 %v6099_v29  ;;  %1972 = vmatpush.msra.mxu3 %v6111_v49 }
 0x445   :  { %1914 = vmatpush.msra.mxu0 %v6079_v19  ;;  %1954 = vmatpush.msra.mxu2 %v6085_v21 }
 0x446   :  { %1933 = vmatpush.msra.mxu1 %v6123_v27  ;;  %1973 = vmatpush.msra.mxu3 %v6135_v7 }
 0x447   :  { %1915 = vmatpush.msra.mxu0 %v6093_v14  ;;  %1955 = vmatpush.msra.mxu2 %v6105_v35 }
 0x448   :  { %1842 = vmatmul.f32.vlgmr.msrb.gmra.mxu0 %v2549_v60  ;;  %1882 = vmatmul.f32.vlgmr.msrb.gmra.mxu2 %v2549_v60  ;;  %v9535_v60 = vld [vmem:[#allocation24_spill] sm:$0xff] }
 0x449   :  { %1916 = vmatpush.msra.mxu0 %v6117_v10  ;;  %1956 = vmatpush.msra.mxu2 %v6129_v63 }
 0x44a   :  { %1934 = vmatpush.msra.mxu1 %v6147_v17  ;;  %1974 = vmatpush.msra.mxu3 %v6159_v22 }
 0x44b   :  { %1917 = vmatpush.msra.mxu0 %v6141_v15  ;;  %1957 = vmatpush.msra.mxu2 %v6153_v18 }
 0x44c   :  { %1935 = vmatpush.msra.mxu1 %v6171_v24  ;;  %1975 = vmatpush.msra.mxu3 %v6183_v41 }
 0x44d   :  { %1918 = vmatpush.msra.mxu0 %v6165_v23  ;;  %1958 = vmatpush.msra.mxu2 %v6177_v39 }
 0x44e   :  { %1862 = vmatmul.f32.vlgmr.msrb.gmra.mxu1 %v2551_v61  ;;  %1902 = vmatmul.f32.vlgmr.msrb.gmra.mxu3 %v2551_v61  ;;  %v9536_v61 = vld [vmem:[#allocation28_spill] sm:$0xff] }
 0x44f   :  { %1919 = vmatpush.msra.mxu0 %v6189_v42  ;;  %1936 = vmatpush.msra.mxu1 %v6195_v43 }
 0x450   :  { %1959 = vmatpush.msra.mxu2 %v6201_v45  ;;  %1976 = vmatpush.msra.mxu3 %v6207_v47 }
 0x451   :  { %1920 = vmatpush.msra.mxu0 %v6213_v52  ;;  %1937 = vmatpush.msra.mxu1 %v6219_v55 }
 0x452   :  { %1960 = vmatpush.msra.mxu2 %v6225_v56  ;;  %1977 = vmatpush.msra.mxu3 %v6231_v58 }
 0x453   :  { %1921 = vmatpush.msra.mxu0 %v6237_v59  ;;  %1938 = vmatpush.msra.mxu1 %v9512_v54 }
 0x454   :  { %1961 = vmatpush.msra.mxu2 %v9513_v50  ;;  %1978 = vmatpush.msra.mxu3 %v9514_v62 }
 0x455   :  { %1922 = vmatpush.msra.mxu0 %v9515_v48  ;;  %1939 = vmatpush.msra.mxu1 %v9516_v38 }
 0x456   :  { %1962 = vmatpush.msra.mxu2 %v9517_v0  ;;  %1979 = vmatpush.msra.mxu3 %v9518_v11 }
 0x457   :  { %1923 = vmatpush.msra.mxu0 %v9519_v6  ;;  %1940 = vmatpush.msra.mxu1 %v9520_v40 }
 0x458   :  { %1963 = vmatpush.msra.mxu2 %v9521_v36  ;;  %1980 = vmatpush.msra.mxu3 %v9522_v32 }
 0x459   :  { %1924 = vmatpush.msra.mxu0 %v9523_v31  ;;  %1941 = vmatpush.msra.mxu1 %v9524_v5 }
 0x45a   :  { %1964 = vmatpush.msra.mxu2 %v9525_v53  ;;  %1981 = vmatpush.msra.mxu3 %v9526_v33  ;;  %v9537_v33 = vld [vmem:[#allocation29_spill] sm:$0xff] }
 0x45b   :  { %1925 = vmatpush.msra.mxu0 %v9527_v25  ;;  %1942 = vmatpush.msra.mxu1 %v9528_v28  ;;  %v9538_v25 = vld [vmem:[#allocation27_spill] sm:$0xff]  ;;  %v9674_v28 = vld [vmem:[#allocation154_spill] sm:$0xff] }
 0x45c   :  { %1965 = vmatpush.msra.mxu2 %v9529_v20  ;;  %1982 = vmatpush.msra.mxu3 %v9530_v37  ;;  %v9539_v37 = vld [vmem:[#allocation31_spill] sm:$0xff]  ;;  %v9548_v20 = vld [vmem:[#allocation34_spill] sm:$0xff] }
 0x45d   :  { %1926 = vmatpush.msra.mxu0 %v9531_v30  ;;  %1943 = vmatpush.msra.mxu1 %v9532_v34  ;;  %v9540_v30 = vld [vmem:[#allocation30_spill] sm:$0xff]  ;;  %v9541_v34 = vld [vmem:[#allocation35_spill] sm:$0xff] }
 0x45e   :  { %1966 = vmatpush.msra.mxu2 %v9533_v46  ;;  %1983 = vmatpush.msra.mxu3 %v9534_v16  ;;  %v9542_v46 = vld [vmem:[#allocation36_spill] sm:$0xff] }
 0x45f   :  { %1927 = vmatpush.msra.mxu0 %v9535_v60  ;;  %1944 = vmatpush.msra.mxu1 %v9536_v61  ;;  %v9543_v16 = vld [vmem:[#allocation32_spill] sm:$0xff]  ;;  %v9544_v60 = vld [vmem:[#allocation33_spill] sm:$0xff]  ;;  %v9545_v61 = vld [vmem:[#allocation39_spill] sm:$0xff] }
 0x460   :  { %1967 = vmatpush.msra.mxu2 %v9537_v33  ;;  %1984 = vmatpush.msra.mxu3 %v9538_v25  ;;  %v9546_v33 = vld [vmem:[#allocation40_spill] sm:$0xff]  ;;  %v9547_v25 = vld [vmem:[#allocation37_spill] sm:$0xff] }
 0x461   :  { %1928 = vmatmul.f32.vlgmr.msra.gmra.mxu0 %v7171_v26  ;;  %1968 = vmatmul.f32.vlgmr.msra.gmra.mxu2 %v7171_v26  ;;  %v9549_v26 = vld [vmem:[#allocation43_spill] sm:$0xff] }
 0x462   :  { %1945 = vmatpush.msra.mxu1 %v9539_v37  ;;  %1985 = vmatpush.msra.mxu3 %v9540_v30  ;;  %v9558_v30 = vld [vmem:[#allocation53_spill] sm:$0xff] }
 0x463   :  { %1996 = vmatpush.msrb.mxu0 %v9541_v34  ;;  %2036 = vmatpush.msrb.mxu2 %v9542_v46  ;;  %v9550_v34 = vld [vmem:[#allocation44_spill] sm:$0xff]  ;;  %v9551_v46 = vld [vmem:[#allocation41_spill] sm:$0xff] }
 0x464   :  { %1946 = vmatpush.msra.mxu1 %v9543_v16  ;;  %1986 = vmatpush.msra.mxu3 %v9544_v60  ;;  %v9552_v16 = vld [vmem:[#allocation38_spill] sm:$0xff] }
 0x465   :  { %1997 = vmatpush.msrb.mxu0 %v9545_v61  ;;  %2037 = vmatpush.msrb.mxu2 %v9546_v33  ;;  %v9553_v60 = vld [vmem:[#allocation46_spill] sm:$0xff]  ;;  %v9554_v61 = vld [vmem:[#allocation49_spill] sm:$0xff] }
 0x466   :  { %1947 = vmatpush.msra.mxu1 %v9547_v25  ;;  %1987 = vmatpush.msra.mxu3 %v9548_v20  ;;  %v9555_v33 = vld [vmem:[#allocation42_spill] sm:$0xff]  ;;  %v9556_v25 = vld [vmem:[#allocation45_spill] sm:$0xff] }
 0x467   :  { %1948 = vmatmul.f32.vlgmr.msra.gmra.mxu1 %v7179_v8  ;;  %1988 = vmatmul.f32.vlgmr.msra.gmra.mxu3 %v7179_v8  ;;  %v9557_v20 = vld [vmem:[#allocation50_spill] sm:$0xff]  ;;  %v9559_v8 = vld [vmem:[#allocation47_spill] sm:$0xff] }
 0x468   :  { %1998 = vmatpush.msrb.mxu0 %v9549_v26  ;;  %2038 = vmatpush.msrb.mxu2 %v9550_v34  ;;  %v9560_v26 = vld [vmem:[#allocation48_spill] sm:$0xff]  ;;  %v9561_v34 = vld [vmem:[#allocation54_spill] sm:$0xff] }
 0x469   :  { %2016 = vmatpush.msrb.mxu1 %v9551_v46  ;;  %2056 = vmatpush.msrb.mxu3 %v9552_v16  ;;  %v9562_v46 = vld [vmem:[#allocation57_spill] sm:$0xff]  ;;  %v9563_v16 = vld [vmem:[#allocation51_spill] sm:$0xff] }
 0x46a   :  { %1999 = vmatpush.msrb.mxu0 %v9553_v60  ;;  %2039 = vmatpush.msrb.mxu2 %v9554_v61  ;;  %v9564_v60 = vld [vmem:[#allocation52_spill] sm:$0xff]  ;;  %v9565_v61 = vld [vmem:[#allocation58_spill] sm:$0xff] }
 0x46b   :  { %2017 = vmatpush.msrb.mxu1 %v9555_v33  ;;  %2057 = vmatpush.msrb.mxu3 %v9556_v25  ;;  %v9566_v33 = vld [vmem:[#allocation63_spill] sm:$0xff] }
 0x46c   :  { %2000 = vmatpush.msrb.mxu0 %v9557_v20  ;;  %2040 = vmatpush.msrb.mxu2 %v9558_v30  ;;  %v9567_v25 = vld [vmem:[#allocation55_spill] sm:$0xff]  ;;  %v9568_v20 = vld [vmem:[#allocation56_spill] sm:$0xff] }
 0x46d   :  { %2018 = vmatpush.msrb.mxu1 %v9559_v8  ;;  %2058 = vmatpush.msrb.mxu3 %v9560_v26  ;;  %v9569_v30 = vld [vmem:[#allocation64_spill] sm:$0xff]  ;;  %v9570_v8 = vld [vmem:[#allocation67_spill] sm:$0xff] }
 0x46e   :  { %2001 = vmatpush.msrb.mxu0 %v9561_v34  ;;  %2041 = vmatpush.msrb.mxu2 %v9562_v46  ;;  %v9571_v26 = vld [vmem:[#allocation59_spill] sm:$0xff]  ;;  %v9572_v34 = vld [vmem:[#allocation60_spill] sm:$0xff] }
 0x46f   :  { %2019 = vmatpush.msrb.mxu1 %v9563_v16  ;;  %2059 = vmatpush.msrb.mxu3 %v9564_v60  ;;  %v9573_v46 = vld [vmem:[#allocation68_spill] sm:$0xff]  ;;  %v9574_v16 = vld [vmem:[#allocation71_spill] sm:$0xff]  ;;  %v9575_v60 = vld [vmem:[#allocation61_spill] sm:$0xff] }
 0x470   :  { %2002 = vmatpush.msrb.mxu0 %v9565_v61  ;;  %2042 = vmatpush.msrb.mxu2 %v9566_v33  ;;  %v9576_v61 = vld [vmem:[#allocation62_spill] sm:$0xff]  ;;  %v9577_v33 = vld [vmem:[#allocation72_spill] sm:$0xff] }
 0x471   :  { %2020 = vmatpush.msrb.mxu1 %v9567_v25  ;;  %2060 = vmatpush.msrb.mxu3 %v9568_v20  ;;  %v9578_v25 = vld [vmem:[#allocation75_spill] sm:$0xff]  ;;  %v9579_v20 = vld [vmem:[#allocation65_spill] sm:$0xff] }
 0x472   :  { %2003 = vmatpush.msrb.mxu0 %v9569_v30  ;;  %2043 = vmatpush.msrb.mxu2 %v9570_v8  ;;  %v9580_v30 = vld [vmem:[#allocation66_spill] sm:$0xff]  ;;  %v9581_v8 = vld [vmem:[#allocation76_spill] sm:$0xff] }
 0x473   :  { %2021 = vmatpush.msrb.mxu1 %v9571_v26  ;;  %2061 = vmatpush.msrb.mxu3 %v9572_v34  ;;  %v9582_v26 = vld [vmem:[#allocation79_spill] sm:$0xff]  ;;  %v9583_v34 = vld [vmem:[#allocation69_spill] sm:$0xff] }
 0x474   :  { %2004 = vmatpush.msrb.mxu0 %v9573_v46  ;;  %2044 = vmatpush.msrb.mxu2 %v9574_v16  ;;  %v9584_v46 = vld [vmem:[#allocation70_spill] sm:$0xff]  ;;  %v9585_v16 = vld [vmem:[#allocation80_spill] sm:$0xff] }
 0x475   :  { %2022 = vmatpush.msrb.mxu1 %v9575_v60  ;;  %2062 = vmatpush.msrb.mxu3 %v9576_v61  ;;  %v9586_v60 = vld [vmem:[#allocation83_spill] sm:$0xff]  ;;  %v9587_v61 = vld [vmem:[#allocation73_spill] sm:$0xff] }
 0x476   :  { %2005 = vmatpush.msrb.mxu0 %v9577_v33  ;;  %2045 = vmatpush.msrb.mxu2 %v9578_v25  ;;  %v9588_v33 = vld [vmem:[#allocation74_spill] sm:$0xff]  ;;  %v9589_v25 = vld [vmem:[#allocation84_spill] sm:$0xff] }
 0x477   :  { %2023 = vmatpush.msrb.mxu1 %v9579_v20  ;;  %2063 = vmatpush.msrb.mxu3 %v9580_v30  ;;  %v9590_v20 = vld [vmem:[#allocation86_spill] sm:$0xff]  ;;  %v9591_v30 = vld [vmem:[#allocation77_spill] sm:$0xff] }
 0x478   :  { %2006 = vmatpush.msrb.mxu0 %v9581_v8  ;;  %2046 = vmatpush.msrb.mxu2 %v9582_v26  ;;  %v9592_v8 = vld [vmem:[#allocation78_spill] sm:$0xff]  ;;  %v9593_v26 = vld [vmem:[#allocation89_spill] sm:$0xff] }
 0x479   :  { %2024 = vmatpush.msrb.mxu1 %v9583_v34  ;;  %2064 = vmatpush.msrb.mxu3 %v9584_v46  ;;  %v9594_v34 = vld [vmem:[#allocation90_spill] sm:$0xff]  ;;  %v9595_v46 = vld [vmem:[#allocation81_spill] sm:$0xff] }
 0x47a   :  { %2007 = vmatpush.msrb.mxu0 %v9585_v16  ;;  %2047 = vmatpush.msrb.mxu2 %v9586_v60  ;;  %v9596_v16 = vld [vmem:[#allocation82_spill] sm:$0xff] }
 0x47b   :  { %2025 = vmatpush.msrb.mxu1 %v9587_v61  ;;  %2065 = vmatpush.msrb.mxu3 %v9588_v33  ;;  %v9597_v60 = vld [vmem:[#allocation94_spill] sm:$0xff]  ;;  %v9599_v33 = vld [vmem:[#allocation85_spill] sm:$0xff] }
 0x47c   :  { %2008 = vmatpush.msrb.mxu0 %v9589_v25  ;;  %2048 = vmatpush.msrb.mxu2 %v9590_v20  ;;  %v9598_v61 = vld [vmem:[#allocation98_spill] sm:$0xff]  ;;  %v9600_v25 = vld [vmem:[#allocation87_spill] sm:$0xff]  ;;  %v9601_v20 = vld [vmem:[#allocation92_spill] sm:$0xff] }
 0x47d   :  { %2026 = vmatpush.msrb.mxu1 %v9591_v30  ;;  %2066 = vmatpush.msrb.mxu3 %v9592_v8  ;;  %v9602_v30 = vld [vmem:[#allocation95_spill] sm:$0xff] }
 0x47e   :  { %2009 = vmatpush.msrb.mxu0 %v9593_v26  ;;  %2049 = vmatpush.msrb.mxu2 %v9594_v34  ;;  %v9603_v8 = vld [vmem:[#allocation91_spill] sm:$0xff]  ;;  %v9604_v26 = vld [vmem:[#allocation102_spill] sm:$0xff]  ;;  %v9605_v34 = vld [vmem:[#allocation88_spill] sm:$0xff] }
 0x47f   :  { %2027 = vmatpush.msrb.mxu1 %v9595_v46  ;;  %2067 = vmatpush.msrb.mxu3 %v9596_v16  ;;  %v9606_v46 = vld [vmem:[#allocation93_spill] sm:$0xff]  ;;  %v9607_v16 = vld [vmem:[#allocation99_spill] sm:$0xff] }
 0x480   :  { %2010 = vmatpush.msrb.mxu0 %v9597_v60  ;;  %2050 = vmatpush.msrb.mxu2 %v9598_v61  ;;  %v9608_v60 = vld [vmem:[#allocation106_spill] sm:$0xff]  ;;  %v9609_v61 = vld [vmem:[#allocation96_spill] sm:$0xff] }
 0x481   :  { %2028 = vmatpush.msrb.mxu1 %v9599_v33  ;;  %2068 = vmatpush.msrb.mxu3 %v9600_v25  ;;  %v9610_v33 = vld [vmem:[#allocation97_spill] sm:$0xff]  ;;  %v9611_v25 = vld [vmem:[#allocation103_spill] sm:$0xff] }
 0x482   :  { %2011 = vmatpush.msrb.mxu0 %v9601_v20  ;;  %2051 = vmatpush.msrb.mxu2 %v9602_v30  ;;  %v9612_v20 = vld [vmem:[#allocation108_spill] sm:$0xff] }
 0x483   :  { %2029 = vmatpush.msrb.mxu1 %v9605_v34  ;;  %2069 = vmatpush.msrb.mxu3 %v9606_v46  ;;  %v9613_v30 = vld [vmem:[#allocation100_spill] sm:$0xff] }
 0x484   :  { %2076 = vmatpush.msra.mxu0 %v9603_v8  ;;  %2116 = vmatpush.msra.mxu2 %v9604_v26  ;;  %v9614_v8 = vld [vmem:[#allocation101_spill] sm:$0xff]  ;;  %v9615_v26 = vld [vmem:[#allocation107_spill] sm:$0xff]  ;;  %v9616_v34 = vld [vmem:[#allocation104_spill] sm:$0xff] }
 0x485   :  { %2030 = vmatpush.msrb.mxu1 %v9609_v61  ;;  %2070 = vmatpush.msrb.mxu3 %v9610_v33  ;;  %v9617_v46 = vld [vmem:[#allocation112_spill] sm:$0xff]  ;;  %v9620_v61 = vld [vmem:[#allocation110_spill] sm:$0xff] }
 0x486   :  { %2077 = vmatpush.msra.mxu0 %v9607_v16  ;;  %2117 = vmatpush.msra.mxu2 %v9608_v60  ;;  %v9618_v16 = vld [vmem:[#allocation105_spill] sm:$0xff]  ;;  %v9619_v60 = vld [vmem:[#allocation111_spill] sm:$0xff]  ;;  %v9621_v33 = vld [vmem:[#allocation116_spill] sm:$0xff] }
 0x487   :  { %2031 = vmatpush.msrb.mxu1 %v9613_v30  ;;  %2071 = vmatpush.msrb.mxu3 %v9614_v8  ;;  %v9624_v30 = vld [vmem:[#allocation114_spill] sm:$0xff]  ;;  %v9625_v8 = vld [vmem:[#allocation120_spill] sm:$0xff] }
 0x488   :  { %2078 = vmatpush.msra.mxu0 %v9611_v25  ;;  %2118 = vmatpush.msra.mxu2 %v9612_v20  ;;  %v9622_v25 = vld [vmem:[#allocation109_spill] sm:$0xff]  ;;  %v9623_v20 = vld [vmem:[#allocation115_spill] sm:$0xff] }
 0x489   :  { %2096 = vmatpush.msra.mxu1 %v9616_v34  ;;  %2136 = vmatpush.msra.mxu3 %v9618_v16  ;;  %v9627_v34 = vld [vmem:[#allocation119_spill] sm:$0xff]  ;;  %v9629_v16 = vld [vmem:[#allocation124_spill] sm:$0xff] }
 0x48a   :  { %2079 = vmatpush.msra.mxu0 %v9615_v26  ;;  %2119 = vmatpush.msra.mxu2 %v9617_v46  ;;  %v9626_v26 = vld [vmem:[#allocation113_spill] sm:$0xff]  ;;  %v9628_v46 = vld [vmem:[#allocation118_spill] sm:$0xff] }
 0x48b   :  { %2097 = vmatpush.msra.mxu1 %v9620_v61  ;;  %2137 = vmatpush.msra.mxu3 %v9622_v25  ;;  %v9631_v61 = vld [vmem:[#allocation123_spill] sm:$0xff]  ;;  %v9633_v25 = vld [vmem:[#allocation128_spill] sm:$0xff] }
 0x48c   :  { %2080 = vmatpush.msra.mxu0 %v9619_v60  ;;  %2120 = vmatpush.msra.mxu2 %v9621_v33  ;;  %v9630_v60 = vld [vmem:[#allocation117_spill] sm:$0xff]  ;;  %v9632_v33 = vld [vmem:[#allocation122_spill] sm:$0xff] }
 0x48d   :  { %2098 = vmatpush.msra.mxu1 %v9624_v30  ;;  %2138 = vmatpush.msra.mxu3 %v9626_v26  ;;  %v9635_v30 = vld [vmem:[#allocation127_spill] sm:$0xff]  ;;  %v9637_v26 = vld [vmem:[#allocation132_spill] sm:$0xff] }
 0x48e   :  { %2081 = vmatpush.msra.mxu0 %v9623_v20  ;;  %2121 = vmatpush.msra.mxu2 %v9625_v8  ;;  %v9634_v20 = vld [vmem:[#allocation121_spill] sm:$0xff]  ;;  %v9636_v8 = vld [vmem:[#allocation126_spill] sm:$0xff] }
 0x48f   :  { %2099 = vmatpush.msra.mxu1 %v9628_v46  ;;  %2139 = vmatpush.msra.mxu3 %v9630_v60  ;;  %v9639_v46 = vld [vmem:[#allocation131_spill] sm:$0xff]  ;;  %v9641_v60 = vld [vmem:[#allocation136_spill] sm:$0xff] }
 0x490   :  { %2082 = vmatpush.msra.mxu0 %v9627_v34  ;;  %2122 = vmatpush.msra.mxu2 %v9629_v16  ;;  %v9638_v34 = vld [vmem:[#allocation125_spill] sm:$0xff]  ;;  %v9640_v16 = vld [vmem:[#allocation130_spill] sm:$0xff] }
 0x491   :  { %2100 = vmatpush.msra.mxu1 %v9632_v33  ;;  %2140 = vmatpush.msra.mxu3 %v9634_v20  ;;  %v9643_v33 = vld [vmem:[#allocation135_spill] sm:$0xff]  ;;  %v9645_v20 = vld [vmem:[#allocation140_spill] sm:$0xff] }
 0x492   :  { %2083 = vmatpush.msra.mxu0 %v9631_v61  ;;  %2123 = vmatpush.msra.mxu2 %v9633_v25  ;;  %v9642_v61 = vld [vmem:[#allocation129_spill] sm:$0xff]  ;;  %v9644_v25 = vld [vmem:[#allocation134_spill] sm:$0xff] }
 0x493   :  { %2101 = vmatpush.msra.mxu1 %v9636_v8  ;;  %2141 = vmatpush.msra.mxu3 %v9638_v34  ;;  %v9647_v8 = vld [vmem:[#allocation139_spill] sm:$0xff]  ;;  %v9649_v34 = vld [vmem:[#allocation144_spill] sm:$0xff] }
 0x494   :  { %2084 = vmatpush.msra.mxu0 %v9635_v30  ;;  %2124 = vmatpush.msra.mxu2 %v9637_v26  ;;  %v9646_v30 = vld [vmem:[#allocation133_spill] sm:$0xff]  ;;  %v9648_v26 = vld [vmem:[#allocation138_spill] sm:$0xff] }
 0x495   :  { %2102 = vmatpush.msra.mxu1 %v9640_v16  ;;  %2142 = vmatpush.msra.mxu3 %v9642_v61  ;;  %v9651_v16 = vld [vmem:[#allocation143_spill] sm:$0xff] }
 0x496   :  { %2085 = vmatpush.msra.mxu0 %v9639_v46  ;;  %2125 = vmatpush.msra.mxu2 %v9641_v60  ;;  %v9650_v46 = vld [vmem:[#allocation137_spill] sm:$0xff]  ;;  %v9652_v60 = vld [vmem:[#allocation142_spill] sm:$0xff]  ;;  %v9653_v61 = vld [vmem:[#allocation147_spill] sm:$0xff] }
 0x497   :  { %2103 = vmatpush.msra.mxu1 %v9644_v25  ;;  %2143 = vmatpush.msra.mxu3 %v9646_v30  ;;  %v9655_v25 = vld [vmem:[#allocation149_spill] sm:$0xff]  ;;  %v9657_v30 = vld [vmem:[#allocation151_spill] sm:$0xff] }
 0x498   :  { %2086 = vmatpush.msra.mxu0 %v9643_v33  ;;  %2126 = vmatpush.msra.mxu2 %v9645_v20  ;;  %v9654_v33 = vld [vmem:[#allocation141_spill] sm:$0xff]  ;;  %v9656_v20 = vld [vmem:[#allocation146_spill] sm:$0xff] }
 0x499   :  { %2104 = vmatpush.msra.mxu1 %v9648_v26  ;;  %2144 = vmatpush.msra.mxu3 %v9650_v46  ;;  %v9659_v26 = vld [vmem:[#allocation155_spill] sm:$0xff]  ;;  %v9661_v46 = vld [vmem:[#allocation157_spill] sm:$0xff] }
 0x49a   :  { %2087 = vmatpush.msra.mxu0 %v9647_v8  ;;  %2127 = vmatpush.msra.mxu2 %v9649_v34  ;;  %v9658_v8 = vld [vmem:[#allocation145_spill] sm:$0xff]  ;;  %v9660_v34 = vld [vmem:[#allocation148_spill] sm:$0xff] }
 0x49b   :  { %2105 = vmatpush.msra.mxu1 %v9652_v60  ;;  %2145 = vmatpush.msra.mxu3 %v9654_v33  ;;  %v9673_v60 = vld [vmem:[#allocation153_spill] sm:$0xff] }
 0x49c   :  { %2088 = vmatpush.msra.mxu0 %v9651_v16  ;;  %2128 = vmatpush.msra.mxu2 %v9653_v61  ;;  %v9662_v16 = vld [vmem:[#allocation150_spill] sm:$0xff]  ;;  %v7369_v61 = vld [vmem:[%s7756_s5] sm:$0xff] }
 0x49d   :  { %2106 = vmatpush.msra.mxu1 %v9656_v20  ;;  %2146 = vmatpush.msra.mxu3 %v9658_v8  ;;  %9663 = vst [vmem:[#allocation152_spill] sm:$0xff] %v7369_v61  ;;  %v74_v8 = vpop.permute.xlu2 %73 }
 0x49e   :  { %2089 = vmatpush.msra.mxu0 %v9655_v25  ;;  %2129 = vmatpush.msra.mxu2 %v9657_v30  ;;  %v7375_v30 = vld [vmem:[%s7756_s5 + $0x130] sm:$0xff]  ;;  %v100_v37 = vmul.f32 %v9673_v60, %v74_v8  ;;  %v101_v32 = vmul.f32 %v4185_v44, %v74_v8 }
 0x49f   :  { %2107 = vmatpush.msra.mxu1 %v9660_v34  ;;  %2147 = vmatpush.msra.mxu3 %v9662_v16  ;;  %9664 = vst [vmem:[#allocation156_spill] sm:$0xff] %v7375_v30 }
 0x4a0   :  { %2090 = vmatpush.msra.mxu0 %v9659_v26  ;;  %2130 = vmatpush.msra.mxu2 %v9661_v46  ;;  %v7381_v46 = vld [vmem:[%s7756_s5 + $0x8] sm:$0xff]  ;;  %v7387_v26 = vld [vmem:[%s7756_s5 + $0x138] sm:$0xff] }
 0x4a1   :  { %2108 = vmatpush.msra.mxu1 %v7375_v30  ;;  %9665 = vst [vmem:[#allocation159_spill] sm:$0xff] %v7381_v46  ;;  %2148 = vmatpush.msra.mxu3 %v7387_v26  ;;  %v7399_v30 = vld [vmem:[%s7756_s5 + $0x128] sm:$0xff] }
 0x4a2   :  { %2091 = vmatpush.msra.mxu0 %v7369_v61  ;;  %2131 = vmatpush.msra.mxu2 %v7381_v46  ;;  %9666 = vst [vmem:[#allocation160_spill] sm:$0xff] %v7387_v26  ;;  %v7393_v61 = vld [vmem:[%s7756_s5 + $0x120] sm:$0xff]  ;;  %v7405_v46 = vld [vmem:[%s7756_s5 + $0x110] sm:$0xff]  ;;  %v7411_v26 = vld [vmem:[%s7756_s5 + $0x118] sm:$0xff] }
 0x4a3   :  { %9667 = vst [vmem:[#allocation158_spill] sm:$0xff] %v7393_v61  ;;  %2109 = vmatpush.msra.mxu1 %v7393_v61  ;;  %2149 = vmatpush.msra.mxu3 %v7399_v30  ;;  %v7417_v61 = vld [vmem:[%s7756_s5 + $0x100] sm:$0xff] }
 0x4a4   :  { %9668 = vst [vmem:[#allocation161_spill] sm:$0xff] %v7399_v30  ;;  %v7423_v30 = vld [vmem:[%s7756_s5 + $0x108] sm:$0xff] }
 0x4a5   :  { %9669 = vst [vmem:[#allocation162_spill] sm:$0xff] %v7405_v46  ;;  %2110 = vmatpush.msra.mxu1 %v7405_v46  ;;  %2150 = vmatpush.msra.mxu3 %v7411_v26 }
 0x4a6   :  { %9670 = vst [vmem:[#allocation163_spill] sm:$0xff] %v7411_v26  ;;  %v130_v26 = vpop.permute.xlu0 %129 }
 0x4a7   :  { %9671 = vst [vmem:[#allocation164_spill] sm:$0xff] %v7417_v61  ;;  %2111 = vmatpush.msra.mxu1 %v7417_v61  ;;  %2151 = vmatpush.msra.mxu3 %v7423_v30  ;;  %v154_v53 = vmul.f32 %v9674_v28, %v130_v26  ;;  %v155_v36 = vmul.f32 %v4187_v57, %v130_v26 }
 0x4a8   :  { %9672 = vst [vmem:[#allocation165_spill] sm:$0xff] %v7423_v30 }
 0x4a9   :  { %v170_v61 = vadd.f32 %v154_v53, %v100_v37  ;;  %v171_v38 = vadd.f32 %v155_v36, %v101_v32  ;;  %v9709_v36 = vld [vmem:[#allocation34_spill] sm:$0xff]  ;;  %v9710_v32 = vld [vmem:[#allocation39_spill] sm:$0xff] }
 0x4ab   :  { %v192_v11 = vadd.f32 %v4189_v3, %v170_v61  ;;  %v193_v37 = vadd.f32 %v4194_v51, %v171_v38  ;;  %v9705_v38 = vld [vmem:[#allocation33_spill] sm:$0xff]  ;;  %v9720_v61 = vld [vmem:[#allocation47_spill] sm:$0xff] }
 0x4bd   :  { %v1763_v46 = vpop.f32.mrf.mxu0 }
 0x4bf   :  { %v1783_v16 = vpop.f32.mrf.mxu1 }
 0x4c0   :  { %v1784_v30 = vadd.f32 %v1783_v16, %v1763_v46 }
 0x4c3   :  { %v1803_v34 = vpop.f32.mrf.mxu2 }
 0x4c5   :  { %v1823_v25 = vpop.f32.mrf.mxu3  ;;  %v1843_v20 = vpop.f32.mrf.mxu0 }
 0x4c6   :  { %v1844_v62 = vadd.f32 %v1843_v20, %v1784_v30  ;;  %v1824_v53 = vadd.f32 %v1823_v25, %v1803_v34  ;;  %v9714_v25 = vld [vmem:[#allocation43_spill] sm:$0xff]  ;;  %v9716_v20 = vld [vmem:[#allocation42_spill] sm:$0xff]  ;;  %v9717_v30 = vld [vmem:[#allocation45_spill] sm:$0xff] }
 0x4c7   :  { %v9718_v34 = vld [vmem:[#allocation46_spill] sm:$0xff] }
 0x4cb   :  { %v1863_v33 = vpop.f32.mrf.mxu1  ;;  %v1883_v5 = vpop.f32.mrf.mxu2 }
 0x4cc   :  { %v1864_v60 = vadd.f32 %v1863_v33, %v1844_v62  ;;  %v1884_v16 = vadd.f32 %v1883_v5, %v1824_v53  ;;  %v9703_v62 = vld [vmem:[#allocation30_spill] sm:$0xff]  ;;  %v9712_v5 = vld [vmem:[#allocation41_spill] sm:$0xff]  ;;  %v9721_v53 = vld [vmem:[#allocation48_spill] sm:$0xff] }
 0x4cd   :  { %v9713_v33 = vld [vmem:[#allocation38_spill] sm:$0xff] }
 0x4ce   :  { %v1906_v26 = vadd.f32 %v1864_v60, %v4422_v1  ;;  %v9719_v60 = vld [vmem:[#allocation49_spill] sm:$0xff] }
 0x4d1   :  { %v1903_v31 = vpop.f32.mrf.mxu3 }
 0x4de   :  { %v1929_v40 = vpop.f32.mrf.mxu0 }
 0x4e4   :  { %v1949_v6 = vpop.f32.mrf.mxu1  ;;  %v1969_v50 = vpop.f32.mrf.mxu2 }
 0x4e5   :  { %v1950_v0 = vadd.f32 %v1949_v6, %v1929_v40  ;;  %v9707_v6 = vld [vmem:[#allocation36_spill] sm:$0xff]  ;;  %v9708_v40 = vld [vmem:[#allocation37_spill] sm:$0xff] }
 0x4e7   :  { %v1992_v48 = vadd.f32 %v1950_v0, %v192_v11  ;;  %v1904_v0 = vadd.f32 %v1903_v31, %v1884_v16  ;;  %v9706_v11 = vld [vmem:[#allocation35_spill] sm:$0xff]  ;;  %v9711_v31 = vld [vmem:[#allocation40_spill] sm:$0xff]  ;;  %v9726_v16 = vld [vmem:[#allocation54_spill] sm:$0xff] }
 0x4e9   :  { %2552 = vtanh.f32 %v1992_v48  ;;  %v9704_v48 = vld [vmem:[#allocation32_spill] sm:$0xff] }
 0x4ea   :  { %v1989_v28 = vpop.f32.mrf.mxu3 }
 0x4eb   :  { %v1990_v54 = vadd.f32 %v1989_v28, %v1969_v50  ;;  %v1907_v50 = vadd.f32 %v1904_v0, %v4430_v13  ;;  %v9715_v28 = vld [vmem:[#allocation44_spill] sm:$0xff]  ;;  %v9727_v0 = vld [vmem:[#allocation57_spill] sm:$0xff] }
 0x4ed   :  { %v1993_v8 = vadd.f32 %v1990_v54, %v193_v37  ;;  %v9722_v37 = vld [vmem:[#allocation50_spill] sm:$0xff] }
 0x4ef   :  { %v7433_v46 = vpop.eup %2552  ;;  %2554 = vtanh.f32 %v1993_v8  ;;  %v9723_v8 = vld [vmem:[#allocation53_spill] sm:$0xff] }
 0x4f0   :  { %2012 = vmatmul.f32.vlgmr.msrb.gmra.mxu0 %v7433_v46  ;;  %2052 = vmatmul.f32.vlgmr.msrb.gmra.mxu2 %v7433_v46  ;;  %2556 = vtanh.f32 %v1906_v26  ;;  %v9724_v26 = vld [vmem:[#allocation51_spill] sm:$0xff] }
 0x4f1   :  { %2162 = vmatpush.msrb.mxu0 %v6052_v2  ;;  %2202 = vmatpush.msrb.mxu2 %v6058_v4  ;;  %2558 = vtanh.f32 %v1907_v50  ;;  %v9729_v50 = vld [vmem:[#allocation56_spill] sm:$0xff] }
 0x4f3   :  { %2163 = vmatpush.msrb.mxu0 %v6064_v9  ;;  %2203 = vmatpush.msrb.mxu2 %v6070_v12  ;;  %v9675_v9 = vld [vmem:[#allocation9_spill] sm:$0xff]  ;;  %v9676_v12 = vld [vmem:[#allocation3_spill] sm:$0xff] }
 0x4f5   :  { %v7441_v54 = vpop.eup %2554  ;;  %2164 = vmatpush.msrb.mxu0 %v6079_v19  ;;  %2204 = vmatpush.msrb.mxu2 %v6085_v21  ;;  %v9677_v19 = vld [vmem:[#allocation11_spill] sm:$0xff]  ;;  %v9678_v21 = vld [vmem:[#allocation4_spill] sm:$0xff] }
 0x4f6   :  { %2032 = vmatmul.f32.vlgmr.msrb.gmra.mxu1 %v7441_v54  ;;  %2072 = vmatmul.f32.vlgmr.msrb.gmra.mxu3 %v7441_v54  ;;  %v2557_v2 = vpop.eup %2556 }
 0x4f7   :  { %2165 = vmatpush.msrb.mxu0 %v6093_v14  ;;  %2182 = vmatpush.msrb.mxu1 %v6099_v29  ;;  %v2559_v4 = vpop.eup %2558  ;;  %v9679_v14 = vld [vmem:[#allocation13_spill] sm:$0xff] }
 0x4f8   :  { %2205 = vmatpush.msrb.mxu2 %v6105_v35  ;;  %2222 = vmatpush.msrb.mxu3 %v6111_v49  ;;  %v9680_v29 = vld [vmem:[#allocation5_spill] sm:$0xff]  ;;  %v9681_v35 = vld [vmem:[#allocation15_spill] sm:$0xff]  ;;  %v9682_v49 = vld [vmem:[#allocation6_spill] sm:$0xff] }
 0x4f9   :  { %2092 = vmatmul.f32.vlgmr.msra.gmra.mxu0 %v2557_v2  ;;  %2132 = vmatmul.f32.vlgmr.msra.gmra.mxu2 %v2557_v2  ;;  %v9730_v2 = vld [vmem:[#allocation58_spill] sm:$0xff] }
 0x4fa   :  { %2166 = vmatpush.msrb.mxu0 %v6117_v10  ;;  %2183 = vmatpush.msrb.mxu1 %v6123_v27  ;;  %v9683_v10 = vld [vmem:[#allocation17_spill] sm:$0xff]  ;;  %v9684_v27 = vld [vmem:[#allocation7_spill] sm:$0xff] }
 0x4fb   :  { %2206 = vmatpush.msrb.mxu2 %v6129_v63  ;;  %2223 = vmatpush.msrb.mxu3 %v6135_v7  ;;  %v9685_v63 = vld [vmem:[#allocation19_spill] sm:$0xff]  ;;  %v9686_v7 = vld [vmem:[#allocation8_spill] sm:$0xff] }
 0x4fc   :  { %2167 = vmatpush.msrb.mxu0 %v6141_v15  ;;  %2184 = vmatpush.msrb.mxu1 %v6147_v17  ;;  %v9687_v15 = vld [vmem:[#allocation21_spill] sm:$0xff]  ;;  %v9688_v17 = vld [vmem:[#allocation10_spill] sm:$0xff] }
 0x4fd   :  { %2207 = vmatpush.msrb.mxu2 %v6153_v18  ;;  %2224 = vmatpush.msrb.mxu3 %v6159_v22  ;;  %v9689_v18 = vld [vmem:[#allocation23_spill] sm:$0xff]  ;;  %v9690_v22 = vld [vmem:[#allocation12_spill] sm:$0xff] }
 0x4fe   :  { %2168 = vmatpush.msrb.mxu0 %v6165_v23  ;;  %2185 = vmatpush.msrb.mxu1 %v6171_v24  ;;  %v9691_v23 = vld [vmem:[#allocation14_spill] sm:$0xff]  ;;  %v9692_v24 = vld [vmem:[#allocation16_spill] sm:$0xff] }
 0x4ff   :  { %2208 = vmatpush.msrb.mxu2 %v6177_v39  ;;  %2225 = vmatpush.msrb.mxu3 %v6183_v41  ;;  %v9693_v39 = vld [vmem:[#allocation25_spill] sm:$0xff]  ;;  %v9694_v41 = vld [vmem:[#allocation18_spill] sm:$0xff] }
 0x500   :  { %2112 = vmatmul.f32.vlgmr.msra.gmra.mxu1 %v2559_v4  ;;  %2152 = vmatmul.f32.vlgmr.msra.gmra.mxu3 %v2559_v4  ;;  %v9731_v4 = vld [vmem:[#allocation63_spill] sm:$0xff] }
 0x501   :  { %2169 = vmatpush.msrb.mxu0 %v6189_v42  ;;  %2186 = vmatpush.msrb.mxu1 %v6195_v43  ;;  %v9695_v42 = vld [vmem:[#allocation20_spill] sm:$0xff]  ;;  %v9696_v43 = vld [vmem:[#allocation26_spill] sm:$0xff] }
 0x502   :  { %2209 = vmatpush.msrb.mxu2 %v6201_v45  ;;  %2226 = vmatpush.msrb.mxu3 %v6207_v47  ;;  %v9697_v45 = vld [vmem:[#allocation22_spill] sm:$0xff]  ;;  %v9698_v47 = vld [vmem:[#allocation24_spill] sm:$0xff] }
 0x503   :  { %2170 = vmatpush.msrb.mxu0 %v6213_v52  ;;  %2187 = vmatpush.msrb.mxu1 %v6219_v55  ;;  %v9699_v52 = vld [vmem:[#allocation28_spill] sm:$0xff]  ;;  %v9700_v55 = vld [vmem:[#allocation29_spill] sm:$0xff] }
 0x504   :  { %2210 = vmatpush.msrb.mxu2 %v6225_v56  ;;  %2227 = vmatpush.msrb.mxu3 %v6231_v58  ;;  %v9701_v56 = vld [vmem:[#allocation27_spill] sm:$0xff]  ;;  %v39_v58 = vld [vmem:[%s7754_s0 + $0x38] sm:$0xff] }
 0x505   :  { %2171 = vmatpush.msrb.mxu0 %v6237_v59  ;;  %2188 = vmatpush.msrb.mxu1 %v9675_v9  ;;  %v9702_v59 = vld [vmem:[#allocation31_spill] sm:$0xff] }
 0x506   :  { %2211 = vmatpush.msrb.mxu2 %v9676_v12  ;;  %2228 = vmatpush.msrb.mxu3 %v9677_v19  ;;  %v9732_v9 = vld [vmem:[#allocation59_spill] sm:$0xff]  ;;  %v9733_v12 = vld [vmem:[#allocation60_spill] sm:$0xff] }
 0x507   :  { %2172 = vmatpush.msrb.mxu0 %v9678_v21  ;;  %2189 = vmatpush.msrb.mxu1 %v9679_v14  ;;  %v9734_v19 = vld [vmem:[#allocation64_spill] sm:$0xff]  ;;  %v9735_v21 = vld [vmem:[#allocation67_spill] sm:$0xff]  ;;  %v9736_v14 = vld [vmem:[#allocation61_spill] sm:$0xff] }
 0x508   :  { %2212 = vmatpush.msrb.mxu2 %v9680_v29  ;;  %2229 = vmatpush.msrb.mxu3 %v9681_v35  ;;  %v9737_v29 = vld [vmem:[#allocation62_spill] sm:$0xff]  ;;  %v9738_v35 = vld [vmem:[#allocation68_spill] sm:$0xff] }
 0x509   :  { %2173 = vmatpush.msrb.mxu0 %v9682_v49  ;;  %2190 = vmatpush.msrb.mxu1 %v9683_v10  ;;  %v9739_v49 = vld [vmem:[#allocation71_spill] sm:$0xff]  ;;  %v9740_v10 = vld [vmem:[#allocation65_spill] sm:$0xff] }
 0x50a   :  { %2213 = vmatpush.msrb.mxu2 %v9684_v27  ;;  %2230 = vmatpush.msrb.mxu3 %v9685_v63  ;;  %v9741_v27 = vld [vmem:[#allocation66_spill] sm:$0xff]  ;;  %v9742_v63 = vld [vmem:[#allocation72_spill] sm:$0xff] }
 0x50b   :  { %2174 = vmatpush.msrb.mxu0 %v9686_v7  ;;  %2191 = vmatpush.msrb.mxu1 %v9687_v15  ;;  %v9743_v7 = vld [vmem:[#allocation75_spill] sm:$0xff]  ;;  %v9744_v15 = vld [vmem:[#allocation69_spill] sm:$0xff] }
 0x50c   :  { %2214 = vmatpush.msrb.mxu2 %v9688_v17  ;;  %2231 = vmatpush.msrb.mxu3 %v9689_v18  ;;  %v9745_v17 = vld [vmem:[#allocation70_spill] sm:$0xff]  ;;  %v9746_v18 = vld [vmem:[#allocation76_spill] sm:$0xff] }
 0x50d   :  { %2175 = vmatpush.msrb.mxu0 %v9690_v22  ;;  %2192 = vmatpush.msrb.mxu1 %v9691_v23  ;;  %v9747_v22 = vld [vmem:[#allocation79_spill] sm:$0xff]  ;;  %v9748_v23 = vld [vmem:[#allocation73_spill] sm:$0xff] }
 0x50e   :  { %2215 = vmatpush.msrb.mxu2 %v9692_v24  ;;  %2232 = vmatpush.msrb.mxu3 %v9693_v39  ;;  %v9749_v24 = vld [vmem:[#allocation74_spill] sm:$0xff]  ;;  %v9750_v39 = vld [vmem:[#allocation80_spill] sm:$0xff] }
 0x50f   :  { %2176 = vmatpush.msrb.mxu0 %v9694_v41  ;;  %2193 = vmatpush.msrb.mxu1 %v9695_v42  ;;  %v9751_v41 = vld [vmem:[#allocation83_spill] sm:$0xff]  ;;  %v9752_v42 = vld [vmem:[#allocation77_spill] sm:$0xff] }
 0x510   :  { %2216 = vmatpush.msrb.mxu2 %v9696_v43  ;;  %2233 = vmatpush.msrb.mxu3 %v9697_v45  ;;  %v9753_v43 = vld [vmem:[#allocation78_spill] sm:$0xff]  ;;  %v9754_v45 = vld [vmem:[#allocation84_spill] sm:$0xff] }
 0x511   :  { %2177 = vmatpush.msrb.mxu0 %v9698_v47  ;;  %2194 = vmatpush.msrb.mxu1 %v9699_v52  ;;  %v9755_v47 = vld [vmem:[#allocation86_spill] sm:$0xff]  ;;  %v9756_v52 = vld [vmem:[#allocation81_spill] sm:$0xff] }
 0x512   :  { %2217 = vmatpush.msrb.mxu2 %v9700_v55  ;;  %2234 = vmatpush.msrb.mxu3 %v9701_v56  ;;  %v9757_v55 = vld [vmem:[#allocation82_spill] sm:$0xff]  ;;  %v9758_v56 = vld [vmem:[#allocation89_spill] sm:$0xff] }
 0x513   :  { %2178 = vmatmul.f32.vlgmr.msrb.gmra.mxu0 %v7433_v46  ;;  %2218 = vmatmul.f32.vlgmr.msrb.gmra.mxu2 %v7433_v46  ;;  %v9725_v46 = vld [vmem:[#allocation52_spill] sm:$0xff] }
 0x514   :  { %2195 = vmatpush.msrb.mxu1 %v9702_v59  ;;  %2235 = vmatpush.msrb.mxu3 %v9703_v62  ;;  %v9760_v59 = vld [vmem:[#allocation85_spill] sm:$0xff]  ;;  %v9761_v62 = vld [vmem:[#allocation87_spill] sm:$0xff] }
 0x515   :  { %78 = vperm.xlu1 %2505, %v39_v58   ;;  %133 = vperm.xlu2 %2506, %v39_v58   ;;  %v9759_v58 = vld [vmem:[#allocation90_spill] sm:$0xff] }
 0x516   :  { %2196 = vmatpush.msrb.mxu1 %v9704_v48  ;;  %2236 = vmatpush.msrb.mxu3 %v9705_v38  ;;  %v9762_v48 = vld [vmem:[#allocation94_spill] sm:$0xff] }
 0x517   :  { %2246 = vmatpush.msra.mxu0 %v9706_v11  ;;  %2286 = vmatpush.msra.mxu2 %v9707_v6  ;;  %v9763_v38 = vld [vmem:[#allocation98_spill] sm:$0xff]  ;;  %v9764_v11 = vld [vmem:[#allocation88_spill] sm:$0xff]  ;;  %v9765_v6 = vld [vmem:[#allocation93_spill] sm:$0xff] }
 0x518   :  { %2197 = vmatpush.msrb.mxu1 %v9708_v40  ;;  %2237 = vmatpush.msrb.mxu3 %v9709_v36  ;;  %v9766_v40 = vld [vmem:[#allocation92_spill] sm:$0xff]  ;;  %v9767_v36 = vld [vmem:[#allocation95_spill] sm:$0xff] }
 0x519   :  { %2198 = vmatmul.f32.vlgmr.msrb.gmra.mxu1 %v7441_v54  ;;  %2238 = vmatmul.f32.vlgmr.msrb.gmra.mxu3 %v7441_v54  ;;  %v9728_v54 = vld [vmem:[#allocation55_spill] sm:$0xff] }
 0x51a   :  { %2247 = vmatpush.msra.mxu0 %v9710_v32  ;;  %2287 = vmatpush.msra.mxu2 %v9711_v31  ;;  %v9768_v32 = vld [vmem:[#allocation91_spill] sm:$0xff]  ;;  %v9769_v31 = vld [vmem:[#allocation102_spill] sm:$0xff] }
 0x51b   :  { %2266 = vmatpush.msra.mxu1 %v9712_v5  ;;  %2306 = vmatpush.msra.mxu3 %v9713_v33  ;;  %v9770_v5 = vld [vmem:[#allocation96_spill] sm:$0xff]  ;;  %v9771_v33 = vld [vmem:[#allocation97_spill] sm:$0xff] }
 0x51c   :  { %2248 = vmatpush.msra.mxu0 %v9714_v25  ;;  %2288 = vmatpush.msra.mxu2 %v9715_v28  ;;  %v9772_v25 = vld [vmem:[#allocation99_spill] sm:$0xff]  ;;  %v9773_v28 = vld [vmem:[#allocation106_spill] sm:$0xff] }
 0x51d   :  { %2267 = vmatpush.msra.mxu1 %v9716_v20  ;;  %2307 = vmatpush.msra.mxu3 %v9717_v30  ;;  %v9774_v20 = vld [vmem:[#allocation100_spill] sm:$0xff]  ;;  %v9775_v30 = vld [vmem:[#allocation101_spill] sm:$0xff] }
 0x51e   :  { %2249 = vmatpush.msra.mxu0 %v9718_v34  ;;  %2289 = vmatpush.msra.mxu2 %v9719_v60  ;;  %v9776_v34 = vld [vmem:[#allocation103_spill] sm:$0xff]  ;;  %v9777_v60 = vld [vmem:[#allocation108_spill] sm:$0xff] }
 0x51f   :  { %2268 = vmatpush.msra.mxu1 %v9720_v61  ;;  %2308 = vmatpush.msra.mxu3 %v9721_v53  ;;  %v9778_v61 = vld [vmem:[#allocation104_spill] sm:$0xff]  ;;  %v9779_v53 = vld [vmem:[#allocation105_spill] sm:$0xff] }
 0x520   :  { %2250 = vmatpush.msra.mxu0 %v9722_v37  ;;  %2290 = vmatpush.msra.mxu2 %v9723_v8  ;;  %v9780_v37 = vld [vmem:[#allocation107_spill] sm:$0xff]  ;;  %v9781_v8 = vld [vmem:[#allocation112_spill] sm:$0xff] }
 0x521   :  { %2269 = vmatpush.msra.mxu1 %v9724_v26  ;;  %2309 = vmatpush.msra.mxu3 %v9725_v46  ;;  %v9782_v26 = vld [vmem:[#allocation110_spill] sm:$0xff]  ;;  %v9783_v46 = vld [vmem:[#allocation109_spill] sm:$0xff] }
 0x522   :  { %2251 = vmatpush.msra.mxu0 %v9726_v16  ;;  %2291 = vmatpush.msra.mxu2 %v9727_v0  ;;  %v9784_v16 = vld [vmem:[#allocation111_spill] sm:$0xff]  ;;  %v9785_v0 = vld [vmem:[#allocation116_spill] sm:$0xff] }
 0x523   :  { %2270 = vmatpush.msra.mxu1 %v9728_v54  ;;  %2310 = vmatpush.msra.mxu3 %v9729_v50  ;;  %v9786_v54 = vld [vmem:[#allocation114_spill] sm:$0xff]  ;;  %v9787_v50 = vld [vmem:[#allocation113_spill] sm:$0xff] }
 0x524   :  { %2252 = vmatpush.msra.mxu0 %v9730_v2  ;;  %2292 = vmatpush.msra.mxu2 %v9731_v4  ;;  %v9788_v2 = vld [vmem:[#allocation115_spill] sm:$0xff]  ;;  %v9789_v4 = vld [vmem:[#allocation120_spill] sm:$0xff] }
 0x525   :  { %2271 = vmatpush.msra.mxu1 %v9732_v9  ;;  %2311 = vmatpush.msra.mxu3 %v9733_v12  ;;  %v9790_v9 = vld [vmem:[#allocation118_spill] sm:$0xff]  ;;  %v9791_v12 = vld [vmem:[#allocation117_spill] sm:$0xff] }
 0x526   :  { %2253 = vmatpush.msra.mxu0 %v9734_v19  ;;  %2293 = vmatpush.msra.mxu2 %v9735_v21  ;;  %v9792_v19 = vld [vmem:[#allocation119_spill] sm:$0xff]  ;;  %v9793_v21 = vld [vmem:[#allocation124_spill] sm:$0xff] }
 0x527   :  { %2272 = vmatpush.msra.mxu1 %v9736_v14  ;;  %2312 = vmatpush.msra.mxu3 %v9737_v29  ;;  %v9794_v14 = vld [vmem:[#allocation122_spill] sm:$0xff]  ;;  %v9795_v29 = vld [vmem:[#allocation121_spill] sm:$0xff] }
 0x528   :  { %2254 = vmatpush.msra.mxu0 %v9738_v35  ;;  %2294 = vmatpush.msra.mxu2 %v9739_v49  ;;  %v9796_v35 = vld [vmem:[#allocation123_spill] sm:$0xff]  ;;  %v9797_v49 = vld [vmem:[#allocation128_spill] sm:$0xff] }
 0x529   :  { %2273 = vmatpush.msra.mxu1 %v9740_v10  ;;  %2313 = vmatpush.msra.mxu3 %v9741_v27  ;;  %v9798_v10 = vld [vmem:[#allocation126_spill] sm:$0xff]  ;;  %v9799_v27 = vld [vmem:[#allocation125_spill] sm:$0xff] }
 0x52a   :  { %2255 = vmatpush.msra.mxu0 %v9742_v63  ;;  %2295 = vmatpush.msra.mxu2 %v9743_v7  ;;  %v9800_v63 = vld [vmem:[#allocation127_spill] sm:$0xff]  ;;  %v9801_v7 = vld [vmem:[#allocation132_spill] sm:$0xff] }
 0x52b   :  { %2274 = vmatpush.msra.mxu1 %v9744_v15  ;;  %2314 = vmatpush.msra.mxu3 %v9745_v17  ;;  %v9802_v15 = vld [vmem:[#allocation130_spill] sm:$0xff]  ;;  %v9803_v17 = vld [vmem:[#allocation129_spill] sm:$0xff] }
 0x52c   :  { %2256 = vmatpush.msra.mxu0 %v9746_v18  ;;  %2296 = vmatpush.msra.mxu2 %v9747_v22  ;;  %v9804_v18 = vld [vmem:[#allocation131_spill] sm:$0xff]  ;;  %v9805_v22 = vld [vmem:[#allocation136_spill] sm:$0xff] }
 0x52d   :  { %2275 = vmatpush.msra.mxu1 %v9748_v23  ;;  %2315 = vmatpush.msra.mxu3 %v9749_v24  ;;  %v9806_v23 = vld [vmem:[#allocation134_spill] sm:$0xff]  ;;  %v9807_v24 = vld [vmem:[#allocation133_spill] sm:$0xff] }
 0x52e   :  { %2257 = vmatpush.msra.mxu0 %v9750_v39  ;;  %2297 = vmatpush.msra.mxu2 %v9751_v41  ;;  %v9808_v39 = vld [vmem:[#allocation135_spill] sm:$0xff]  ;;  %v9809_v41 = vld [vmem:[#allocation140_spill] sm:$0xff] }
 0x52f   :  { %2276 = vmatpush.msra.mxu1 %v9752_v42  ;;  %2316 = vmatpush.msra.mxu3 %v9753_v43  ;;  %v9810_v42 = vld [vmem:[#allocation138_spill] sm:$0xff]  ;;  %v9811_v43 = vld [vmem:[#allocation137_spill] sm:$0xff] }
 0x530   :  { %2258 = vmatpush.msra.mxu0 %v9754_v45  ;;  %2298 = vmatpush.msra.mxu2 %v9755_v47  ;;  %v9812_v45 = vld [vmem:[#allocation139_spill] sm:$0xff]  ;;  %v9813_v47 = vld [vmem:[#allocation144_spill] sm:$0xff] }
 0x531   :  { %2277 = vmatpush.msra.mxu1 %v9756_v52  ;;  %2317 = vmatpush.msra.mxu3 %v9757_v55  ;;  %v9814_v52 = vld [vmem:[#allocation142_spill] sm:$0xff]  ;;  %v9815_v55 = vld [vmem:[#allocation141_spill] sm:$0xff] }
 0x532   :  { %2259 = vmatpush.msra.mxu0 %v9758_v56  ;;  %2299 = vmatpush.msra.mxu2 %v9759_v58  ;;  %v9816_v56 = vld [vmem:[#allocation143_spill] sm:$0xff] }
 0x533   :  { %2278 = vmatpush.msra.mxu1 %v9760_v59  ;;  %2318 = vmatpush.msra.mxu3 %v9761_v62  ;;  %v9817_v58 = vld [vmem:[#allocation147_spill] sm:$0xff]  ;;  %v9818_v59 = vld [vmem:[#allocation146_spill] sm:$0xff]  ;;  %v9819_v62 = vld [vmem:[#allocation145_spill] sm:$0xff] }
 0x534   :  { %2260 = vmatpush.msra.mxu0 %v9762_v48  ;;  %2300 = vmatpush.msra.mxu2 %v9763_v38  ;;  %v9820_v48 = vld [vmem:[#allocation149_spill] sm:$0xff]  ;;  %v9821_v38 = vld [vmem:[#allocation151_spill] sm:$0xff] }
 0x535   :  { %2279 = vmatpush.msra.mxu1 %v9764_v11  ;;  %2319 = vmatpush.msra.mxu3 %v9765_v6  ;;  %v9822_v11 = vld [vmem:[#allocation148_spill] sm:$0xff]  ;;  %v9823_v6 = vld [vmem:[#allocation150_spill] sm:$0xff] }
 0x536   :  { %2261 = vmatpush.msra.mxu0 %v9766_v40  ;;  %2301 = vmatpush.msra.mxu2 %v9767_v36  ;;  %v9824_v40 = vld [vmem:[#allocation155_spill] sm:$0xff]  ;;  %v9825_v36 = vld [vmem:[#allocation157_spill] sm:$0xff] }
 0x537   :  { %2280 = vmatpush.msra.mxu1 %v9770_v5  ;;  %2320 = vmatpush.msra.mxu3 %v9771_v33  ;;  %v9828_v5 = vld [vmem:[#allocation152_spill] sm:$0xff]  ;;  %v9829_v33 = vld [vmem:[#allocation159_spill] sm:$0xff] }
 0x538   :  { %2326 = vmatpush.msrb.mxu0 %v9768_v32  ;;  %2366 = vmatpush.msrb.mxu2 %v9769_v31  ;;  %v9826_v32 = vld [vmem:[#allocation156_spill] sm:$0xff] }
 0x539   :  { %2281 = vmatpush.msra.mxu1 %v9774_v20  ;;  %2321 = vmatpush.msra.mxu3 %v9775_v30  ;;  %v9827_v31 = vld [vmem:[#allocation160_spill] sm:$0xff]  ;;  %v9832_v20 = vld [vmem:[#allocation162_spill] sm:$0xff]  ;;  %v9833_v30 = vld [vmem:[#allocation163_spill] sm:$0xff] }
 0x53a   :  { %2327 = vmatpush.msrb.mxu0 %v9772_v25  ;;  %2367 = vmatpush.msrb.mxu2 %v9773_v28  ;;  %v9830_v25 = vld [vmem:[#allocation158_spill] sm:$0xff]  ;;  %v9831_v28 = vld [vmem:[#allocation161_spill] sm:$0xff] }
 0x53b   :  { %2346 = vmatpush.msrb.mxu1 %v9778_v61  ;;  %2386 = vmatpush.msrb.mxu3 %v9779_v53 }
 0x53c   :  { %2328 = vmatpush.msrb.mxu0 %v9776_v34  ;;  %2368 = vmatpush.msrb.mxu2 %v9777_v60  ;;  %v9834_v34 = vld [vmem:[#allocation164_spill] sm:$0xff]  ;;  %v9835_v60 = vld [vmem:[#allocation165_spill] sm:$0xff] }
 0x53d   :  { %2347 = vmatpush.msrb.mxu1 %v9782_v26  ;;  %2387 = vmatpush.msrb.mxu3 %v9783_v46 }
 0x53e   :  { %2329 = vmatpush.msrb.mxu0 %v9780_v37  ;;  %2369 = vmatpush.msrb.mxu2 %v9781_v8 }
 0x53f   :  { %2348 = vmatpush.msrb.mxu1 %v9786_v54  ;;  %2388 = vmatpush.msrb.mxu3 %v9787_v50  ;;  %v9837_v54 = vld [vmem:[#allocation153_spill] sm:$0xff] }
 0x540   :  { %2330 = vmatpush.msrb.mxu0 %v9784_v16  ;;  %2370 = vmatpush.msrb.mxu2 %v9785_v0  ;;  %v9836_v16 = vld [vmem:[#allocation154_spill] sm:$0xff] }
 0x541   :  { %2349 = vmatpush.msrb.mxu1 %v9790_v9  ;;  %2389 = vmatpush.msrb.mxu3 %v9791_v12 }
 0x542   :  { %2331 = vmatpush.msrb.mxu0 %v9788_v2  ;;  %2371 = vmatpush.msrb.mxu2 %v9789_v4 }
 0x543   :  { %2350 = vmatpush.msrb.mxu1 %v9794_v14  ;;  %2390 = vmatpush.msrb.mxu3 %v9795_v29 }
 0x544   :  { %2332 = vmatpush.msrb.mxu0 %v9792_v19  ;;  %2372 = vmatpush.msrb.mxu2 %v9793_v21 }
 0x545   :  { %2351 = vmatpush.msrb.mxu1 %v9798_v10  ;;  %2391 = vmatpush.msrb.mxu3 %v9799_v27 }
 0x546   :  { %2333 = vmatpush.msrb.mxu0 %v9796_v35  ;;  %2373 = vmatpush.msrb.mxu2 %v9797_v49 }
 0x547   :  { %2352 = vmatpush.msrb.mxu1 %v9802_v15  ;;  %2392 = vmatpush.msrb.mxu3 %v9803_v17 }
 0x548   :  { %2334 = vmatpush.msrb.mxu0 %v9800_v63  ;;  %2374 = vmatpush.msrb.mxu2 %v9801_v7 }
 0x549   :  { %2353 = vmatpush.msrb.mxu1 %v9806_v23  ;;  %2393 = vmatpush.msrb.mxu3 %v9807_v24 }
 0x54a   :  { %2335 = vmatpush.msrb.mxu0 %v9804_v18  ;;  %2375 = vmatpush.msrb.mxu2 %v9805_v22 }
 0x54b   :  { %2354 = vmatpush.msrb.mxu1 %v9810_v42  ;;  %2394 = vmatpush.msrb.mxu3 %v9811_v43 }
 0x54c   :  { %2336 = vmatpush.msrb.mxu0 %v9808_v39  ;;  %2376 = vmatpush.msrb.mxu2 %v9809_v41 }
 0x54d   :  { %2355 = vmatpush.msrb.mxu1 %v9814_v52  ;;  %2395 = vmatpush.msrb.mxu3 %v9815_v55 }
 0x54e   :  { %2337 = vmatpush.msrb.mxu0 %v9812_v45  ;;  %2377 = vmatpush.msrb.mxu2 %v9813_v47  ;;  %v2424_v45 = vld [vmem:[%s7760_s7 + $0x70] sm:$0xff] }
 0x54f   :  { %2356 = vmatpush.msrb.mxu1 %v9818_v59  ;;  %2396 = vmatpush.msrb.mxu3 %v9819_v62  ;;  %v2441_v59 = vld [vmem:[%s7760_s7 + $0xf8] sm:$0xff] }
 0x550   :  { %2338 = vmatpush.msrb.mxu0 %v9816_v56  ;;  %2378 = vmatpush.msrb.mxu2 %v9817_v58  ;;  %v2422_v58 = vld [vmem:[%s7760_s7 + $0x60] sm:$0xff]  ;;  %v2421_v62 = vld [vmem:[%s7760_s7 + $0x58] sm:$0xff] }
 0x551   :  { %2357 = vmatpush.msrb.mxu1 %v9822_v11  ;;  %2397 = vmatpush.msrb.mxu3 %v9823_v6  ;;  %v2439_v11 = vld [vmem:[%s7760_s7 + $0xe8] sm:$0xff] }
 0x552   :  { %2339 = vmatpush.msrb.mxu0 %v9820_v48  ;;  %2379 = vmatpush.msrb.mxu2 %v9821_v38  ;;  %v2440_v48 = vld [vmem:[%s7760_s7 + $0xf0] sm:$0xff]  ;;  %v2419_v6 = vld [vmem:[%s7760_s7 + $0x48] sm:$0xff] }
 0x553   :  { %2358 = vmatpush.msrb.mxu1 %v9826_v32  ;;  %2398 = vmatpush.msrb.mxu3 %v9827_v31  ;;  %v2420_v38 = vld [vmem:[%s7760_s7 + $0x50] sm:$0xff]  ;;  %v2437_v32 = vld [vmem:[%s7760_s7 + $0xd8] sm:$0xff] }
 0x554   :  { %2340 = vmatpush.msrb.mxu0 %v9824_v40  ;;  %2380 = vmatpush.msrb.mxu2 %v9825_v36  ;;  %v2438_v40 = vld [vmem:[%s7760_s7 + $0xe0] sm:$0xff]  ;;  %v2417_v31 = vld [vmem:[%s7760_s7 + $0x38] sm:$0xff] }
 0x555   :  { %2359 = vmatpush.msrb.mxu1 %v9830_v25  ;;  %2399 = vmatpush.msrb.mxu3 %v9831_v28  ;;  %v2418_v36 = vld [vmem:[%s7760_s7 + $0x40] sm:$0xff]  ;;  %v2435_v25 = vld [vmem:[%s7760_s7 + $0xc8] sm:$0xff] }
 0x556   :  { %2341 = vmatpush.msrb.mxu0 %v9828_v5  ;;  %2381 = vmatpush.msrb.mxu2 %v9829_v33  ;;  %v2436_v5 = vld [vmem:[%s7760_s7 + $0xd0] sm:$0xff]  ;;  %v2415_v28 = vld [vmem:[%s7760_s7 + $0x28] sm:$0xff] }
 0x557   :  { %2360 = vmatpush.msrb.mxu1 %v9832_v20  ;;  %2400 = vmatpush.msrb.mxu3 %v9833_v30  ;;  %v2416_v33 = vld [vmem:[%s7760_s7 + $0x30] sm:$0xff]  ;;  %v2434_v20 = vld [vmem:[%s7760_s7 + $0xc0] sm:$0xff] }
 0x558   :  { %v2414_v30 = vld [vmem:[%s7760_s7 + $0x20] sm:$0xff] }
 0x559   :  { %2361 = vmatpush.msrb.mxu1 %v9834_v34  ;;  %2401 = vmatpush.msrb.mxu3 %v9835_v60  ;;  %v2433_v34 = vld [vmem:[%s7760_s7 + $0xb8] sm:$0xff] }
 0x55a   :  { %v2413_v60 = vld [vmem:[%s7760_s7 + $0x18] sm:$0xff] }
 0x56d   :  { %v2013_v61 = vpop.f32.mrf.mxu0 }
 0x56f   :  { %v134_v8 = vpop.permute.xlu2 %133 }
 0x570   :  { %v156_v0 = vmul.f32 %v9836_v16, %v134_v8  ;;  %v157_v14 = vmul.f32 %v4187_v57, %v134_v8  ;;  %v2411_v8 = vld [vmem:[%s7760_s7 + $0x8] sm:$0xff]  ;;  %v2429_v16 = vld [vmem:[%s7760_s7 + $0x98] sm:$0xff] }
 0x573   :  { %v2033_v53 = vpop.f32.mrf.mxu1  ;;  %v2053_v37 = vpop.f32.mrf.mxu2 }
 0x574   :  { %v2034_v21 = vadd.f32 %v2033_v53, %v2013_v61  ;;  %v2432_v61 = vld [vmem:[%s7760_s7 + $0xb0] sm:$0xff] }
 0x575   :  { %v2412_v53 = vld [vmem:[%s7760_s7 + $0x10] sm:$0xff] }
 0x576   :  { %v2093_v2 = vpop.f32.mrf.mxu0 }
 0x577   :  { %v2094_v63 = vadd.f32 %v2093_v2, %v2034_v21 }
 0x579   :  { %v2073_v26 = vpop.f32.mrf.mxu3 }
 0x57a   :  { %v2074_v17 = vadd.f32 %v2073_v26, %v2053_v37  ;;  %v2431_v37 = vld [vmem:[%s7760_s7 + $0xa8] sm:$0xff]  ;;  %v2430_v26 = vld [vmem:[%s7760_s7 + $0xa0] sm:$0xff] }
 0x57c   :  { %v2133_v12 = vpop.f32.mrf.mxu2 }
 0x57d   :  { %v2113_v4 = vpop.f32.mrf.mxu1  ;;  %v2134_v41 = vadd.f32 %v2133_v12, %v2074_v17 }
 0x57e   :  { %v2114_v18 = vadd.f32 %v2113_v4, %v2094_v63 }
 0x580   :  { %v2156_v57 = vadd.f32 %v2114_v18, %v4422_v1 }
 0x583   :  { %v2153_v19 = vpop.f32.mrf.mxu3 }
 0x584   :  { %v2154_v43 = vadd.f32 %v2153_v19, %v2134_v41 }
 0x586   :  { %v2157_v47 = vadd.f32 %v2154_v43, %v4430_v13 }
 0x587   :  { %v79_v46 = vpop.permute.xlu1 %78 }
 0x588   :  { %v102_v50 = vmul.f32 %v9837_v54, %v79_v46  ;;  %v103_v29 = vmul.f32 %v4185_v44, %v79_v46  ;;  %v2410_v46 = vld [vmem:[%s7760_s7] sm:$0xff]  ;;  %v2427_v54 = vld [vmem:[%s7760_s7 + $0x88] sm:$0xff] }
 0x58a   :  { %v172_v9 = vadd.f32 %v156_v0, %v102_v50  ;;  %v173_v7 = vadd.f32 %v157_v14, %v103_v29  ;;  %v2428_v0 = vld [vmem:[%s7760_s7 + $0x90] sm:$0xff]  ;;  %v2426_v50 = vld [vmem:[%s7760_s7 + $0x80] sm:$0xff] }
 0x58c   :  { %v194_v35 = vadd.f32 %v4189_v3, %v172_v9  ;;  %v195_v24 = vadd.f32 %v4194_v51, %v173_v7  ;;  %v2425_v3 = vld [vmem:[%s7760_s7 + $0x78] sm:$0xff]  ;;  %v2423_v51 = vld [vmem:[%s7760_s7 + $0x68] sm:$0xff] }
 0x590   :  { %v2179_v49 = vpop.f32.mrf.mxu0 }
 0x596   :  { %v2199_v10 = vpop.f32.mrf.mxu1  ;;  %v2219_v22 = vpop.f32.mrf.mxu2 }
 0x597   :  { %v2200_v27 = vadd.f32 %v2199_v10, %v2179_v49 }
 0x599   :  { %v2242_v15 = vadd.f32 %v2200_v27, %v194_v35 }
 0x59b   :  { %2560 = vtanh.f32 %v2242_v15 }
 0x59c   :  { %v2239_v23 = vpop.f32.mrf.mxu3 }
 0x59d   :  { %v2240_v39 = vadd.f32 %v2239_v23, %v2219_v22  ;;  %v2507_v23 = vld [vmem:[%s7761_s8] ss:$0 sm:$0xff] }
 0x59f   :  { %v2243_v44 = vadd.f32 %v2240_v39, %v195_v24 }
 0x5a1   :  { %v2561_v42 = vpop.eup %2560  ;;  %2562 = vtanh.f32 %v2243_v44 }
 0x5a2   :  { %2262 = vmatmul.f32.vlgmr.msra.gmra.mxu0 %v2561_v42  ;;  %2302 = vmatmul.f32.vlgmr.msra.gmra.mxu2 %v2561_v42  ;;  %2564 = vtanh.f32 %v2156_v57 }
 0x5a3   :  { %2446 = vmatpush.msra.mxu0 %v2425_v3  ;;  %2566 = vtanh.f32 %v2157_v47 }
 0x5a5   :  { %2447 = vmatpush.msra.mxu0 %v2424_v45 }
 0x5a7   :  { %v2563_v52 = vpop.eup %2562  ;;  %2448 = vmatpush.msra.mxu0 %v2423_v51 }
 0x5a8   :  { %2282 = vmatmul.f32.vlgmr.msra.gmra.mxu1 %v2563_v52  ;;  %2322 = vmatmul.f32.vlgmr.msra.gmra.mxu3 %v2563_v52  ;;  %v2565_v55 = vpop.eup %2564 }
 0x5a9   :  { %v2567_v56 = vpop.eup %2566  ;;  %2449 = vmatpush.msra.mxu0 %v2422_v58  ;;  %2466 = vmatpush.msra.mxu1 %v2441_v59 }
 0x5aa   :  { %2342 = vmatmul.f32.vlgmr.msrb.gmra.mxu0 %v2565_v55  ;;  %2382 = vmatmul.f32.vlgmr.msrb.gmra.mxu2 %v2565_v55 }
 0x5ab   :  { %2450 = vmatpush.msra.mxu0 %v2421_v62  ;;  %2467 = vmatpush.msra.mxu1 %v2440_v48 }
 0x5ad   :  { %2451 = vmatpush.msra.mxu0 %v2420_v38  ;;  %2468 = vmatpush.msra.mxu1 %v2439_v11 }
 0x5af   :  { %2452 = vmatpush.msra.mxu0 %v2419_v6  ;;  %2469 = vmatpush.msra.mxu1 %v2438_v40 }
 0x5b0   :  { %2362 = vmatmul.f32.vlgmr.msrb.gmra.mxu1 %v2567_v56  ;;  %2402 = vmatmul.f32.vlgmr.msrb.gmra.mxu3 %v2567_v56 }
 0x5b1   :  { %2453 = vmatpush.msra.mxu0 %v2418_v36  ;;  %2470 = vmatpush.msra.mxu1 %v2437_v32 }
 0x5b3   :  { %2454 = vmatpush.msra.mxu0 %v2417_v31  ;;  %2471 = vmatpush.msra.mxu1 %v2436_v5 }
 0x5b5   :  { %2455 = vmatpush.msra.mxu0 %v2416_v33  ;;  %2472 = vmatpush.msra.mxu1 %v2435_v25 }
 0x5b7   :  { %2456 = vmatpush.msra.mxu0 %v2415_v28  ;;  %2473 = vmatpush.msra.mxu1 %v2434_v20 }
 0x5b9   :  { %2457 = vmatpush.msra.mxu0 %v2414_v30  ;;  %2474 = vmatpush.msra.mxu1 %v2433_v34 }
 0x5bb   :  { %2458 = vmatpush.msra.mxu0 %v2413_v60  ;;  %2475 = vmatpush.msra.mxu1 %v2432_v61 }
 0x5bd   :  { %2459 = vmatpush.msra.mxu0 %v2412_v53  ;;  %2476 = vmatpush.msra.mxu1 %v2431_v37 }
 0x5bf   :  { %2460 = vmatpush.msra.mxu0 %v2411_v8  ;;  %2477 = vmatpush.msra.mxu1 %v2430_v26 }
 0x5c1   :  { %2461 = vmatpush.msra.mxu0 %v2410_v46  ;;  %2478 = vmatpush.msra.mxu1 %v2429_v16 }
 0x5c3   :  { %2479 = vmatpush.msra.mxu1 %v2428_v0 }
 0x5c5   :  { %2480 = vmatpush.msra.mxu1 %v2427_v54 }
 0x5c7   :  { %2481 = vmatpush.msra.mxu1 %v2426_v50 }
 0x61f   :  { %v2263_v2 = vpop.f32.mrf.mxu0 }
 0x625   :  { %v2283_v4 = vpop.f32.mrf.mxu1  ;;  %v2303_v9 = vpop.f32.mrf.mxu2 }
 0x626   :  { %v2284_v12 = vadd.f32 %v2283_v4, %v2263_v2 }
 0x627   :  { %v2343_v19 = vpop.f32.mrf.mxu0 }
 0x628   :  { %v2344_v14 = vadd.f32 %v2343_v19, %v2284_v12 }
 0x62b   :  { %v2323_v21 = vpop.f32.mrf.mxu3 }
 0x62c   :  { %v2324_v35 = vadd.f32 %v2323_v21, %v2303_v9 }
 0x62d   :  { %v2363_v29 = vpop.f32.mrf.mxu1  ;;  %v2383_v10 = vpop.f32.mrf.mxu2 }
 0x62e   :  { %v2364_v49 = vadd.f32 %v2363_v29, %v2344_v14  ;;  %v2384_v63 = vadd.f32 %v2383_v10, %v2324_v35 }
 0x630   :  { %v2406_v27 = vadd.f32 %v2364_v49, %v4422_v1 }
 0x632   :  { %2568 = vtanh.f32 %v2406_v27 }
 0x633   :  { %v2403_v7 = vpop.f32.mrf.mxu3 }
 0x634   :  { %v2404_v15 = vadd.f32 %v2403_v7, %v2384_v63 }
 0x636   :  { %v2407_v17 = vadd.f32 %v2404_v15, %v4430_v13 }
 0x638   :  { %v2569_v18 = vpop.eup %2568  ;;  %2570 = vtanh.f32 %v2407_v17 }
 0x639   :  { %2462 = vmatmul.f32.vlgmr.msra.gmra.mxu0 %v2569_v18 }
 0x63e   :  { %v2571_v22 = vpop.eup %2570 }
 0x63f   :  { %2482 = vmatmul.f32.vlgmr.msra.gmra.mxu1 %v2571_v22 }
 0x6b6   :  { %v2463_v24 = vpop.f32.mrf.mxu0 }
 0x6b7   :  { %v2464_v39 = vadd.f32 %v2507_v23, %v2463_v24 }
 0x6bc   :  { %v2483_v57 = vpop.f32.mrf.mxu1 }
 0x6bd   :  { %v2484_v41 = vadd.f32 %v2483_v57, %v2464_v39 }
 0x6bf   :  { %2486 = vst [vmem:[%s7762_s9] sm:$0xff] %v2484_v41 }

</bundles_post_ra>
